<compile_context>
chip_gen: v6e
topology: v6e:2x2x1
jax: 0.10.0
libtpu: 0.0.40
codegen_flags: <defaults>
</compile_context>

<pallas_src>
import jax
import jax.numpy as jnp
from jax.experimental import pallas as pl
from jax.experimental.pallas import tpu as pltpu

# --- model dims (small, synthetic) ---
B = 2            # batch
S = 8            # sequence length
D = 128          # hidden (word_embedding_dimension)
H = 4            # attention heads
DH = D // H      # head dim
FFN = 256        # intermediate size
VOCAB = 1000
N_LAYERS = 2
TRANSFORM_DIM = 64   # transform_dim != -1  => projection layer is applied
OUT_PAD = 128        # lane-dense padded projection width (sliced to TRANSFORM_DIM outside)
LN_EPS = 1e-12


def _layernorm(x, g, b):
    mu = jnp.mean(x, axis=-1, keepdims=True)
    var = jnp.mean((x - mu) ** 2, axis=-1, keepdims=True)
    return (x - mu) * jax.lax.rsqrt(var + LN_EPS) * g + b


# -------------------- fused Pallas kernel --------------------

def fused_encoder_kernel(x_ref, mask3_ref, pool_ref,
                         emb_g_ref, emb_b_ref,
                         wqkv_ref, bqkv_ref, wo_ref, bo_ref,
                         ln1_g_ref, ln1_b_ref, w1_ref, b1_ref,
                         w2_ref, b2_ref, ln2_g_ref, ln2_b_ref,
                         wt_ref, bt_ref,
                         out_ref,
                         ctx_ref):
    """Whole forward pass: emb-LN -> N_LAYERS x (MHA + FFN, post-LN) -> pool -> project."""
    # Flatten batch into matmul rows: (B*S, D) = (16, 128).
    xf = x_ref[...].reshape(B * S, D).astype(jnp.float32)
    xf = _layernorm(xf, emb_g_ref[...], emb_b_ref[...])

    scale = 1.0 / (DH ** 0.5)

    for l in range(N_LAYERS):                      # static layer loop
        # Fused QKV projection: one (16,128) @ (128,384) matmul.
        wqkv = wqkv_ref[l].astype(jnp.float32)
        qkv = jnp.dot(xf, wqkv, preferred_element_type=jnp.float32) + bqkv_ref[l]
        q = qkv[:, 0 * D:1 * D]
        k = qkv[:, 1 * D:2 * D]
        v = qkv[:, 2 * D:3 * D]

        # Attention per batch element (S x S is batch-local); heads write straight
        # into the (B*S, D) VMEM scratch -> no lane concatenation.
        for b in range(B):                         # static batch loop
            qb = q[b * S:(b + 1) * S, :]           # (S, D)
            vb = v[b * S:(b + 1) * S, :]           # (S, D)
            kbT = k[b * S:(b + 1) * S, :].T        # (D, S): one transpose per batch
            bias = (1.0 - mask3_ref[b]) * -1e9     # (1, S) additive key mask
            for h in range(H):                     # static head loop
                cs = slice(h * DH, (h + 1) * DH)
                s = jnp.dot(qb[:, cs], kbT[cs, :],
                            preferred_element_type=jnp.float32) * scale + bias
                s = s - jnp.max(s, axis=-1, keepdims=True)
                p = jnp.exp(s)
                p = p * pl.reciprocal(jnp.sum(p, axis=-1, keepdims=True), approx=True)
                ctx_ref[pl.ds(b * S, S), pl.ds(h * DH, DH)] = jnp.dot(
                    p, vb[:, cs], preferred_element_type=jnp.float32)

        attn = jnp.dot(ctx_ref[...], wo_ref[l].astype(jnp.float32),
                       preferred_element_type=jnp.float32) + bo_ref[l]
        xf = _layernorm(xf + attn, ln1_g_ref[l], ln1_b_ref[l])

        ff = jnp.dot(xf, w1_ref[l].astype(jnp.float32),
                     preferred_element_type=jnp.float32) + b1_ref[l]
        # TODO(synk): roberta uses exact (erf) GELU; tanh approximation used for TPU lowering.
        ff = jax.nn.gelu(ff, approximate=True)
        ff = jnp.dot(ff, w2_ref[l].astype(jnp.float32),
                     preferred_element_type=jnp.float32) + b2_ref[l]
        xf = _layernorm(xf + ff, ln2_g_ref[l], ln2_b_ref[l])

    # Masked mean pooling for all batch rows with one (B, B*S) @ (B*S, D) matmul.
    pm = pool_ref[...]                                               # (B, B*S) block mask
    pooled_sum = jnp.dot(pm, xf, preferred_element_type=jnp.float32) # (B, D)
    counts = jnp.maximum(jnp.sum(pm, axis=-1, keepdims=True), 1e-9)  # sentence-transformers clamp
    pooled = pooled_sum * pl.reciprocal(counts, approx=True)

    # Linear(D -> TRANSFORM_DIM), computed into a lane-dense 128-wide padded slab.
    out_ref[...] = jnp.dot(pooled, wt_ref[...].astype(jnp.float32),
                           preferred_element_type=jnp.float32) + bt_ref[...]


# -------------------- wrapper --------------------

@jax.jit
def custom_encoder_forward(input_ids, attention_mask, params):
    mask_f = attention_mask.astype(jnp.float32)                 # (B, S)
    mask3 = mask_f.reshape(B, 1, S)                              # attention key mask
    # Block-diagonal pooling matrix: pool_mat[b, b*S+s] = mask[b, s]  (layout plumbing only).
    pool_mat = (jnp.eye(B, dtype=jnp.float32)[:, :, None] * mask_f[None, :, :]).reshape(B, B * S)

    # Embedding gather + positional embedding in plain JAX (data-dependent gather);
    # the embedding LayerNorm and everything downstream run inside the fused kernel.
    x = params['tok_emb'][input_ids] + params['pos_emb'][None]   # (B, S, D)

    out_pad = pl.pallas_call(
        fused_encoder_kernel,
        out_shape=jax.ShapeDtypeStruct((B, OUT_PAD), jnp.float32),
        scratch_shapes=[pltpu.VMEM((B * S, D), jnp.float32)],    # attention context scratch
    )(x, mask3, pool_mat,
      params['emb_ln_g'], params['emb_ln_b'],
      params['wqkv'], params['bqkv'], params['wo'], params['bo'],
      params['ln1_g'], params['ln1_b'], params['w1'], params['b1'],
      params['w2'], params['b2'], params['ln2_g'], params['ln2_b'],
      params['wt'], params['bt'])

    return out_pad[:, :TRANSFORM_DIM]                            # (B, TRANSFORM_DIM)


# -------------------- deterministic parameter init --------------------

def init_params(key):
    ks = iter(jax.random.split(key, 16))

    def nrm(shape, scale=0.02):
        return scale * jax.random.normal(next(ks), shape, dtype=jnp.float32)

    # Projection weights padded to a lane-dense 128-wide slab (zeros beyond TRANSFORM_DIM).
    wt = jnp.zeros((D, OUT_PAD), jnp.float32).at[:, :TRANSFORM_DIM].set(nrm((D, TRANSFORM_DIM)))
    bt = jnp.zeros((1, OUT_PAD), jnp.float32).at[:, :TRANSFORM_DIM].set(nrm((1, TRANSFORM_DIM)))

    params = {
        'tok_emb': nrm((VOCAB, D)),
        'pos_emb': nrm((S, D)),
        'emb_ln_g': jnp.ones((1, D), jnp.float32),
        'emb_ln_b': jnp.zeros((1, D), jnp.float32),
        # Per-layer weights stacked along a leading layer axis; big matrices in bf16
        # (halves weight DMA), biases / LN params in f32.
        'wqkv': nrm((N_LAYERS, D, 3 * D)).astype(jnp.bfloat16),   # fused Wq|Wk|Wv
        'bqkv': nrm((N_LAYERS, 1, 3 * D)),
        'wo':   nrm((N_LAYERS, D, D)).astype(jnp.bfloat16),
        'bo':   nrm((N_LAYERS, 1, D)),
        'ln1_g': jnp.ones((N_LAYERS, 1, D), jnp.float32),
        'ln1_b': jnp.zeros((N_LAYERS, 1, D), jnp.float32),
        'w1':   nrm((N_LAYERS, D, FFN)).astype(jnp.bfloat16),
        'b1':   nrm((N_LAYERS, 1, FFN)),
        'w2':   nrm((N_LAYERS, FFN, D)).astype(jnp.bfloat16),
        'b2':   nrm((N_LAYERS, 1, D)),
        'ln2_g': jnp.ones((N_LAYERS, 1, D), jnp.float32),
        'ln2_b': jnp.zeros((N_LAYERS, 1, D), jnp.float32),
        'wt': wt.astype(jnp.bfloat16),
        'bt': bt,
    }
    return params


if __name__ == "__main__":
    key = jax.random.PRNGKey(0)
    kp, kid = jax.random.split(key)
    params = init_params(kp)

    input_ids = jax.random.randint(kid, (B, S), 0, VOCAB, dtype=jnp.int32)
    attention_mask = jnp.array([[1, 1, 1, 1, 1, 1, 0, 0],
                                [1, 1, 1, 1, 0, 0, 0, 0]], dtype=jnp.int32)

    out = custom_encoder_forward(input_ids, attention_mask, params)
    out = jax.block_until_ready(out)

    assert out.shape == (B, TRANSFORM_DIM), out.shape
    assert out.dtype == jnp.float32
    assert bool(jnp.all(jnp.isfinite(out)))
    print("KERNEL_OK")
</pallas_src>

<mosaic_0001>
module attributes {stable_mosaic.version = 11 : i64} {
  func.func @fused_encoder_kernel(%arg0: memref<2x8x128xf32, #tpu.memory_space<vmem>>, %arg1: memref<2x1x8xf32, #tpu.memory_space<vmem>>, %arg2: memref<2x16xf32, #tpu.memory_space<vmem>>, %arg3: memref<1x128xf32, #tpu.memory_space<vmem>>, %arg4: memref<1x128xf32, #tpu.memory_space<vmem>>, %arg5: memref<2x128x384xbf16, #tpu.memory_space<vmem>>, %arg6: memref<2x1x384xf32, #tpu.memory_space<vmem>>, %arg7: memref<2x128x128xbf16, #tpu.memory_space<vmem>>, %arg8: memref<2x1x128xf32, #tpu.memory_space<vmem>>, %arg9: memref<2x1x128xf32, #tpu.memory_space<vmem>>, %arg10: memref<2x1x128xf32, #tpu.memory_space<vmem>>, %arg11: memref<2x128x256xbf16, #tpu.memory_space<vmem>>, %arg12: memref<2x1x256xf32, #tpu.memory_space<vmem>>, %arg13: memref<2x256x128xbf16, #tpu.memory_space<vmem>>, %arg14: memref<2x1x128xf32, #tpu.memory_space<vmem>>, %arg15: memref<2x1x128xf32, #tpu.memory_space<vmem>>, %arg16: memref<2x1x128xf32, #tpu.memory_space<vmem>>, %arg17: memref<128x128xbf16, #tpu.memory_space<vmem>>, %arg18: memref<1x128xf32, #tpu.memory_space<vmem>>, %arg19: memref<2x128xf32, #tpu.memory_space<vmem>>, %arg20: memref<16x128xf32, #tpu.memory_space<vmem>>) attributes {dimension_semantics = [], scalar_prefetch = 0 : i64, scratch_operands = 1 : i64, tpu.core_type = #tpu.core_type<tc>} {
    %c0 = arith.constant 0 : index
    %c0_0 = arith.constant 0 : index
    %c0_1 = arith.constant 0 : index
    %0 = vector.load %arg0[%c0, %c0_0, %c0_1] : memref<2x8x128xf32, #tpu.memory_space<vmem>>, vector<2x8x128xf32>
    %1 = vector.shape_cast %0 : vector<2x8x128xf32> to vector<16x128xf32>
    %c0_2 = arith.constant 0 : index
    %c0_3 = arith.constant 0 : index
    %2 = vector.load %arg3[%c0_2, %c0_3] : memref<1x128xf32, #tpu.memory_space<vmem>>, vector<1x128xf32>
    %c0_4 = arith.constant 0 : index
    %c0_5 = arith.constant 0 : index
    %3 = vector.load %arg4[%c0_4, %c0_5] : memref<1x128xf32, #tpu.memory_space<vmem>>, vector<1x128xf32>
    %cst = arith.constant dense<0.000000e+00> : vector<16xf32>
    %4 = vector.multi_reduction <add>, %1, %cst [1] : vector<16x128xf32> to vector<16xf32>
    %5 = vector.shape_cast %4 : vector<16xf32> to vector<16x1xf32>
    %cst_6 = arith.constant 1.280000e+02 : f32
    %6 = vector.broadcast %cst_6 : f32 to vector<16x1xf32>
    %7 = arith.divf %5, %6 : vector<16x1xf32>
    %8 = vector.broadcast %7 : vector<16x1xf32> to vector<16x128xf32>
    %9 = arith.subf %1, %8 : vector<16x128xf32>
    %10 = arith.mulf %9, %9 : vector<16x128xf32>
    %cst_7 = arith.constant dense<0.000000e+00> : vector<16xf32>
    %11 = vector.multi_reduction <add>, %10, %cst_7 [1] : vector<16x128xf32> to vector<16xf32>
    %12 = vector.shape_cast %11 : vector<16xf32> to vector<16x1xf32>
    %cst_8 = arith.constant 1.280000e+02 : f32
    %13 = vector.broadcast %cst_8 : f32 to vector<16x1xf32>
    %14 = arith.divf %12, %13 : vector<16x1xf32>
    %15 = vector.broadcast %7 : vector<16x1xf32> to vector<16x128xf32>
    %16 = arith.subf %1, %15 : vector<16x128xf32>
    %cst_9 = arith.constant 9.99999996E-13 : f32
    %17 = vector.broadcast %cst_9 : f32 to vector<16x1xf32>
    %18 = arith.addf %14, %17 : vector<16x1xf32>
    %19 = math.rsqrt %18 : vector<16x1xf32>
    %20 = vector.broadcast %19 : vector<16x1xf32> to vector<16x128xf32>
    %21 = arith.mulf %16, %20 : vector<16x128xf32>
    %22 = vector.broadcast %2 : vector<1x128xf32> to vector<16x128xf32>
    %23 = arith.mulf %21, %22 : vector<16x128xf32>
    %24 = vector.broadcast %3 : vector<1x128xf32> to vector<16x128xf32>
    %25 = arith.addf %23, %24 : vector<16x128xf32>
    %c0_10 = arith.constant 0 : index
    %c0_11 = arith.constant 0 : index
    %c0_12 = arith.constant 0 : index
    %26 = vector.load %arg5[%c0_10, %c0_11, %c0_12] : memref<2x128x384xbf16, #tpu.memory_space<vmem>>, vector<1x128x384xbf16>
    %27 = vector.shape_cast %26 : vector<1x128x384xbf16> to vector<128x384xbf16>
    %28 = arith.extf %27 : vector<128x384xbf16> to vector<128x384xf32>
    %cst_13 = arith.constant dense<0.000000e+00> : vector<16x384xf32>
    %29 = tpu.matmul %25, %28, %cst_13 {dimension_numbers = #tpu.dot_dimension_numbers<[1], [0], [0], [1], [0, 0, 1, 1], [], []>} : vector<16x128xf32>, vector<128x384xf32>, vector<16x384xf32> -> vector<16x384xf32>
    %c0_14 = arith.constant 0 : index
    %c0_15 = arith.constant 0 : index
    %c0_16 = arith.constant 0 : index
    %30 = vector.load %arg6[%c0_14, %c0_15, %c0_16] : memref<2x1x384xf32, #tpu.memory_space<vmem>>, vector<1x1x384xf32>
    %31 = vector.shape_cast %30 : vector<1x1x384xf32> to vector<1x384xf32>
    %32 = vector.broadcast %31 : vector<1x384xf32> to vector<16x384xf32>
    %33 = arith.addf %29, %32 : vector<16x384xf32>
    %34 = vector.extract_strided_slice %33 {offsets = [0, 0], sizes = [16, 128], strides = [1, 1]} : vector<16x384xf32> to vector<16x128xf32>
    %35 = vector.extract_strided_slice %33 {offsets = [0, 128], sizes = [16, 128], strides = [1, 1]} : vector<16x384xf32> to vector<16x128xf32>
    %36 = vector.extract_strided_slice %33 {offsets = [0, 256], sizes = [16, 128], strides = [1, 1]} : vector<16x384xf32> to vector<16x128xf32>
    %37 = vector.extract_strided_slice %34 {offsets = [0, 0], sizes = [8, 128], strides = [1, 1]} : vector<16x128xf32> to vector<8x128xf32>
    %38 = vector.extract_strided_slice %36 {offsets = [0, 0], sizes = [8, 128], strides = [1, 1]} : vector<16x128xf32> to vector<8x128xf32>
    %39 = vector.extract_strided_slice %35 {offsets = [0, 0], sizes = [8, 128], strides = [1, 1]} : vector<16x128xf32> to vector<8x128xf32>
    %40 = tpu.transpose %39, [1, 0] : vector<8x128xf32> -> vector<128x8xf32>
    %c0_17 = arith.constant 0 : index
    %c0_18 = arith.constant 0 : index
    %c0_19 = arith.constant 0 : index
    %41 = vector.load %arg1[%c0_17, %c0_18, %c0_19] : memref<2x1x8xf32, #tpu.memory_space<vmem>>, vector<1x1x8xf32>
    %42 = vector.shape_cast %41 : vector<1x1x8xf32> to vector<1x8xf32>
    %cst_20 = arith.constant 1.000000e+00 : f32
    %43 = vector.broadcast %cst_20 : f32 to vector<1x8xf32>
    %44 = arith.subf %43, %42 : vector<1x8xf32>
    %cst_21 = arith.constant -1.000000e+09 : f32
    %45 = vector.broadcast %cst_21 : f32 to vector<1x8xf32>
    %46 = arith.mulf %44, %45 : vector<1x8xf32>
    %47 = vector.extract_strided_slice %37 {offsets = [0, 0], sizes = [8, 32], strides = [1, 1]} : vector<8x128xf32> to vector<8x32xf32>
    %48 = vector.extract_strided_slice %40 {offsets = [0, 0], sizes = [32, 8], strides = [1, 1]} : vector<128x8xf32> to vector<32x8xf32>
    %cst_22 = arith.constant dense<0.000000e+00> : vector<8x8xf32>
    %49 = tpu.matmul %47, %48, %cst_22 {dimension_numbers = #tpu.dot_dimension_numbers<[1], [0], [0], [1], [0, 0, 1, 1], [], []>} : vector<8x32xf32>, vector<32x8xf32>, vector<8x8xf32> -> vector<8x8xf32>
    %cst_23 = arith.constant 0.176776692 : f32
    %50 = vector.broadcast %cst_23 : f32 to vector<8x8xf32>
    %51 = arith.mulf %49, %50 : vector<8x8xf32>
    %52 = vector.broadcast %46 : vector<1x8xf32> to vector<8x8xf32>
    %53 = arith.addf %51, %52 : vector<8x8xf32>
    %cst_24 = arith.constant dense<0xFF800000> : vector<8xf32>
    %54 = vector.multi_reduction <maximumf>, %53, %cst_24 [1] : vector<8x8xf32> to vector<8xf32>
    %55 = vector.shape_cast %54 : vector<8xf32> to vector<8x1xf32>
    %56 = vector.broadcast %55 : vector<8x1xf32> to vector<8x8xf32>
    %57 = arith.subf %53, %56 : vector<8x8xf32>
    %58 = math.exp %57 : vector<8x8xf32>
    %cst_25 = arith.constant dense<0.000000e+00> : vector<8xf32>
    %59 = vector.multi_reduction <add>, %58, %cst_25 [1] : vector<8x8xf32> to vector<8xf32>
    %60 = vector.shape_cast %59 : vector<8xf32> to vector<8x1xf32>
    %61 = tpu.reciprocal %60 {approx = true} : vector<8x1xf32> -> vector<8x1xf32>
    %62 = vector.broadcast %61 : vector<8x1xf32> to vector<8x8xf32>
    %63 = arith.mulf %58, %62 : vector<8x8xf32>
    %64 = vector.extract_strided_slice %38 {offsets = [0, 0], sizes = [8, 32], strides = [1, 1]} : vector<8x128xf32> to vector<8x32xf32>
    %cst_26 = arith.constant dense<0.000000e+00> : vector<8x32xf32>
    %65 = tpu.matmul %63, %64, %cst_26 {dimension_numbers = #tpu.dot_dimension_numbers<[1], [0], [0], [1], [0, 0, 1, 1], [], []>} : vector<8x8xf32>, vector<8x32xf32>, vector<8x32xf32> -> vector<8x32xf32>
    %c0_27 = arith.constant 0 : index
    %c0_28 = arith.constant 0 : index
    %66 = vector.load %arg20[%c0_27, %c0_28] : memref<16x128xf32, #tpu.memory_space<vmem>>, vector<8x32xf32>
    tpu.vector_store %arg20[%c0_27, %c0_28], %65 {strides = array<i32>} : memref<16x128xf32, #tpu.memory_space<vmem>>, vector<8x32xf32>,
    %67 = vector.extract_strided_slice %37 {offsets = [0, 32], sizes = [8, 32], strides = [1, 1]} : vector<8x128xf32> to vector<8x32xf32>
    %68 = vector.extract_strided_slice %40 {offsets = [32, 0], sizes = [32, 8], strides = [1, 1]} : vector<128x8xf32> to vector<32x8xf32>
    %cst_29 = arith.constant dense<0.000000e+00> : vector<8x8xf32>
    %69 = tpu.matmul %67, %68, %cst_29 {dimension_numbers = #tpu.dot_dimension_numbers<[1], [0], [0], [1], [0, 0, 1, 1], [], []>} : vector<8x32xf32>, vector<32x8xf32>, vector<8x8xf32> -> vector<8x8xf32>
    %cst_30 = arith.constant 0.176776692 : f32
    %70 = vector.broadcast %cst_30 : f32 to vector<8x8xf32>
    %71 = arith.mulf %69, %70 : vector<8x8xf32>
    %72 = vector.broadcast %46 : vector<1x8xf32> to vector<8x8xf32>
    %73 = arith.addf %71, %72 : vector<8x8xf32>
    %cst_31 = arith.constant dense<0xFF800000> : vector<8xf32>
    %74 = vector.multi_reduction <maximumf>, %73, %cst_31 [1] : vector<8x8xf32> to vector<8xf32>
    %75 = vector.shape_cast %74 : vector<8xf32> to vector<8x1xf32>
    %76 = vector.broadcast %75 : vector<8x1xf32> to vector<8x8xf32>
    %77 = arith.subf %73, %76 : vector<8x8xf32>
    %78 = math.exp %77 : vector<8x8xf32>
    %cst_32 = arith.constant dense<0.000000e+00> : vector<8xf32>
    %79 = vector.multi_reduction <add>, %78, %cst_32 [1] : vector<8x8xf32> to vector<8xf32>
    %80 = vector.shape_cast %79 : vector<8xf32> to vector<8x1xf32>
    %81 = tpu.reciprocal %80 {approx = true} : vector<8x1xf32> -> vector<8x1xf32>
    %82 = vector.broadcast %81 : vector<8x1xf32> to vector<8x8xf32>
    %83 = arith.mulf %78, %82 : vector<8x8xf32>
    %84 = vector.extract_strided_slice %38 {offsets = [0, 32], sizes = [8, 32], strides = [1, 1]} : vector<8x128xf32> to vector<8x32xf32>
    %cst_33 = arith.constant dense<0.000000e+00> : vector<8x32xf32>
    %85 = tpu.matmul %83, %84, %cst_33 {dimension_numbers = #tpu.dot_dimension_numbers<[1], [0], [0], [1], [0, 0, 1, 1], [], []>} : vector<8x8xf32>, vector<8x32xf32>, vector<8x32xf32> -> vector<8x32xf32>
    %c0_34 = arith.constant 0 : index
    %c32 = arith.constant 32 : index
    %86 = vector.load %arg20[%c0_34, %c32] : memref<16x128xf32, #tpu.memory_space<vmem>>, vector<8x32xf32>
    tpu.vector_store %arg20[%c0_34, %c32], %85 {strides = array<i32>} : memref<16x128xf32, #tpu.memory_space<vmem>>, vector<8x32xf32>,
    %87 = vector.extract_strided_slice %37 {offsets = [0, 64], sizes = [8, 32], strides = [1, 1]} : vector<8x128xf32> to vector<8x32xf32>
    %88 = vector.extract_strided_slice %40 {offsets = [64, 0], sizes = [32, 8], strides = [1, 1]} : vector<128x8xf32> to vector<32x8xf32>
    %cst_35 = arith.constant dense<0.000000e+00> : vector<8x8xf32>
    %89 = tpu.matmul %87, %88, %cst_35 {dimension_numbers = #tpu.dot_dimension_numbers<[1], [0], [0], [1], [0, 0, 1, 1], [], []>} : vector<8x32xf32>, vector<32x8xf32>, vector<8x8xf32> -> vector<8x8xf32>
    %cst_36 = arith.constant 0.176776692 : f32
    %90 = vector.broadcast %cst_36 : f32 to vector<8x8xf32>
    %91 = arith.mulf %89, %90 : vector<8x8xf32>
    %92 = vector.broadcast %46 : vector<1x8xf32> to vector<8x8xf32>
    %93 = arith.addf %91, %92 : vector<8x8xf32>
    %cst_37 = arith.constant dense<0xFF800000> : vector<8xf32>
    %94 = vector.multi_reduction <maximumf>, %93, %cst_37 [1] : vector<8x8xf32> to vector<8xf32>
    %95 = vector.shape_cast %94 : vector<8xf32> to vector<8x1xf32>
    %96 = vector.broadcast %95 : vector<8x1xf32> to vector<8x8xf32>
    %97 = arith.subf %93, %96 : vector<8x8xf32>
    %98 = math.exp %97 : vector<8x8xf32>
    %cst_38 = arith.constant dense<0.000000e+00> : vector<8xf32>
    %99 = vector.multi_reduction <add>, %98, %cst_38 [1] : vector<8x8xf32> to vector<8xf32>
    %100 = vector.shape_cast %99 : vector<8xf32> to vector<8x1xf32>
    %101 = tpu.reciprocal %100 {approx = true} : vector<8x1xf32> -> vector<8x1xf32>
    %102 = vector.broadcast %101 : vector<8x1xf32> to vector<8x8xf32>
    %103 = arith.mulf %98, %102 : vector<8x8xf32>
    %104 = vector.extract_strided_slice %38 {offsets = [0, 64], sizes = [8, 32], strides = [1, 1]} : vector<8x128xf32> to vector<8x32xf32>
    %cst_39 = arith.constant dense<0.000000e+00> : vector<8x32xf32>
    %105 = tpu.matmul %103, %104, %cst_39 {dimension_numbers = #tpu.dot_dimension_numbers<[1], [0], [0], [1], [0, 0, 1, 1], [], []>} : vector<8x8xf32>, vector<8x32xf32>, vector<8x32xf32> -> vector<8x32xf32>
    %c0_40 = arith.constant 0 : index
    %c64 = arith.constant 64 : index
    %106 = vector.load %arg20[%c0_40, %c64] : memref<16x128xf32, #tpu.memory_space<vmem>>, vector<8x32xf32>
    tpu.vector_store %arg20[%c0_40, %c64], %105 {strides = array<i32>} : memref<16x128xf32, #tpu.memory_space<vmem>>, vector<8x32xf32>,
    %107 = vector.extract_strided_slice %37 {offsets = [0, 96], sizes = [8, 32], strides = [1, 1]} : vector<8x128xf32> to vector<8x32xf32>
    %108 = vector.extract_strided_slice %40 {offsets = [96, 0], sizes = [32, 8], strides = [1, 1]} : vector<128x8xf32> to vector<32x8xf32>
    %cst_41 = arith.constant dense<0.000000e+00> : vector<8x8xf32>
    %109 = tpu.matmul %107, %108, %cst_41 {dimension_numbers = #tpu.dot_dimension_numbers<[1], [0], [0], [1], [0, 0, 1, 1], [], []>} : vector<8x32xf32>, vector<32x8xf32>, vector<8x8xf32> -> vector<8x8xf32>
    %cst_42 = arith.constant 0.176776692 : f32
    %110 = vector.broadcast %cst_42 : f32 to vector<8x8xf32>
    %111 = arith.mulf %109, %110 : vector<8x8xf32>
    %112 = vector.broadcast %46 : vector<1x8xf32> to vector<8x8xf32>
    %113 = arith.addf %111, %112 : vector<8x8xf32>
    %cst_43 = arith.constant dense<0xFF800000> : vector<8xf32>
    %114 = vector.multi_reduction <maximumf>, %113, %cst_43 [1] : vector<8x8xf32> to vector<8xf32>
    %115 = vector.shape_cast %114 : vector<8xf32> to vector<8x1xf32>
    %116 = vector.broadcast %115 : vector<8x1xf32> to vector<8x8xf32>
    %117 = arith.subf %113, %116 : vector<8x8xf32>
    %118 = math.exp %117 : vector<8x8xf32>
    %cst_44 = arith.constant dense<0.000000e+00> : vector<8xf32>
    %119 = vector.multi_reduction <add>, %118, %cst_44 [1] : vector<8x8xf32> to vector<8xf32>
    %120 = vector.shape_cast %119 : vector<8xf32> to vector<8x1xf32>
    %121 = tpu.reciprocal %120 {approx = true} : vector<8x1xf32> -> vector<8x1xf32>
    %122 = vector.broadcast %121 : vector<8x1xf32> to vector<8x8xf32>
    %123 = arith.mulf %118, %122 : vector<8x8xf32>
    %124 = vector.extract_strided_slice %38 {offsets = [0, 96], sizes = [8, 32], strides = [1, 1]} : vector<8x128xf32> to vector<8x32xf32>
    %cst_45 = arith.constant dense<0.000000e+00> : vector<8x32xf32>
    %125 = tpu.matmul %123, %124, %cst_45 {dimension_numbers = #tpu.dot_dimension_numbers<[1], [0], [0], [1], [0, 0, 1, 1], [], []>} : vector<8x8xf32>, vector<8x32xf32>, vector<8x32xf32> -> vector<8x32xf32>
    %c0_46 = arith.constant 0 : index
    %c96 = arith.constant 96 : index
    %126 = vector.load %arg20[%c0_46, %c96] : memref<16x128xf32, #tpu.memory_space<vmem>>, vector<8x32xf32>
    tpu.vector_store %arg20[%c0_46, %c96], %125 {strides = array<i32>} : memref<16x128xf32, #tpu.memory_space<vmem>>, vector<8x32xf32>,
    %127 = vector.extract_strided_slice %34 {offsets = [8, 0], sizes = [8, 128], strides = [1, 1]} : vector<16x128xf32> to vector<8x128xf32>
    %128 = vector.extract_strided_slice %36 {offsets = [8, 0], sizes = [8, 128], strides = [1, 1]} : vector<16x128xf32> to vector<8x128xf32>
    %129 = vector.extract_strided_slice %35 {offsets = [8, 0], sizes = [8, 128], strides = [1, 1]} : vector<16x128xf32> to vector<8x128xf32>
    %130 = tpu.transpose %129, [1, 0] : vector<8x128xf32> -> vector<128x8xf32>
    %c1 = arith.constant 1 : index
    %c0_47 = arith.constant 0 : index
    %c0_48 = arith.constant 0 : index
    %131 = vector.load %arg1[%c1, %c0_47, %c0_48] : memref<2x1x8xf32, #tpu.memory_space<vmem>>, vector<1x1x8xf32>
    %132 = vector.shape_cast %131 : vector<1x1x8xf32> to vector<1x8xf32>
    %cst_49 = arith.constant 1.000000e+00 : f32
    %133 = vector.broadcast %cst_49 : f32 to vector<1x8xf32>
    %134 = arith.subf %133, %132 : vector<1x8xf32>
    %cst_50 = arith.constant -1.000000e+09 : f32
    %135 = vector.broadcast %cst_50 : f32 to vector<1x8xf32>
    %136 = arith.mulf %134, %135 : vector<1x8xf32>
    %137 = vector.extract_strided_slice %127 {offsets = [0, 0], sizes = [8, 32], strides = [1, 1]} : vector<8x128xf32> to vector<8x32xf32>
    %138 = vector.extract_strided_slice %130 {offsets = [0, 0], sizes = [32, 8], strides = [1, 1]} : vector<128x8xf32> to vector<32x8xf32>
    %cst_51 = arith.constant dense<0.000000e+00> : vector<8x8xf32>
    %139 = tpu.matmul %137, %138, %cst_51 {dimension_numbers = #tpu.dot_dimension_numbers<[1], [0], [0], [1], [0, 0, 1, 1], [], []>} : vector<8x32xf32>, vector<32x8xf32>, vector<8x8xf32> -> vector<8x8xf32>
    %cst_52 = arith.constant 0.176776692 : f32
    %140 = vector.broadcast %cst_52 : f32 to vector<8x8xf32>
    %141 = arith.mulf %139, %140 : vector<8x8xf32>
    %142 = vector.broadcast %136 : vector<1x8xf32> to vector<8x8xf32>
    %143 = arith.addf %141, %142 : vector<8x8xf32>
    %cst_53 = arith.constant dense<0xFF800000> : vector<8xf32>
    %144 = vector.multi_reduction <maximumf>, %143, %cst_53 [1] : vector<8x8xf32> to vector<8xf32>
    %145 = vector.shape_cast %144 : vector<8xf32> to vector<8x1xf32>
    %146 = vector.broadcast %145 : vector<8x1xf32> to vector<8x8xf32>
    %147 = arith.subf %143, %146 : vector<8x8xf32>
    %148 = math.exp %147 : vector<8x8xf32>
    %cst_54 = arith.constant dense<0.000000e+00> : vector<8xf32>
    %149 = vector.multi_reduction <add>, %148, %cst_54 [1] : vector<8x8xf32> to vector<8xf32>
    %150 = vector.shape_cast %149 : vector<8xf32> to vector<8x1xf32>
    %151 = tpu.reciprocal %150 {approx = true} : vector<8x1xf32> -> vector<8x1xf32>
    %152 = vector.broadcast %151 : vector<8x1xf32> to vector<8x8xf32>
    %153 = arith.mulf %148, %152 : vector<8x8xf32>
    %154 = vector.extract_strided_slice %128 {offsets = [0, 0], sizes = [8, 32], strides = [1, 1]} : vector<8x128xf32> to vector<8x32xf32>
    %cst_55 = arith.constant dense<0.000000e+00> : vector<8x32xf32>
    %155 = tpu.matmul %153, %154, %cst_55 {dimension_numbers = #tpu.dot_dimension_numbers<[1], [0], [0], [1], [0, 0, 1, 1], [], []>} : vector<8x8xf32>, vector<8x32xf32>, vector<8x32xf32> -> vector<8x32xf32>
    %c8 = arith.constant 8 : index
    %c0_56 = arith.constant 0 : index
    %156 = vector.load %arg20[%c8, %c0_56] : memref<16x128xf32, #tpu.memory_space<vmem>>, vector<8x32xf32>
    tpu.vector_store %arg20[%c8, %c0_56], %155 {strides = array<i32>} : memref<16x128xf32, #tpu.memory_space<vmem>>, vector<8x32xf32>,
    %157 = vector.extract_strided_slice %127 {offsets = [0, 32], sizes = [8, 32], strides = [1, 1]} : vector<8x128xf32> to vector<8x32xf32>
    %158 = vector.extract_strided_slice %130 {offsets = [32, 0], sizes = [32, 8], strides = [1, 1]} : vector<128x8xf32> to vector<32x8xf32>
    %cst_57 = arith.constant dense<0.000000e+00> : vector<8x8xf32>
    %159 = tpu.matmul %157, %158, %cst_57 {dimension_numbers = #tpu.dot_dimension_numbers<[1], [0], [0], [1], [0, 0, 1, 1], [], []>} : vector<8x32xf32>, vector<32x8xf32>, vector<8x8xf32> -> vector<8x8xf32>
    %cst_58 = arith.constant 0.176776692 : f32
    %160 = vector.broadcast %cst_58 : f32 to vector<8x8xf32>
    %161 = arith.mulf %159, %160 : vector<8x8xf32>
    %162 = vector.broadcast %136 : vector<1x8xf32> to vector<8x8xf32>
    %163 = arith.addf %161, %162 : vector<8x8xf32>
    %cst_59 = arith.constant dense<0xFF800000> : vector<8xf32>
    %164 = vector.multi_reduction <maximumf>, %163, %cst_59 [1] : vector<8x8xf32> to vector<8xf32>
    %165 = vector.shape_cast %164 : vector<8xf32> to vector<8x1xf32>
    %166 = vector.broadcast %165 : vector<8x1xf32> to vector<8x8xf32>
    %167 = arith.subf %163, %166 : vector<8x8xf32>
    %168 = math.exp %167 : vector<8x8xf32>
    %cst_60 = arith.constant dense<0.000000e+00> : vector<8xf32>
    %169 = vector.multi_reduction <add>, %168, %cst_60 [1] : vector<8x8xf32> to vector<8xf32>
    %170 = vector.shape_cast %169 : vector<8xf32> to vector<8x1xf32>
    %171 = tpu.reciprocal %170 {approx = true} : vector<8x1xf32> -> vector<8x1xf32>
    %172 = vector.broadcast %171 : vector<8x1xf32> to vector<8x8xf32>
    %173 = arith.mulf %168, %172 : vector<8x8xf32>
    %174 = vector.extract_strided_slice %128 {offsets = [0, 32], sizes = [8, 32], strides = [1, 1]} : vector<8x128xf32> to vector<8x32xf32>
    %cst_61 = arith.constant dense<0.000000e+00> : vector<8x32xf32>
    %175 = tpu.matmul %173, %174, %cst_61 {dimension_numbers = #tpu.dot_dimension_numbers<[1], [0], [0], [1], [0, 0, 1, 1], [], []>} : vector<8x8xf32>, vector<8x32xf32>, vector<8x32xf32> -> vector<8x32xf32>
    %c8_62 = arith.constant 8 : index
    %c32_63 = arith.constant 32 : index
    %176 = vector.load %arg20[%c8_62, %c32_63] : memref<16x128xf32, #tpu.memory_space<vmem>>, vector<8x32xf32>
    tpu.vector_store %arg20[%c8_62, %c32_63], %175 {strides = array<i32>} : memref<16x128xf32, #tpu.memory_space<vmem>>, vector<8x32xf32>,
    %177 = vector.extract_strided_slice %127 {offsets = [0, 64], sizes = [8, 32], strides = [1, 1]} : vector<8x128xf32> to vector<8x32xf32>
    %178 = vector.extract_strided_slice %130 {offsets = [64, 0], sizes = [32, 8], strides = [1, 1]} : vector<128x8xf32> to vector<32x8xf32>
    %cst_64 = arith.constant dense<0.000000e+00> : vector<8x8xf32>
    %179 = tpu.matmul %177, %178, %cst_64 {dimension_numbers = #tpu.dot_dimension_numbers<[1], [0], [0], [1], [0, 0, 1, 1], [], []>} : vector<8x32xf32>, vector<32x8xf32>, vector<8x8xf32> -> vector<8x8xf32>
    %cst_65 = arith.constant 0.176776692 : f32
    %180 = vector.broadcast %cst_65 : f32 to vector<8x8xf32>
    %181 = arith.mulf %179, %180 : vector<8x8xf32>
    %182 = vector.broadcast %136 : vector<1x8xf32> to vector<8x8xf32>
    %183 = arith.addf %181, %182 : vector<8x8xf32>
    %cst_66 = arith.constant dense<0xFF800000> : vector<8xf32>
    %184 = vector.multi_reduction <maximumf>, %183, %cst_66 [1] : vector<8x8xf32> to vector<8xf32>
    %185 = vector.shape_cast %184 : vector<8xf32> to vector<8x1xf32>
    %186 = vector.broadcast %185 : vector<8x1xf32> to vector<8x8xf32>
    %187 = arith.subf %183, %186 : vector<8x8xf32>
    %188 = math.exp %187 : vector<8x8xf32>
    %cst_67 = arith.constant dense<0.000000e+00> : vector<8xf32>
    %189 = vector.multi_reduction <add>, %188, %cst_67 [1] : vector<8x8xf32> to vector<8xf32>
    %190 = vector.shape_cast %189 : vector<8xf32> to vector<8x1xf32>
    %191 = tpu.reciprocal %190 {approx = true} : vector<8x1xf32> -> vector<8x1xf32>
    %192 = vector.broadcast %191 : vector<8x1xf32> to vector<8x8xf32>
    %193 = arith.mulf %188, %192 : vector<8x8xf32>
    %194 = vector.extract_strided_slice %128 {offsets = [0, 64], sizes = [8, 32], strides = [1, 1]} : vector<8x128xf32> to vector<8x32xf32>
    %cst_68 = arith.constant dense<0.000000e+00> : vector<8x32xf32>
    %195 = tpu.matmul %193, %194, %cst_68 {dimension_numbers = #tpu.dot_dimension_numbers<[1], [0], [0], [1], [0, 0, 1, 1], [], []>} : vector<8x8xf32>, vector<8x32xf32>, vector<8x32xf32> -> vector<8x32xf32>
    %c8_69 = arith.constant 8 : index
    %c64_70 = arith.constant 64 : index
    %196 = vector.load %arg20[%c8_69, %c64_70] : memref<16x128xf32, #tpu.memory_space<vmem>>, vector<8x32xf32>
    tpu.vector_store %arg20[%c8_69, %c64_70], %195 {strides = array<i32>} : memref<16x128xf32, #tpu.memory_space<vmem>>, vector<8x32xf32>,
    %197 = vector.extract_strided_slice %127 {offsets = [0, 96], sizes = [8, 32], strides = [1, 1]} : vector<8x128xf32> to vector<8x32xf32>
    %198 = vector.extract_strided_slice %130 {offsets = [96, 0], sizes = [32, 8], strides = [1, 1]} : vector<128x8xf32> to vector<32x8xf32>
    %cst_71 = arith.constant dense<0.000000e+00> : vector<8x8xf32>
    %199 = tpu.matmul %197, %198, %cst_71 {dimension_numbers = #tpu.dot_dimension_numbers<[1], [0], [0], [1], [0, 0, 1, 1], [], []>} : vector<8x32xf32>, vector<32x8xf32>, vector<8x8xf32> -> vector<8x8xf32>
    %cst_72 = arith.constant 0.176776692 : f32
    %200 = vector.broadcast %cst_72 : f32 to vector<8x8xf32>
    %201 = arith.mulf %199, %200 : vector<8x8xf32>
    %202 = vector.broadcast %136 : vector<1x8xf32> to vector<8x8xf32>
    %203 = arith.addf %201, %202 : vector<8x8xf32>
    %cst_73 = arith.constant dense<0xFF800000> : vector<8xf32>
    %204 = vector.multi_reduction <maximumf>, %203, %cst_73 [1] : vector<8x8xf32> to vector<8xf32>
    %205 = vector.shape_cast %204 : vector<8xf32> to vector<8x1xf32>
    %206 = vector.broadcast %205 : vector<8x1xf32> to vector<8x8xf32>
    %207 = arith.subf %203, %206 : vector<8x8xf32>
    %208 = math.exp %207 : vector<8x8xf32>
    %cst_74 = arith.constant dense<0.000000e+00> : vector<8xf32>
    %209 = vector.multi_reduction <add>, %208, %cst_74 [1] : vector<8x8xf32> to vector<8xf32>
    %210 = vector.shape_cast %209 : vector<8xf32> to vector<8x1xf32>
    %211 = tpu.reciprocal %210 {approx = true} : vector<8x1xf32> -> vector<8x1xf32>
    %212 = vector.broadcast %211 : vector<8x1xf32> to vector<8x8xf32>
    %213 = arith.mulf %208, %212 : vector<8x8xf32>
    %214 = vector.extract_strided_slice %128 {offsets = [0, 96], sizes = [8, 32], strides = [1, 1]} : vector<8x128xf32> to vector<8x32xf32>
    %cst_75 = arith.constant dense<0.000000e+00> : vector<8x32xf32>
    %215 = tpu.matmul %213, %214, %cst_75 {dimension_numbers = #tpu.dot_dimension_numbers<[1], [0], [0], [1], [0, 0, 1, 1], [], []>} : vector<8x8xf32>, vector<8x32xf32>, vector<8x32xf32> -> vector<8x32xf32>
    %c8_76 = arith.constant 8 : index
    %c96_77 = arith.constant 96 : index
    %216 = vector.load %arg20[%c8_76, %c96_77] : memref<16x128xf32, #tpu.memory_space<vmem>>, vector<8x32xf32>
    tpu.vector_store %arg20[%c8_76, %c96_77], %215 {strides = array<i32>} : memref<16x128xf32, #tpu.memory_space<vmem>>, vector<8x32xf32>,
    %c0_78 = arith.constant 0 : index
    %c0_79 = arith.constant 0 : index
    %217 = vector.load %arg20[%c0_78, %c0_79] : memref<16x128xf32, #tpu.memory_space<vmem>>, vector<16x128xf32>
    %c0_80 = arith.constant 0 : index
    %c0_81 = arith.constant 0 : index
    %c0_82 = arith.constant 0 : index
    %218 = vector.load %arg7[%c0_80, %c0_81, %c0_82] : memref<2x128x128xbf16, #tpu.memory_space<vmem>>, vector<1x128x128xbf16>
    %219 = vector.shape_cast %218 : vector<1x128x128xbf16> to vector<128x128xbf16>
    %220 = arith.extf %219 : vector<128x128xbf16> to vector<128x128xf32>
    %cst_83 = arith.constant dense<0.000000e+00> : vector<16x128xf32>
    %221 = tpu.matmul %217, %220, %cst_83 {dimension_numbers = #tpu.dot_dimension_numbers<[1], [0], [0], [1], [0, 0, 1, 1], [], []>} : vector<16x128xf32>, vector<128x128xf32>, vector<16x128xf32> -> vector<16x128xf32>
    %c0_84 = arith.constant 0 : index
    %c0_85 = arith.constant 0 : index
    %c0_86 = arith.constant 0 : index
    %222 = vector.load %arg8[%c0_84, %c0_85, %c0_86] : memref<2x1x128xf32, #tpu.memory_space<vmem>>, vector<1x1x128xf32>
    %223 = vector.shape_cast %222 : vector<1x1x128xf32> to vector<1x128xf32>
    %224 = vector.broadcast %223 : vector<1x128xf32> to vector<16x128xf32>
    %225 = arith.addf %221, %224 : vector<16x128xf32>
    %226 = arith.addf %25, %225 : vector<16x128xf32>
    %c0_87 = arith.constant 0 : index
    %c0_88 = arith.constant 0 : index
    %c0_89 = arith.constant 0 : index
    %227 = vector.load %arg9[%c0_87, %c0_88, %c0_89] : memref<2x1x128xf32, #tpu.memory_space<vmem>>, vector<1x1x128xf32>
    %228 = vector.shape_cast %227 : vector<1x1x128xf32> to vector<1x128xf32>
    %c0_90 = arith.constant 0 : index
    %c0_91 = arith.constant 0 : index
    %c0_92 = arith.constant 0 : index
    %229 = vector.load %arg10[%c0_90, %c0_91, %c0_92] : memref<2x1x128xf32, #tpu.memory_space<vmem>>, vector<1x1x128xf32>
    %230 = vector.shape_cast %229 : vector<1x1x128xf32> to vector<1x128xf32>
    %cst_93 = arith.constant dense<0.000000e+00> : vector<16xf32>
    %231 = vector.multi_reduction <add>, %226, %cst_93 [1] : vector<16x128xf32> to vector<16xf32>
    %232 = vector.shape_cast %231 : vector<16xf32> to vector<16x1xf32>
    %cst_94 = arith.constant 1.280000e+02 : f32
    %233 = vector.broadcast %cst_94 : f32 to vector<16x1xf32>
    %234 = arith.divf %232, %233 : vector<16x1xf32>
    %235 = vector.broadcast %234 : vector<16x1xf32> to vector<16x128xf32>
    %236 = arith.subf %226, %235 : vector<16x128xf32>
    %237 = arith.mulf %236, %236 : vector<16x128xf32>
    %cst_95 = arith.constant dense<0.000000e+00> : vector<16xf32>
    %238 = vector.multi_reduction <add>, %237, %cst_95 [1] : vector<16x128xf32> to vector<16xf32>
    %239 = vector.shape_cast %238 : vector<16xf32> to vector<16x1xf32>
    %cst_96 = arith.constant 1.280000e+02 : f32
    %240 = vector.broadcast %cst_96 : f32 to vector<16x1xf32>
    %241 = arith.divf %239, %240 : vector<16x1xf32>
    %242 = vector.broadcast %234 : vector<16x1xf32> to vector<16x128xf32>
    %243 = arith.subf %226, %242 : vector<16x128xf32>
    %cst_97 = arith.constant 9.99999996E-13 : f32
    %244 = vector.broadcast %cst_97 : f32 to vector<16x1xf32>
    %245 = arith.addf %241, %244 : vector<16x1xf32>
    %246 = math.rsqrt %245 : vector<16x1xf32>
    %247 = vector.broadcast %246 : vector<16x1xf32> to vector<16x128xf32>
    %248 = arith.mulf %243, %247 : vector<16x128xf32>
    %249 = vector.broadcast %228 : vector<1x128xf32> to vector<16x128xf32>
    %250 = arith.mulf %248, %249 : vector<16x128xf32>
    %251 = vector.broadcast %230 : vector<1x128xf32> to vector<16x128xf32>
    %252 = arith.addf %250, %251 : vector<16x128xf32>
    %c0_98 = arith.constant 0 : index
    %c0_99 = arith.constant 0 : index
    %c0_100 = arith.constant 0 : index
    %253 = vector.load %arg11[%c0_98, %c0_99, %c0_100] : memref<2x128x256xbf16, #tpu.memory_space<vmem>>, vector<1x128x256xbf16>
    %254 = vector.shape_cast %253 : vector<1x128x256xbf16> to vector<128x256xbf16>
    %255 = arith.extf %254 : vector<128x256xbf16> to vector<128x256xf32>
    %cst_101 = arith.constant dense<0.000000e+00> : vector<16x256xf32>
    %256 = tpu.matmul %252, %255, %cst_101 {dimension_numbers = #tpu.dot_dimension_numbers<[1], [0], [0], [1], [0, 0, 1, 1], [], []>} : vector<16x128xf32>, vector<128x256xf32>, vector<16x256xf32> -> vector<16x256xf32>
    %c0_102 = arith.constant 0 : index
    %c0_103 = arith.constant 0 : index
    %c0_104 = arith.constant 0 : index
    %257 = vector.load %arg12[%c0_102, %c0_103, %c0_104] : memref<2x1x256xf32, #tpu.memory_space<vmem>>, vector<1x1x256xf32>
    %258 = vector.shape_cast %257 : vector<1x1x256xf32> to vector<1x256xf32>
    %259 = vector.broadcast %258 : vector<1x256xf32> to vector<16x256xf32>
    %260 = arith.addf %256, %259 : vector<16x256xf32>
    %261 = arith.mulf %260, %260 : vector<16x256xf32>
    %262 = arith.mulf %260, %261 : vector<16x256xf32>
    %cst_105 = arith.constant 4.471500e-02 : f32
    %263 = vector.broadcast %cst_105 : f32 to vector<16x256xf32>
    %264 = arith.mulf %263, %262 : vector<16x256xf32>
    %265 = arith.addf %260, %264 : vector<16x256xf32>
    %cst_106 = arith.constant 0.797884583 : f32
    %266 = vector.broadcast %cst_106 : f32 to vector<16x256xf32>
    %267 = arith.mulf %266, %265 : vector<16x256xf32>
    %268 = math.tanh %267 : vector<16x256xf32>
    %cst_107 = arith.constant 1.000000e+00 : f32
    %269 = vector.broadcast %cst_107 : f32 to vector<16x256xf32>
    %270 = arith.addf %269, %268 : vector<16x256xf32>
    %cst_108 = arith.constant 5.000000e-01 : f32
    %271 = vector.broadcast %cst_108 : f32 to vector<16x256xf32>
    %272 = arith.mulf %271, %270 : vector<16x256xf32>
    %273 = arith.mulf %260, %272 : vector<16x256xf32>
    %c0_109 = arith.constant 0 : index
    %c0_110 = arith.constant 0 : index
    %c0_111 = arith.constant 0 : index
    %274 = vector.load %arg13[%c0_109, %c0_110, %c0_111] : memref<2x256x128xbf16, #tpu.memory_space<vmem>>, vector<1x256x128xbf16>
    %275 = vector.shape_cast %274 : vector<1x256x128xbf16> to vector<256x128xbf16>
    %276 = arith.extf %275 : vector<256x128xbf16> to vector<256x128xf32>
    %cst_112 = arith.constant dense<0.000000e+00> : vector<16x128xf32>
    %277 = tpu.matmul %273, %276, %cst_112 {dimension_numbers = #tpu.dot_dimension_numbers<[1], [0], [0], [1], [0, 0, 1, 1], [], []>} : vector<16x256xf32>, vector<256x128xf32>, vector<16x128xf32> -> vector<16x128xf32>
    %c0_113 = arith.constant 0 : index
    %c0_114 = arith.constant 0 : index
    %c0_115 = arith.constant 0 : index
    %278 = vector.load %arg14[%c0_113, %c0_114, %c0_115] : memref<2x1x128xf32, #tpu.memory_space<vmem>>, vector<1x1x128xf32>
    %279 = vector.shape_cast %278 : vector<1x1x128xf32> to vector<1x128xf32>
    %280 = vector.broadcast %279 : vector<1x128xf32> to vector<16x128xf32>
    %281 = arith.addf %277, %280 : vector<16x128xf32>
    %282 = arith.addf %252, %281 : vector<16x128xf32>
    %c0_116 = arith.constant 0 : index
    %c0_117 = arith.constant 0 : index
    %c0_118 = arith.constant 0 : index
    %283 = vector.load %arg15[%c0_116, %c0_117, %c0_118] : memref<2x1x128xf32, #tpu.memory_space<vmem>>, vector<1x1x128xf32>
    %284 = vector.shape_cast %283 : vector<1x1x128xf32> to vector<1x128xf32>
    %c0_119 = arith.constant 0 : index
    %c0_120 = arith.constant 0 : index
    %c0_121 = arith.constant 0 : index
    %285 = vector.load %arg16[%c0_119, %c0_120, %c0_121] : memref<2x1x128xf32, #tpu.memory_space<vmem>>, vector<1x1x128xf32>
    %286 = vector.shape_cast %285 : vector<1x1x128xf32> to vector<1x128xf32>
    %cst_122 = arith.constant dense<0.000000e+00> : vector<16xf32>
    %287 = vector.multi_reduction <add>, %282, %cst_122 [1] : vector<16x128xf32> to vector<16xf32>
    %288 = vector.shape_cast %287 : vector<16xf32> to vector<16x1xf32>
    %cst_123 = arith.constant 1.280000e+02 : f32
    %289 = vector.broadcast %cst_123 : f32 to vector<16x1xf32>
    %290 = arith.divf %288, %289 : vector<16x1xf32>
    %291 = vector.broadcast %290 : vector<16x1xf32> to vector<16x128xf32>
    %292 = arith.subf %282, %291 : vector<16x128xf32>
    %293 = arith.mulf %292, %292 : vector<16x128xf32>
    %cst_124 = arith.constant dense<0.000000e+00> : vector<16xf32>
    %294 = vector.multi_reduction <add>, %293, %cst_124 [1] : vector<16x128xf32> to vector<16xf32>
    %295 = vector.shape_cast %294 : vector<16xf32> to vector<16x1xf32>
    %cst_125 = arith.constant 1.280000e+02 : f32
    %296 = vector.broadcast %cst_125 : f32 to vector<16x1xf32>
    %297 = arith.divf %295, %296 : vector<16x1xf32>
    %298 = vector.broadcast %290 : vector<16x1xf32> to vector<16x128xf32>
    %299 = arith.subf %282, %298 : vector<16x128xf32>
    %cst_126 = arith.constant 9.99999996E-13 : f32
    %300 = vector.broadcast %cst_126 : f32 to vector<16x1xf32>
    %301 = arith.addf %297, %300 : vector<16x1xf32>
    %302 = math.rsqrt %301 : vector<16x1xf32>
    %303 = vector.broadcast %302 : vector<16x1xf32> to vector<16x128xf32>
    %304 = arith.mulf %299, %303 : vector<16x128xf32>
    %305 = vector.broadcast %284 : vector<1x128xf32> to vector<16x128xf32>
    %306 = arith.mulf %304, %305 : vector<16x128xf32>
    %307 = vector.broadcast %286 : vector<1x128xf32> to vector<16x128xf32>
    %308 = arith.addf %306, %307 : vector<16x128xf32>
    %c1_127 = arith.constant 1 : index
    %c0_128 = arith.constant 0 : index
    %c0_129 = arith.constant 0 : index
    %309 = vector.load %arg5[%c1_127, %c0_128, %c0_129] : memref<2x128x384xbf16, #tpu.memory_space<vmem>>, vector<1x128x384xbf16>
    %310 = vector.shape_cast %309 : vector<1x128x384xbf16> to vector<128x384xbf16>
    %311 = arith.extf %310 : vector<128x384xbf16> to vector<128x384xf32>
    %cst_130 = arith.constant dense<0.000000e+00> : vector<16x384xf32>
    %312 = tpu.matmul %308, %311, %cst_130 {dimension_numbers = #tpu.dot_dimension_numbers<[1], [0], [0], [1], [0, 0, 1, 1], [], []>} : vector<16x128xf32>, vector<128x384xf32>, vector<16x384xf32> -> vector<16x384xf32>
    %c1_131 = arith.constant 1 : index
    %c0_132 = arith.constant 0 : index
    %c0_133 = arith.constant 0 : index
    %313 = vector.load %arg6[%c1_131, %c0_132, %c0_133] : memref<2x1x384xf32, #tpu.memory_space<vmem>>, vector<1x1x384xf32>
    %314 = vector.shape_cast %313 : vector<1x1x384xf32> to vector<1x384xf32>
    %315 = vector.broadcast %314 : vector<1x384xf32> to vector<16x384xf32>
    %316 = arith.addf %312, %315 : vector<16x384xf32>
    %317 = vector.extract_strided_slice %316 {offsets = [0, 0], sizes = [16, 128], strides = [1, 1]} : vector<16x384xf32> to vector<16x128xf32>
    %318 = vector.extract_strided_slice %316 {offsets = [0, 128], sizes = [16, 128], strides = [1, 1]} : vector<16x384xf32> to vector<16x128xf32>
    %319 = vector.extract_strided_slice %316 {offsets = [0, 256], sizes = [16, 128], strides = [1, 1]} : vector<16x384xf32> to vector<16x128xf32>
    %320 = vector.extract_strided_slice %317 {offsets = [0, 0], sizes = [8, 128], strides = [1, 1]} : vector<16x128xf32> to vector<8x128xf32>
    %321 = vector.extract_strided_slice %319 {offsets = [0, 0], sizes = [8, 128], strides = [1, 1]} : vector<16x128xf32> to vector<8x128xf32>
    %322 = vector.extract_strided_slice %318 {offsets = [0, 0], sizes = [8, 128], strides = [1, 1]} : vector<16x128xf32> to vector<8x128xf32>
    %323 = tpu.transpose %322, [1, 0] : vector<8x128xf32> -> vector<128x8xf32>
    %c0_134 = arith.constant 0 : index
    %c0_135 = arith.constant 0 : index
    %c0_136 = arith.constant 0 : index
    %324 = vector.load %arg1[%c0_134, %c0_135, %c0_136] : memref<2x1x8xf32, #tpu.memory_space<vmem>>, vector<1x1x8xf32>
    %325 = vector.shape_cast %324 : vector<1x1x8xf32> to vector<1x8xf32>
    %cst_137 = arith.constant 1.000000e+00 : f32
    %326 = vector.broadcast %cst_137 : f32 to vector<1x8xf32>
    %327 = arith.subf %326, %325 : vector<1x8xf32>
    %cst_138 = arith.constant -1.000000e+09 : f32
    %328 = vector.broadcast %cst_138 : f32 to vector<1x8xf32>
    %329 = arith.mulf %327, %328 : vector<1x8xf32>
    %330 = vector.extract_strided_slice %320 {offsets = [0, 0], sizes = [8, 32], strides = [1, 1]} : vector<8x128xf32> to vector<8x32xf32>
    %331 = vector.extract_strided_slice %323 {offsets = [0, 0], sizes = [32, 8], strides = [1, 1]} : vector<128x8xf32> to vector<32x8xf32>
    %cst_139 = arith.constant dense<0.000000e+00> : vector<8x8xf32>
    %332 = tpu.matmul %330, %331, %cst_139 {dimension_numbers = #tpu.dot_dimension_numbers<[1], [0], [0], [1], [0, 0, 1, 1], [], []>} : vector<8x32xf32>, vector<32x8xf32>, vector<8x8xf32> -> vector<8x8xf32>
    %cst_140 = arith.constant 0.176776692 : f32
    %333 = vector.broadcast %cst_140 : f32 to vector<8x8xf32>
    %334 = arith.mulf %332, %333 : vector<8x8xf32>
    %335 = vector.broadcast %329 : vector<1x8xf32> to vector<8x8xf32>
    %336 = arith.addf %334, %335 : vector<8x8xf32>
    %cst_141 = arith.constant dense<0xFF800000> : vector<8xf32>
    %337 = vector.multi_reduction <maximumf>, %336, %cst_141 [1] : vector<8x8xf32> to vector<8xf32>
    %338 = vector.shape_cast %337 : vector<8xf32> to vector<8x1xf32>
    %339 = vector.broadcast %338 : vector<8x1xf32> to vector<8x8xf32>
    %340 = arith.subf %336, %339 : vector<8x8xf32>
    %341 = math.exp %340 : vector<8x8xf32>
    %cst_142 = arith.constant dense<0.000000e+00> : vector<8xf32>
    %342 = vector.multi_reduction <add>, %341, %cst_142 [1] : vector<8x8xf32> to vector<8xf32>
    %343 = vector.shape_cast %342 : vector<8xf32> to vector<8x1xf32>
    %344 = tpu.reciprocal %343 {approx = true} : vector<8x1xf32> -> vector<8x1xf32>
    %345 = vector.broadcast %344 : vector<8x1xf32> to vector<8x8xf32>
    %346 = arith.mulf %341, %345 : vector<8x8xf32>
    %347 = vector.extract_strided_slice %321 {offsets = [0, 0], sizes = [8, 32], strides = [1, 1]} : vector<8x128xf32> to vector<8x32xf32>
    %cst_143 = arith.constant dense<0.000000e+00> : vector<8x32xf32>
    %348 = tpu.matmul %346, %347, %cst_143 {dimension_numbers = #tpu.dot_dimension_numbers<[1], [0], [0], [1], [0, 0, 1, 1], [], []>} : vector<8x8xf32>, vector<8x32xf32>, vector<8x32xf32> -> vector<8x32xf32>
    %c0_144 = arith.constant 0 : index
    %c0_145 = arith.constant 0 : index
    %349 = vector.load %arg20[%c0_144, %c0_145] : memref<16x128xf32, #tpu.memory_space<vmem>>, vector<8x32xf32>
    tpu.vector_store %arg20[%c0_144, %c0_145], %348 {strides = array<i32>} : memref<16x128xf32, #tpu.memory_space<vmem>>, vector<8x32xf32>,
    %350 = vector.extract_strided_slice %320 {offsets = [0, 32], sizes = [8, 32], strides = [1, 1]} : vector<8x128xf32> to vector<8x32xf32>
    %351 = vector.extract_strided_slice %323 {offsets = [32, 0], sizes = [32, 8], strides = [1, 1]} : vector<128x8xf32> to vector<32x8xf32>
    %cst_146 = arith.constant dense<0.000000e+00> : vector<8x8xf32>
    %352 = tpu.matmul %350, %351, %cst_146 {dimension_numbers = #tpu.dot_dimension_numbers<[1], [0], [0], [1], [0, 0, 1, 1], [], []>} : vector<8x32xf32>, vector<32x8xf32>, vector<8x8xf32> -> vector<8x8xf32>
    %cst_147 = arith.constant 0.176776692 : f32
    %353 = vector.broadcast %cst_147 : f32 to vector<8x8xf32>
    %354 = arith.mulf %352, %353 : vector<8x8xf32>
    %355 = vector.broadcast %329 : vector<1x8xf32> to vector<8x8xf32>
    %356 = arith.addf %354, %355 : vector<8x8xf32>
    %cst_148 = arith.constant dense<0xFF800000> : vector<8xf32>
    %357 = vector.multi_reduction <maximumf>, %356, %cst_148 [1] : vector<8x8xf32> to vector<8xf32>
    %358 = vector.shape_cast %357 : vector<8xf32> to vector<8x1xf32>
    %359 = vector.broadcast %358 : vector<8x1xf32> to vector<8x8xf32>
    %360 = arith.subf %356, %359 : vector<8x8xf32>
    %361 = math.exp %360 : vector<8x8xf32>
    %cst_149 = arith.constant dense<0.000000e+00> : vector<8xf32>
    %362 = vector.multi_reduction <add>, %361, %cst_149 [1] : vector<8x8xf32> to vector<8xf32>
    %363 = vector.shape_cast %362 : vector<8xf32> to vector<8x1xf32>
    %364 = tpu.reciprocal %363 {approx = true} : vector<8x1xf32> -> vector<8x1xf32>
    %365 = vector.broadcast %364 : vector<8x1xf32> to vector<8x8xf32>
    %366 = arith.mulf %361, %365 : vector<8x8xf32>
    %367 = vector.extract_strided_slice %321 {offsets = [0, 32], sizes = [8, 32], strides = [1, 1]} : vector<8x128xf32> to vector<8x32xf32>
    %cst_150 = arith.constant dense<0.000000e+00> : vector<8x32xf32>
    %368 = tpu.matmul %366, %367, %cst_150 {dimension_numbers = #tpu.dot_dimension_numbers<[1], [0], [0], [1], [0, 0, 1, 1], [], []>} : vector<8x8xf32>, vector<8x32xf32>, vector<8x32xf32> -> vector<8x32xf32>
    %c0_151 = arith.constant 0 : index
    %c32_152 = arith.constant 32 : index
    %369 = vector.load %arg20[%c0_151, %c32_152] : memref<16x128xf32, #tpu.memory_space<vmem>>, vector<8x32xf32>
    tpu.vector_store %arg20[%c0_151, %c32_152], %368 {strides = array<i32>} : memref<16x128xf32, #tpu.memory_space<vmem>>, vector<8x32xf32>,
    %370 = vector.extract_strided_slice %320 {offsets = [0, 64], sizes = [8, 32], strides = [1, 1]} : vector<8x128xf32> to vector<8x32xf32>
    %371 = vector.extract_strided_slice %323 {offsets = [64, 0], sizes = [32, 8], strides = [1, 1]} : vector<128x8xf32> to vector<32x8xf32>
    %cst_153 = arith.constant dense<0.000000e+00> : vector<8x8xf32>
    %372 = tpu.matmul %370, %371, %cst_153 {dimension_numbers = #tpu.dot_dimension_numbers<[1], [0], [0], [1], [0, 0, 1, 1], [], []>} : vector<8x32xf32>, vector<32x8xf32>, vector<8x8xf32> -> vector<8x8xf32>
    %cst_154 = arith.constant 0.176776692 : f32
    %373 = vector.broadcast %cst_154 : f32 to vector<8x8xf32>
    %374 = arith.mulf %372, %373 : vector<8x8xf32>
    %375 = vector.broadcast %329 : vector<1x8xf32> to vector<8x8xf32>
    %376 = arith.addf %374, %375 : vector<8x8xf32>
    %cst_155 = arith.constant dense<0xFF800000> : vector<8xf32>
    %377 = vector.multi_reduction <maximumf>, %376, %cst_155 [1] : vector<8x8xf32> to vector<8xf32>
    %378 = vector.shape_cast %377 : vector<8xf32> to vector<8x1xf32>
    %379 = vector.broadcast %378 : vector<8x1xf32> to vector<8x8xf32>
    %380 = arith.subf %376, %379 : vector<8x8xf32>
    %381 = math.exp %380 : vector<8x8xf32>
    %cst_156 = arith.constant dense<0.000000e+00> : vector<8xf32>
    %382 = vector.multi_reduction <add>, %381, %cst_156 [1] : vector<8x8xf32> to vector<8xf32>
    %383 = vector.shape_cast %382 : vector<8xf32> to vector<8x1xf32>
    %384 = tpu.reciprocal %383 {approx = true} : vector<8x1xf32> -> vector<8x1xf32>
    %385 = vector.broadcast %384 : vector<8x1xf32> to vector<8x8xf32>
    %386 = arith.mulf %381, %385 : vector<8x8xf32>
    %387 = vector.extract_strided_slice %321 {offsets = [0, 64], sizes = [8, 32], strides = [1, 1]} : vector<8x128xf32> to vector<8x32xf32>
    %cst_157 = arith.constant dense<0.000000e+00> : vector<8x32xf32>
    %388 = tpu.matmul %386, %387, %cst_157 {dimension_numbers = #tpu.dot_dimension_numbers<[1], [0], [0], [1], [0, 0, 1, 1], [], []>} : vector<8x8xf32>, vector<8x32xf32>, vector<8x32xf32> -> vector<8x32xf32>
    %c0_158 = arith.constant 0 : index
    %c64_159 = arith.constant 64 : index
    %389 = vector.load %arg20[%c0_158, %c64_159] : memref<16x128xf32, #tpu.memory_space<vmem>>, vector<8x32xf32>
    tpu.vector_store %arg20[%c0_158, %c64_159], %388 {strides = array<i32>} : memref<16x128xf32, #tpu.memory_space<vmem>>, vector<8x32xf32>,
    %390 = vector.extract_strided_slice %320 {offsets = [0, 96], sizes = [8, 32], strides = [1, 1]} : vector<8x128xf32> to vector<8x32xf32>
    %391 = vector.extract_strided_slice %323 {offsets = [96, 0], sizes = [32, 8], strides = [1, 1]} : vector<128x8xf32> to vector<32x8xf32>
    %cst_160 = arith.constant dense<0.000000e+00> : vector<8x8xf32>
    %392 = tpu.matmul %390, %391, %cst_160 {dimension_numbers = #tpu.dot_dimension_numbers<[1], [0], [0], [1], [0, 0, 1, 1], [], []>} : vector<8x32xf32>, vector<32x8xf32>, vector<8x8xf32> -> vector<8x8xf32>
    %cst_161 = arith.constant 0.176776692 : f32
    %393 = vector.broadcast %cst_161 : f32 to vector<8x8xf32>
    %394 = arith.mulf %392, %393 : vector<8x8xf32>
    %395 = vector.broadcast %329 : vector<1x8xf32> to vector<8x8xf32>
    %396 = arith.addf %394, %395 : vector<8x8xf32>
    %cst_162 = arith.constant dense<0xFF800000> : vector<8xf32>
    %397 = vector.multi_reduction <maximumf>, %396, %cst_162 [1] : vector<8x8xf32> to vector<8xf32>
    %398 = vector.shape_cast %397 : vector<8xf32> to vector<8x1xf32>
    %399 = vector.broadcast %398 : vector<8x1xf32> to vector<8x8xf32>
    %400 = arith.subf %396, %399 : vector<8x8xf32>
    %401 = math.exp %400 : vector<8x8xf32>
    %cst_163 = arith.constant dense<0.000000e+00> : vector<8xf32>
    %402 = vector.multi_reduction <add>, %401, %cst_163 [1] : vector<8x8xf32> to vector<8xf32>
    %403 = vector.shape_cast %402 : vector<8xf32> to vector<8x1xf32>
    %404 = tpu.reciprocal %403 {approx = true} : vector<8x1xf32> -> vector<8x1xf32>
    %405 = vector.broadcast %404 : vector<8x1xf32> to vector<8x8xf32>
    %406 = arith.mulf %401, %405 : vector<8x8xf32>
    %407 = vector.extract_strided_slice %321 {offsets = [0, 96], sizes = [8, 32], strides = [1, 1]} : vector<8x128xf32> to vector<8x32xf32>
    %cst_164 = arith.constant dense<0.000000e+00> : vector<8x32xf32>
    %408 = tpu.matmul %406, %407, %cst_164 {dimension_numbers = #tpu.dot_dimension_numbers<[1], [0], [0], [1], [0, 0, 1, 1], [], []>} : vector<8x8xf32>, vector<8x32xf32>, vector<8x32xf32> -> vector<8x32xf32>
    %c0_165 = arith.constant 0 : index
    %c96_166 = arith.constant 96 : index
    %409 = vector.load %arg20[%c0_165, %c96_166] : memref<16x128xf32, #tpu.memory_space<vmem>>, vector<8x32xf32>
    tpu.vector_store %arg20[%c0_165, %c96_166], %408 {strides = array<i32>} : memref<16x128xf32, #tpu.memory_space<vmem>>, vector<8x32xf32>,
    %410 = vector.extract_strided_slice %317 {offsets = [8, 0], sizes = [8, 128], strides = [1, 1]} : vector<16x128xf32> to vector<8x128xf32>
    %411 = vector.extract_strided_slice %319 {offsets = [8, 0], sizes = [8, 128], strides = [1, 1]} : vector<16x128xf32> to vector<8x128xf32>
    %412 = vector.extract_strided_slice %318 {offsets = [8, 0], sizes = [8, 128], strides = [1, 1]} : vector<16x128xf32> to vector<8x128xf32>
    %413 = tpu.transpose %412, [1, 0] : vector<8x128xf32> -> vector<128x8xf32>
    %c1_167 = arith.constant 1 : index
    %c0_168 = arith.constant 0 : index
    %c0_169 = arith.constant 0 : index
    %414 = vector.load %arg1[%c1_167, %c0_168, %c0_169] : memref<2x1x8xf32, #tpu.memory_space<vmem>>, vector<1x1x8xf32>
    %415 = vector.shape_cast %414 : vector<1x1x8xf32> to vector<1x8xf32>
    %cst_170 = arith.constant 1.000000e+00 : f32
    %416 = vector.broadcast %cst_170 : f32 to vector<1x8xf32>
    %417 = arith.subf %416, %415 : vector<1x8xf32>
    %cst_171 = arith.constant -1.000000e+09 : f32
    %418 = vector.broadcast %cst_171 : f32 to vector<1x8xf32>
    %419 = arith.mulf %417, %418 : vector<1x8xf32>
    %420 = vector.extract_strided_slice %410 {offsets = [0, 0], sizes = [8, 32], strides = [1, 1]} : vector<8x128xf32> to vector<8x32xf32>
    %421 = vector.extract_strided_slice %413 {offsets = [0, 0], sizes = [32, 8], strides = [1, 1]} : vector<128x8xf32> to vector<32x8xf32>
    %cst_172 = arith.constant dense<0.000000e+00> : vector<8x8xf32>
    %422 = tpu.matmul %420, %421, %cst_172 {dimension_numbers = #tpu.dot_dimension_numbers<[1], [0], [0], [1], [0, 0, 1, 1], [], []>} : vector<8x32xf32>, vector<32x8xf32>, vector<8x8xf32> -> vector<8x8xf32>
    %cst_173 = arith.constant 0.176776692 : f32
    %423 = vector.broadcast %cst_173 : f32 to vector<8x8xf32>
    %424 = arith.mulf %422, %423 : vector<8x8xf32>
    %425 = vector.broadcast %419 : vector<1x8xf32> to vector<8x8xf32>
    %426 = arith.addf %424, %425 : vector<8x8xf32>
    %cst_174 = arith.constant dense<0xFF800000> : vector<8xf32>
    %427 = vector.multi_reduction <maximumf>, %426, %cst_174 [1] : vector<8x8xf32> to vector<8xf32>
    %428 = vector.shape_cast %427 : vector<8xf32> to vector<8x1xf32>
    %429 = vector.broadcast %428 : vector<8x1xf32> to vector<8x8xf32>
    %430 = arith.subf %426, %429 : vector<8x8xf32>
    %431 = math.exp %430 : vector<8x8xf32>
    %cst_175 = arith.constant dense<0.000000e+00> : vector<8xf32>
    %432 = vector.multi_reduction <add>, %431, %cst_175 [1] : vector<8x8xf32> to vector<8xf32>
    %433 = vector.shape_cast %432 : vector<8xf32> to vector<8x1xf32>
    %434 = tpu.reciprocal %433 {approx = true} : vector<8x1xf32> -> vector<8x1xf32>
    %435 = vector.broadcast %434 : vector<8x1xf32> to vector<8x8xf32>
    %436 = arith.mulf %431, %435 : vector<8x8xf32>
    %437 = vector.extract_strided_slice %411 {offsets = [0, 0], sizes = [8, 32], strides = [1, 1]} : vector<8x128xf32> to vector<8x32xf32>
    %cst_176 = arith.constant dense<0.000000e+00> : vector<8x32xf32>
    %438 = tpu.matmul %436, %437, %cst_176 {dimension_numbers = #tpu.dot_dimension_numbers<[1], [0], [0], [1], [0, 0, 1, 1], [], []>} : vector<8x8xf32>, vector<8x32xf32>, vector<8x32xf32> -> vector<8x32xf32>
    %c8_177 = arith.constant 8 : index
    %c0_178 = arith.constant 0 : index
    %439 = vector.load %arg20[%c8_177, %c0_178] : memref<16x128xf32, #tpu.memory_space<vmem>>, vector<8x32xf32>
    tpu.vector_store %arg20[%c8_177, %c0_178], %438 {strides = array<i32>} : memref<16x128xf32, #tpu.memory_space<vmem>>, vector<8x32xf32>,
    %440 = vector.extract_strided_slice %410 {offsets = [0, 32], sizes = [8, 32], strides = [1, 1]} : vector<8x128xf32> to vector<8x32xf32>
    %441 = vector.extract_strided_slice %413 {offsets = [32, 0], sizes = [32, 8], strides = [1, 1]} : vector<128x8xf32> to vector<32x8xf32>
    %cst_179 = arith.constant dense<0.000000e+00> : vector<8x8xf32>
    %442 = tpu.matmul %440, %441, %cst_179 {dimension_numbers = #tpu.dot_dimension_numbers<[1], [0], [0], [1], [0, 0, 1, 1], [], []>} : vector<8x32xf32>, vector<32x8xf32>, vector<8x8xf32> -> vector<8x8xf32>
    %cst_180 = arith.constant 0.176776692 : f32
    %443 = vector.broadcast %cst_180 : f32 to vector<8x8xf32>
    %444 = arith.mulf %442, %443 : vector<8x8xf32>
    %445 = vector.broadcast %419 : vector<1x8xf32> to vector<8x8xf32>
    %446 = arith.addf %444, %445 : vector<8x8xf32>
    %cst_181 = arith.constant dense<0xFF800000> : vector<8xf32>
    %447 = vector.multi_reduction <maximumf>, %446, %cst_181 [1] : vector<8x8xf32> to vector<8xf32>
    %448 = vector.shape_cast %447 : vector<8xf32> to vector<8x1xf32>
    %449 = vector.broadcast %448 : vector<8x1xf32> to vector<8x8xf32>
    %450 = arith.subf %446, %449 : vector<8x8xf32>
    %451 = math.exp %450 : vector<8x8xf32>
    %cst_182 = arith.constant dense<0.000000e+00> : vector<8xf32>
    %452 = vector.multi_reduction <add>, %451, %cst_182 [1] : vector<8x8xf32> to vector<8xf32>
    %453 = vector.shape_cast %452 : vector<8xf32> to vector<8x1xf32>
    %454 = tpu.reciprocal %453 {approx = true} : vector<8x1xf32> -> vector<8x1xf32>
    %455 = vector.broadcast %454 : vector<8x1xf32> to vector<8x8xf32>
    %456 = arith.mulf %451, %455 : vector<8x8xf32>
    %457 = vector.extract_strided_slice %411 {offsets = [0, 32], sizes = [8, 32], strides = [1, 1]} : vector<8x128xf32> to vector<8x32xf32>
    %cst_183 = arith.constant dense<0.000000e+00> : vector<8x32xf32>
    %458 = tpu.matmul %456, %457, %cst_183 {dimension_numbers = #tpu.dot_dimension_numbers<[1], [0], [0], [1], [0, 0, 1, 1], [], []>} : vector<8x8xf32>, vector<8x32xf32>, vector<8x32xf32> -> vector<8x32xf32>
    %c8_184 = arith.constant 8 : index
    %c32_185 = arith.constant 32 : index
    %459 = vector.load %arg20[%c8_184, %c32_185] : memref<16x128xf32, #tpu.memory_space<vmem>>, vector<8x32xf32>
    tpu.vector_store %arg20[%c8_184, %c32_185], %458 {strides = array<i32>} : memref<16x128xf32, #tpu.memory_space<vmem>>, vector<8x32xf32>,
    %460 = vector.extract_strided_slice %410 {offsets = [0, 64], sizes = [8, 32], strides = [1, 1]} : vector<8x128xf32> to vector<8x32xf32>
    %461 = vector.extract_strided_slice %413 {offsets = [64, 0], sizes = [32, 8], strides = [1, 1]} : vector<128x8xf32> to vector<32x8xf32>
    %cst_186 = arith.constant dense<0.000000e+00> : vector<8x8xf32>
    %462 = tpu.matmul %460, %461, %cst_186 {dimension_numbers = #tpu.dot_dimension_numbers<[1], [0], [0], [1], [0, 0, 1, 1], [], []>} : vector<8x32xf32>, vector<32x8xf32>, vector<8x8xf32> -> vector<8x8xf32>
    %cst_187 = arith.constant 0.176776692 : f32
    %463 = vector.broadcast %cst_187 : f32 to vector<8x8xf32>
    %464 = arith.mulf %462, %463 : vector<8x8xf32>
    %465 = vector.broadcast %419 : vector<1x8xf32> to vector<8x8xf32>
    %466 = arith.addf %464, %465 : vector<8x8xf32>
    %cst_188 = arith.constant dense<0xFF800000> : vector<8xf32>
    %467 = vector.multi_reduction <maximumf>, %466, %cst_188 [1] : vector<8x8xf32> to vector<8xf32>
    %468 = vector.shape_cast %467 : vector<8xf32> to vector<8x1xf32>
    %469 = vector.broadcast %468 : vector<8x1xf32> to vector<8x8xf32>
    %470 = arith.subf %466, %469 : vector<8x8xf32>
    %471 = math.exp %470 : vector<8x8xf32>
    %cst_189 = arith.constant dense<0.000000e+00> : vector<8xf32>
    %472 = vector.multi_reduction <add>, %471, %cst_189 [1] : vector<8x8xf32> to vector<8xf32>
    %473 = vector.shape_cast %472 : vector<8xf32> to vector<8x1xf32>
    %474 = tpu.reciprocal %473 {approx = true} : vector<8x1xf32> -> vector<8x1xf32>
    %475 = vector.broadcast %474 : vector<8x1xf32> to vector<8x8xf32>
    %476 = arith.mulf %471, %475 : vector<8x8xf32>
    %477 = vector.extract_strided_slice %411 {offsets = [0, 64], sizes = [8, 32], strides = [1, 1]} : vector<8x128xf32> to vector<8x32xf32>
    %cst_190 = arith.constant dense<0.000000e+00> : vector<8x32xf32>
    %478 = tpu.matmul %476, %477, %cst_190 {dimension_numbers = #tpu.dot_dimension_numbers<[1], [0], [0], [1], [0, 0, 1, 1], [], []>} : vector<8x8xf32>, vector<8x32xf32>, vector<8x32xf32> -> vector<8x32xf32>
    %c8_191 = arith.constant 8 : index
    %c64_192 = arith.constant 64 : index
    %479 = vector.load %arg20[%c8_191, %c64_192] : memref<16x128xf32, #tpu.memory_space<vmem>>, vector<8x32xf32>
    tpu.vector_store %arg20[%c8_191, %c64_192], %478 {strides = array<i32>} : memref<16x128xf32, #tpu.memory_space<vmem>>, vector<8x32xf32>,
    %480 = vector.extract_strided_slice %410 {offsets = [0, 96], sizes = [8, 32], strides = [1, 1]} : vector<8x128xf32> to vector<8x32xf32>
    %481 = vector.extract_strided_slice %413 {offsets = [96, 0], sizes = [32, 8], strides = [1, 1]} : vector<128x8xf32> to vector<32x8xf32>
    %cst_193 = arith.constant dense<0.000000e+00> : vector<8x8xf32>
    %482 = tpu.matmul %480, %481, %cst_193 {dimension_numbers = #tpu.dot_dimension_numbers<[1], [0], [0], [1], [0, 0, 1, 1], [], []>} : vector<8x32xf32>, vector<32x8xf32>, vector<8x8xf32> -> vector<8x8xf32>
    %cst_194 = arith.constant 0.176776692 : f32
    %483 = vector.broadcast %cst_194 : f32 to vector<8x8xf32>
    %484 = arith.mulf %482, %483 : vector<8x8xf32>
    %485 = vector.broadcast %419 : vector<1x8xf32> to vector<8x8xf32>
    %486 = arith.addf %484, %485 : vector<8x8xf32>
    %cst_195 = arith.constant dense<0xFF800000> : vector<8xf32>
    %487 = vector.multi_reduction <maximumf>, %486, %cst_195 [1] : vector<8x8xf32> to vector<8xf32>
    %488 = vector.shape_cast %487 : vector<8xf32> to vector<8x1xf32>
    %489 = vector.broadcast %488 : vector<8x1xf32> to vector<8x8xf32>
    %490 = arith.subf %486, %489 : vector<8x8xf32>
    %491 = math.exp %490 : vector<8x8xf32>
    %cst_196 = arith.constant dense<0.000000e+00> : vector<8xf32>
    %492 = vector.multi_reduction <add>, %491, %cst_196 [1] : vector<8x8xf32> to vector<8xf32>
    %493 = vector.shape_cast %492 : vector<8xf32> to vector<8x1xf32>
    %494 = tpu.reciprocal %493 {approx = true} : vector<8x1xf32> -> vector<8x1xf32>
    %495 = vector.broadcast %494 : vector<8x1xf32> to vector<8x8xf32>
    %496 = arith.mulf %491, %495 : vector<8x8xf32>
    %497 = vector.extract_strided_slice %411 {offsets = [0, 96], sizes = [8, 32], strides = [1, 1]} : vector<8x128xf32> to vector<8x32xf32>
    %cst_197 = arith.constant dense<0.000000e+00> : vector<8x32xf32>
    %498 = tpu.matmul %496, %497, %cst_197 {dimension_numbers = #tpu.dot_dimension_numbers<[1], [0], [0], [1], [0, 0, 1, 1], [], []>} : vector<8x8xf32>, vector<8x32xf32>, vector<8x32xf32> -> vector<8x32xf32>
    %c8_198 = arith.constant 8 : index
    %c96_199 = arith.constant 96 : index
    %499 = vector.load %arg20[%c8_198, %c96_199] : memref<16x128xf32, #tpu.memory_space<vmem>>, vector<8x32xf32>
    tpu.vector_store %arg20[%c8_198, %c96_199], %498 {strides = array<i32>} : memref<16x128xf32, #tpu.memory_space<vmem>>, vector<8x32xf32>,
    %c0_200 = arith.constant 0 : index
    %c0_201 = arith.constant 0 : index
    %500 = vector.load %arg20[%c0_200, %c0_201] : memref<16x128xf32, #tpu.memory_space<vmem>>, vector<16x128xf32>
    %c1_202 = arith.constant 1 : index
    %c0_203 = arith.constant 0 : index
    %c0_204 = arith.constant 0 : index
    %501 = vector.load %arg7[%c1_202, %c0_203, %c0_204] : memref<2x128x128xbf16, #tpu.memory_space<vmem>>, vector<1x128x128xbf16>
    %502 = vector.shape_cast %501 : vector<1x128x128xbf16> to vector<128x128xbf16>
    %503 = arith.extf %502 : vector<128x128xbf16> to vector<128x128xf32>
    %cst_205 = arith.constant dense<0.000000e+00> : vector<16x128xf32>
    %504 = tpu.matmul %500, %503, %cst_205 {dimension_numbers = #tpu.dot_dimension_numbers<[1], [0], [0], [1], [0, 0, 1, 1], [], []>} : vector<16x128xf32>, vector<128x128xf32>, vector<16x128xf32> -> vector<16x128xf32>
    %c1_206 = arith.constant 1 : index
    %c0_207 = arith.constant 0 : index
    %c0_208 = arith.constant 0 : index
    %505 = vector.load %arg8[%c1_206, %c0_207, %c0_208] : memref<2x1x128xf32, #tpu.memory_space<vmem>>, vector<1x1x128xf32>
    %506 = vector.shape_cast %505 : vector<1x1x128xf32> to vector<1x128xf32>
    %507 = vector.broadcast %506 : vector<1x128xf32> to vector<16x128xf32>
    %508 = arith.addf %504, %507 : vector<16x128xf32>
    %509 = arith.addf %308, %508 : vector<16x128xf32>
    %c1_209 = arith.constant 1 : index
    %c0_210 = arith.constant 0 : index
    %c0_211 = arith.constant 0 : index
    %510 = vector.load %arg9[%c1_209, %c0_210, %c0_211] : memref<2x1x128xf32, #tpu.memory_space<vmem>>, vector<1x1x128xf32>
    %511 = vector.shape_cast %510 : vector<1x1x128xf32> to vector<1x128xf32>
    %c1_212 = arith.constant 1 : index
    %c0_213 = arith.constant 0 : index
    %c0_214 = arith.constant 0 : index
    %512 = vector.load %arg10[%c1_212, %c0_213, %c0_214] : memref<2x1x128xf32, #tpu.memory_space<vmem>>, vector<1x1x128xf32>
    %513 = vector.shape_cast %512 : vector<1x1x128xf32> to vector<1x128xf32>
    %cst_215 = arith.constant dense<0.000000e+00> : vector<16xf32>
    %514 = vector.multi_reduction <add>, %509, %cst_215 [1] : vector<16x128xf32> to vector<16xf32>
    %515 = vector.shape_cast %514 : vector<16xf32> to vector<16x1xf32>
    %cst_216 = arith.constant 1.280000e+02 : f32
    %516 = vector.broadcast %cst_216 : f32 to vector<16x1xf32>
    %517 = arith.divf %515, %516 : vector<16x1xf32>
    %518 = vector.broadcast %517 : vector<16x1xf32> to vector<16x128xf32>
    %519 = arith.subf %509, %518 : vector<16x128xf32>
    %520 = arith.mulf %519, %519 : vector<16x128xf32>
    %cst_217 = arith.constant dense<0.000000e+00> : vector<16xf32>
    %521 = vector.multi_reduction <add>, %520, %cst_217 [1] : vector<16x128xf32> to vector<16xf32>
    %522 = vector.shape_cast %521 : vector<16xf32> to vector<16x1xf32>
    %cst_218 = arith.constant 1.280000e+02 : f32
    %523 = vector.broadcast %cst_218 : f32 to vector<16x1xf32>
    %524 = arith.divf %522, %523 : vector<16x1xf32>
    %525 = vector.broadcast %517 : vector<16x1xf32> to vector<16x128xf32>
    %526 = arith.subf %509, %525 : vector<16x128xf32>
    %cst_219 = arith.constant 9.99999996E-13 : f32
    %527 = vector.broadcast %cst_219 : f32 to vector<16x1xf32>
    %528 = arith.addf %524, %527 : vector<16x1xf32>
    %529 = math.rsqrt %528 : vector<16x1xf32>
    %530 = vector.broadcast %529 : vector<16x1xf32> to vector<16x128xf32>
    %531 = arith.mulf %526, %530 : vector<16x128xf32>
    %532 = vector.broadcast %511 : vector<1x128xf32> to vector<16x128xf32>
    %533 = arith.mulf %531, %532 : vector<16x128xf32>
    %534 = vector.broadcast %513 : vector<1x128xf32> to vector<16x128xf32>
    %535 = arith.addf %533, %534 : vector<16x128xf32>
    %c1_220 = arith.constant 1 : index
    %c0_221 = arith.constant 0 : index
    %c0_222 = arith.constant 0 : index
    %536 = vector.load %arg11[%c1_220, %c0_221, %c0_222] : memref<2x128x256xbf16, #tpu.memory_space<vmem>>, vector<1x128x256xbf16>
    %537 = vector.shape_cast %536 : vector<1x128x256xbf16> to vector<128x256xbf16>
    %538 = arith.extf %537 : vector<128x256xbf16> to vector<128x256xf32>
    %cst_223 = arith.constant dense<0.000000e+00> : vector<16x256xf32>
    %539 = tpu.matmul %535, %538, %cst_223 {dimension_numbers = #tpu.dot_dimension_numbers<[1], [0], [0], [1], [0, 0, 1, 1], [], []>} : vector<16x128xf32>, vector<128x256xf32>, vector<16x256xf32> -> vector<16x256xf32>
    %c1_224 = arith.constant 1 : index
    %c0_225 = arith.constant 0 : index
    %c0_226 = arith.constant 0 : index
    %540 = vector.load %arg12[%c1_224, %c0_225, %c0_226] : memref<2x1x256xf32, #tpu.memory_space<vmem>>, vector<1x1x256xf32>
    %541 = vector.shape_cast %540 : vector<1x1x256xf32> to vector<1x256xf32>
    %542 = vector.broadcast %541 : vector<1x256xf32> to vector<16x256xf32>
    %543 = arith.addf %539, %542 : vector<16x256xf32>
    %544 = arith.mulf %543, %543 : vector<16x256xf32>
    %545 = arith.mulf %543, %544 : vector<16x256xf32>
    %cst_227 = arith.constant 4.471500e-02 : f32
    %546 = vector.broadcast %cst_227 : f32 to vector<16x256xf32>
    %547 = arith.mulf %546, %545 : vector<16x256xf32>
    %548 = arith.addf %543, %547 : vector<16x256xf32>
    %cst_228 = arith.constant 0.797884583 : f32
    %549 = vector.broadcast %cst_228 : f32 to vector<16x256xf32>
    %550 = arith.mulf %549, %548 : vector<16x256xf32>
    %551 = math.tanh %550 : vector<16x256xf32>
    %cst_229 = arith.constant 1.000000e+00 : f32
    %552 = vector.broadcast %cst_229 : f32 to vector<16x256xf32>
    %553 = arith.addf %552, %551 : vector<16x256xf32>
    %cst_230 = arith.constant 5.000000e-01 : f32
    %554 = vector.broadcast %cst_230 : f32 to vector<16x256xf32>
    %555 = arith.mulf %554, %553 : vector<16x256xf32>
    %556 = arith.mulf %543, %555 : vector<16x256xf32>
    %c1_231 = arith.constant 1 : index
    %c0_232 = arith.constant 0 : index
    %c0_233 = arith.constant 0 : index
    %557 = vector.load %arg13[%c1_231, %c0_232, %c0_233] : memref<2x256x128xbf16, #tpu.memory_space<vmem>>, vector<1x256x128xbf16>
    %558 = vector.shape_cast %557 : vector<1x256x128xbf16> to vector<256x128xbf16>
    %559 = arith.extf %558 : vector<256x128xbf16> to vector<256x128xf32>
    %cst_234 = arith.constant dense<0.000000e+00> : vector<16x128xf32>
    %560 = tpu.matmul %556, %559, %cst_234 {dimension_numbers = #tpu.dot_dimension_numbers<[1], [0], [0], [1], [0, 0, 1, 1], [], []>} : vector<16x256xf32>, vector<256x128xf32>, vector<16x128xf32> -> vector<16x128xf32>
    %c1_235 = arith.constant 1 : index
    %c0_236 = arith.constant 0 : index
    %c0_237 = arith.constant 0 : index
    %561 = vector.load %arg14[%c1_235, %c0_236, %c0_237] : memref<2x1x128xf32, #tpu.memory_space<vmem>>, vector<1x1x128xf32>
    %562 = vector.shape_cast %561 : vector<1x1x128xf32> to vector<1x128xf32>
    %563 = vector.broadcast %562 : vector<1x128xf32> to vector<16x128xf32>
    %564 = arith.addf %560, %563 : vector<16x128xf32>
    %565 = arith.addf %535, %564 : vector<16x128xf32>
    %c1_238 = arith.constant 1 : index
    %c0_239 = arith.constant 0 : index
    %c0_240 = arith.constant 0 : index
    %566 = vector.load %arg15[%c1_238, %c0_239, %c0_240] : memref<2x1x128xf32, #tpu.memory_space<vmem>>, vector<1x1x128xf32>
    %567 = vector.shape_cast %566 : vector<1x1x128xf32> to vector<1x128xf32>
    %c1_241 = arith.constant 1 : index
    %c0_242 = arith.constant 0 : index
    %c0_243 = arith.constant 0 : index
    %568 = vector.load %arg16[%c1_241, %c0_242, %c0_243] : memref<2x1x128xf32, #tpu.memory_space<vmem>>, vector<1x1x128xf32>
    %569 = vector.shape_cast %568 : vector<1x1x128xf32> to vector<1x128xf32>
    %cst_244 = arith.constant dense<0.000000e+00> : vector<16xf32>
    %570 = vector.multi_reduction <add>, %565, %cst_244 [1] : vector<16x128xf32> to vector<16xf32>
    %571 = vector.shape_cast %570 : vector<16xf32> to vector<16x1xf32>
    %cst_245 = arith.constant 1.280000e+02 : f32
    %572 = vector.broadcast %cst_245 : f32 to vector<16x1xf32>
    %573 = arith.divf %571, %572 : vector<16x1xf32>
    %574 = vector.broadcast %573 : vector<16x1xf32> to vector<16x128xf32>
    %575 = arith.subf %565, %574 : vector<16x128xf32>
    %576 = arith.mulf %575, %575 : vector<16x128xf32>
    %cst_246 = arith.constant dense<0.000000e+00> : vector<16xf32>
    %577 = vector.multi_reduction <add>, %576, %cst_246 [1] : vector<16x128xf32> to vector<16xf32>
    %578 = vector.shape_cast %577 : vector<16xf32> to vector<16x1xf32>
    %cst_247 = arith.constant 1.280000e+02 : f32
    %579 = vector.broadcast %cst_247 : f32 to vector<16x1xf32>
    %580 = arith.divf %578, %579 : vector<16x1xf32>
    %581 = vector.broadcast %573 : vector<16x1xf32> to vector<16x128xf32>
    %582 = arith.subf %565, %581 : vector<16x128xf32>
    %cst_248 = arith.constant 9.99999996E-13 : f32
    %583 = vector.broadcast %cst_248 : f32 to vector<16x1xf32>
    %584 = arith.addf %580, %583 : vector<16x1xf32>
    %585 = math.rsqrt %584 : vector<16x1xf32>
    %586 = vector.broadcast %585 : vector<16x1xf32> to vector<16x128xf32>
    %587 = arith.mulf %582, %586 : vector<16x128xf32>
    %588 = vector.broadcast %567 : vector<1x128xf32> to vector<16x128xf32>
    %589 = arith.mulf %587, %588 : vector<16x128xf32>
    %590 = vector.broadcast %569 : vector<1x128xf32> to vector<16x128xf32>
    %591 = arith.addf %589, %590 : vector<16x128xf32>
    %c0_249 = arith.constant 0 : index
    %c0_250 = arith.constant 0 : index
    %592 = vector.load %arg2[%c0_249, %c0_250] : memref<2x16xf32, #tpu.memory_space<vmem>>, vector<2x16xf32>
    %cst_251 = arith.constant dense<0.000000e+00> : vector<2x128xf32>
    %593 = tpu.matmul %592, %591, %cst_251 {dimension_numbers = #tpu.dot_dimension_numbers<[1], [0], [0], [1], [0, 0, 1, 1], [], []>} : vector<2x16xf32>, vector<16x128xf32>, vector<2x128xf32> -> vector<2x128xf32>
    %cst_252 = arith.constant dense<0.000000e+00> : vector<2xf32>
    %594 = vector.multi_reduction <add>, %592, %cst_252 [1] : vector<2x16xf32> to vector<2xf32>
    %595 = vector.shape_cast %594 : vector<2xf32> to vector<2x1xf32>
    %cst_253 = arith.constant 9.99999971E-10 : f32
    %596 = vector.broadcast %cst_253 : f32 to vector<2x1xf32>
    %597 = arith.maximumf %595, %596 : vector<2x1xf32>
    %598 = tpu.reciprocal %597 {approx = true} : vector<2x1xf32> -> vector<2x1xf32>
    %599 = vector.broadcast %598 : vector<2x1xf32> to vector<2x128xf32>
    %600 = arith.mulf %593, %599 : vector<2x128xf32>
    %c0_254 = arith.constant 0 : index
    %c0_255 = arith.constant 0 : index
    %601 = vector.load %arg17[%c0_254, %c0_255] : memref<128x128xbf16, #tpu.memory_space<vmem>>, vector<128x128xbf16>
    %602 = arith.extf %601 : vector<128x128xbf16> to vector<128x128xf32>
    %cst_256 = arith.constant dense<0.000000e+00> : vector<2x128xf32>
    %603 = tpu.matmul %600, %602, %cst_256 {dimension_numbers = #tpu.dot_dimension_numbers<[1], [0], [0], [1], [0, 0, 1, 1], [], []>} : vector<2x128xf32>, vector<128x128xf32>, vector<2x128xf32> -> vector<2x128xf32>
    %c0_257 = arith.constant 0 : index
    %c0_258 = arith.constant 0 : index
    %604 = vector.load %arg18[%c0_257, %c0_258] : memref<1x128xf32, #tpu.memory_space<vmem>>, vector<1x128xf32>
    %605 = vector.broadcast %604 : vector<1x128xf32> to vector<2x128xf32>
    %606 = arith.addf %603, %605 : vector<2x128xf32>
    %c0_259 = arith.constant 0 : index
    %c0_260 = arith.constant 0 : index
    %607 = vector.load %arg19[%c0_259, %c0_260] : memref<2x128xf32, #tpu.memory_space<vmem>>, vector<2x128xf32>
    tpu.vector_store %arg19[%c0_259, %c0_260], %606 {strides = array<i32>} : memref<2x128xf32, #tpu.memory_space<vmem>>, vector<2x128xf32>,
    return
  }
}

</mosaic_0001>

<bundles_post_ra>
// kernel: custom_encoder_forward.1
= control target key start
LH: loop header
LB: loop body
LE: loop exit
PB: predicated region body
PF: predicated region fallthrough
CT: control target
= control target key end

     0   :  { %s6533_s0 = inlined_call_operand.vmem [shape: f32[2,8,128], index: 0, kind: input, shape index: {}]   ;;  %s6534_s1 = inlined_call_operand.vmem [shape: f32[2,1,8], index: 1, kind: input, shape index: {}]   ;;  %s6535_s2 = inlined_call_operand.vmem [shape: f32[2,16], index: 2, kind: input, shape index: {}]   ;;  %s6536_s3 = inlined_call_operand.vmem [shape: f32[1,128], index: 3, kind: input, shape index: {}]   ;;  %s6537_s4 = inlined_call_operand.vmem [shape: f32[1,128], index: 4, kind: input, shape index: {}]   ;;  %s6538_s5 = inlined_call_operand.hbm [shape: bf16[2,128,384], index: 5, kind: input, shape index: {}]   ;;  %s6539_s6 = inlined_call_operand.vmem [shape: f32[2,1,384], index: 6, kind: input, shape index: {}]   ;;  %s6540_s7 = inlined_call_operand.vmem [shape: bf16[2,128,128], index: 7, kind: input, shape index: {}]   ;;  %s6541_s8 = inlined_call_operand.vmem [shape: f32[2,1,128], index: 8, kind: input, shape index: {}]   ;;  %s6542_s9 = inlined_call_operand.vmem [shape: f32[2,1,128], index: 9, kind: input, shape index: {}]   ;;  %s6543_s10 = inlined_call_operand.vmem [shape: f32[2,1,128], index: 10, kind: input, shape index: {}]   ;;  %s6544_s11 = inlined_call_operand.hbm [shape: bf16[2,128,256], index: 11, kind: input, shape index: {}]   ;;  %s6545_s12 = inlined_call_operand.vmem [shape: f32[2,1,256], index: 12, kind: input, shape index: {}]   ;;  %s6546_s13 = inlined_call_operand.hbm [shape: bf16[2,256,128], index: 13, kind: input, shape index: {}]   ;;  %s6547_s14 = inlined_call_operand.vmem [shape: f32[2,1,128], index: 14, kind: input, shape index: {}]   ;;  %s6548_s15 = inlined_call_operand.vmem [shape: f32[2,1,128], index: 15, kind: input, shape index: {}]   ;;  %s6549_s16 = inlined_call_operand.vmem [shape: f32[2,1,128], index: 16, kind: input, shape index: {}]   ;;  %s6550_s17 = inlined_call_operand.vmem [shape: bf16[128,128], index: 17, kind: input, shape index: {}]   ;;  %s6551_s18 = inlined_call_operand.vmem [shape: f32[1,128], index: 18, kind: input, shape index: {}]   ;;  %s6552_s19 = inlined_call_operand.hbm [shape: f32[2,128], index: 19, kind: output, shape index: {}]  }
   0x1   :  { %6555 = sst [smem:[#allocation13_spill]] %s6533_s0 }
   0x2   :  { %6556 = sst [smem:[#allocation14_spill]] %s6534_s1 }
   0x3   :  { %6557 = sst [smem:[#allocation15_spill]] %s6535_s2 }
   0x4   :  { %6558 = sst [smem:[#allocation16_spill]] %s6536_s3 }
   0x5   :  { %24 = vsyncpa [#allocation4], 0 }
   0x6   :  { %25 = vsyncpa [#allocation7], 0 }
   0x7   :  { %26 = vsyncpa [#allocation5], 0  ;;  %s5807_s0 = smov [#allocation6]  }
   0x8   :  { %s64_s30 = sshll.u32 %s5807_s0, 4  ;;  %s65_s30 = int_to_ptr.vmem [resolvable:$true] %s64_s30 }
   0x9   :  { %s5729_s20 = scalar_lea.vmem %s65_s30, 4096  ;;  %p5734_p1 = scmp.lt.s32.totalorder %s65_s30, %s65_s30 }
   0xa   :  { %p5730_p0 = scmp.ne.s32.totalorder %s65_s30, %s5729_s20  ;;  %p5735_p2 = scmp.lt.s32.totalorder %s5729_s20, %s5729_s20 }
   0xc   :  { %p5736_p3 = por %p5735_p2, %p5734_p1 }
   0xe   :  { %p5737_p4 = pnand %p5736_p3, %p5730_p0 }
  0x10   :  { %5740 = shalt.err (!%p5737_p4)
}
  0x11   :  { %s5808_s21 = smov 128   ;;  %s5809_s1 = smov 8  }
  0x12   :  { %70 = dma.hbm_to_vmem [thread:$0]  %s6544_s11, 4096, %s65_s30, [#allocation7], %s5808_s21, %s5808_s21, %s5809_s1  }
  0x13   :  { %s5810_s23 = smov [#allocation3]  }
  0x14   :  { %s42_s24 = sshll.u32 %s5810_s23, 4  ;;  %s43_s24 = int_to_ptr.vmem [resolvable:$true] %s42_s24 }
  0x15   :  { %s5749_s25 = scalar_lea.vmem %s43_s24, 6144  ;;  %p5754_p6 = scmp.lt.s32.totalorder %s43_s24, %s43_s24 }
  0x16   :  { %p5750_p5 = scmp.ne.s32.totalorder %s43_s24, %s5749_s25  ;;  %p5755_p7 = scmp.lt.s32.totalorder %s5749_s25, %s5749_s25 }
  0x18   :  { %p5756_p8 = por %p5755_p7, %p5754_p6 }
  0x1a   :  { %p5757_p9 = pnand %p5756_p8, %p5750_p5 }
  0x1c   :  { %5760 = shalt.err (!%p5757_p9)
}
  0x1d   :  { %s5811_s3 = smov 192   ;;  %s5812_s26 = smov 12  }
  0x1e   :  { %48 = dma.hbm_to_vmem [thread:$0]  %s6538_s5, 6144, %s43_s24, [#allocation4], %s5811_s3, %s5811_s3, %s5812_s26  }
  0x1f   :  { %s5813_s29 = smov [#allocation8]  }
  0x20   :  { %s78_s0 = sshll.u32 %s5813_s29, 4  ;;  %s79_s0 = int_to_ptr.vmem [resolvable:$true] %s78_s0 }
  0x21   :  { %s5769_s11 = scalar_lea.vmem %s79_s0, 4096  ;;  %p5774_p11 = scmp.lt.s32.totalorder %s79_s0, %s79_s0 }
  0x22   :  { %p5770_p10 = scmp.ne.s32.totalorder %s79_s0, %s5769_s11  ;;  %p5775_p12 = scmp.lt.s32.totalorder %s5769_s11, %s5769_s11 }
  0x24   :  { %p5776_p13 = por %p5775_p12, %p5774_p11 }
  0x26   :  { %p5777_p0 = pnand %p5776_p13, %p5770_p10 }
  0x28   :  { %5780 = shalt.err (!%p5777_p0)
}
  0x29   :  { %s5814_s30 = smov 64   ;;  %s5815_s20 = smov 4  }
  0x2a   :  { %84 = dma.hbm_to_vmem [thread:$0]  %s6546_s13, 4096, %s79_s0, [#allocation7], %s5814_s30, %s5814_s30, %s5815_s20  }
  0x2b   :  { %5801 = dma.done.wait [#allocation4], 6144  }
  0x2c   :  { %5802 = vsyncadd [#allocation4], 4294961152 }
  0x2d   :  { %5803 = dma.done.wait [#allocation7], 8192  }
  0x2e   :  { %5804 = vsyncadd [#allocation7], 4294959104  ;;  %s6559_s2 = sld [smem:[#allocation13_spill]]  ;;  %v177_v2 = vld [vmem:[#allocation3 + $0xb4] sm:$0xff]  ;;  %v175_v3 = vld [vmem:[#allocation3 + $0xa8] sm:$0xff]  ;;  %vm5817_vm0 = vmmov 0  }
  0x2f   :  { %v173_v4 = vld [vmem:[#allocation3 + $0x9c] sm:$0xff]  ;;  %v225_v5 = vunpack.c.h.bf16 %v177_v2  ;;  %v224_v6 = vunpack.c.l.bf16 %v177_v2  ;;  %v222_v7 = vunpack.c.h.bf16 %v175_v3  ;;  %v221_v9 = vunpack.c.l.bf16 %v175_v3  ;;  %v171_v11 = vld [vmem:[#allocation3 + $0x90] sm:$0xff]  ;;  %v169_v25 = vld [vmem:[#allocation3 + $0x84] sm:$0xff]  ;;  %s6560_s3 = sld [smem:[#allocation16_spill]]  ;;  %s5818_s29 = smov 96  }
  0x30   :  { %v178_v8 = vld [vmem:[#allocation3 + $0xb0] ss:$12 sps:$4 sm:$0xff]   ;;  %v219_v12 = vunpack.c.h.bf16 %v173_v4  ;;  %v218_v14 = vunpack.c.l.bf16 %v173_v4  ;;  %v216_v15 = vunpack.c.h.bf16 %v171_v11  ;;  %v215_v16 = vunpack.c.l.bf16 %v171_v11  ;;  %v174_v26 = vld [vmem:[#allocation3 + $0x98] ss:$12 sps:$4 sm:$0xff]   ;;  %v170_v35 = vld [vmem:[#allocation3 + $0x80] ss:$12 sps:$4 sm:$0xff]  }
  0x31   :  { %v226_v10 = vunpack.c.h.bf16 %v178_v8  ;;  %244 = vmatprep.subr.mxu0 %v225_v5  ;;  %v223_v13 = vunpack.c.l.bf16 %v178_v8  ;;  %v213_v27 = vunpack.c.h.bf16 %v169_v25  ;;  %v220_v28 = vunpack.c.h.bf16 %v174_v26  ;;  %v167_v30 = vld [vmem:[#allocation3 + $0x78] sm:$0xff]  ;;  %v165_v34 = vld [vmem:[#allocation3 + $0x6c] sm:$0xff]  ;;  %v163_v39 = vld [vmem:[#allocation3 + $0x60] sm:$0xff]  ;;  %s5819_s0 = smov 32   ;;  %s6561_s21 = sld [smem:[#allocation14_spill]] }
  0x32   :  { %245 = vmatpush1.msra.mxu0 %v224_v6  ;;  %v212_v29 = vunpack.c.l.bf16 %v169_v25  ;;  %v210_v31 = vunpack.c.h.bf16 %v167_v30  ;;  %v217_v32 = vunpack.c.l.bf16 %v174_v26  ;;  %v209_v33 = vunpack.c.l.bf16 %v167_v30  ;;  %v161_v43 = vld [vmem:[#allocation3 + $0x54] sm:$0xff]  ;;  %v159_v48 = vld [vmem:[#allocation3 + $0x48] sm:$0xff]  ;;  %v157_v52 = vld [vmem:[#allocation3 + $0x3c] sm:$0xff] }
  0x33   :  { %5263 = vmatprep.subr.mxu1 %v226_v10  ;;  %246 = vmatprep.subr.mxu0 %v222_v7  ;;  %v207_v36 = vunpack.c.h.bf16 %v165_v34  ;;  %v214_v37 = vunpack.c.h.bf16 %v170_v35  ;;  %v206_v38 = vunpack.c.l.bf16 %v165_v34  ;;  %v204_v40 = vunpack.c.h.bf16 %v163_v39  ;;  %v166_v44 = vld [vmem:[#allocation3 + $0x68] ss:$12 sps:$4 sm:$0xff]   ;;  %v162_v53 = vld [vmem:[#allocation3 + $0x50] ss:$12 sps:$4 sm:$0xff]   ;;  %v158_v59 = vld [vmem:[#allocation3 + $0x38] ss:$12 sps:$4 sm:$0xff]  }
  0x34   :  { %v104_v0 = vld [vmem:[%s6559_s2] sm:$0xff]  ;;  %v105_v1 = vld [vmem:[%s6559_s2 + $0x8] sm:$0xff]  ;;  %5264 = vmatpush3.msra.mxu1 %v226_v10  ;;  %247 = vmatpush1.msra.mxu0 %v221_v9  ;;  %v211_v41 = vunpack.c.l.bf16 %v170_v35  ;;  %v203_v42 = vunpack.c.l.bf16 %v163_v39  ;;  %v201_v45 = vunpack.c.h.bf16 %v161_v43  ;;  %v208_v46 = vunpack.c.h.bf16 %v166_v44  ;;  %v153_v58 = vld [vmem:[#allocation3 + $0x24] sm:$0xff] }
  0x35   :  { %108 = vadd.xlane.f32.xlu0 %v104_v0  ;;  %5265 = vmatprep.subr.mxu1 %v223_v13  ;;  %v200_v47 = vunpack.c.l.bf16 %v161_v43  ;;  %v198_v49 = vunpack.c.h.bf16 %v159_v48  ;;  %v205_v50 = vunpack.c.l.bf16 %v166_v44  ;;  %v197_v51 = vunpack.c.l.bf16 %v159_v48  ;;  %v155_v54 = vld [vmem:[#allocation3 + $0x30] sm:$0xff]  ;;  %v151_v63 = vld [vmem:[#allocation3 + $0x18] sm:$0xff]  ;;  %v154_v4 = vld [vmem:[#allocation3 + $0x20] ss:$12 sps:$4 sm:$0xff]  }
  0x36   :  { %248 = vmatprep.subr.mxu0 %v219_v12  ;;  %5266 = vmatpush3.msra.mxu1 %v223_v13  ;;  %v195_v55 = vunpack.c.h.bf16 %v157_v52  ;;  %v202_v56 = vunpack.c.h.bf16 %v162_v53  ;;  %v194_v57 = vunpack.c.l.bf16 %v157_v52  ;;  %v192_v60 = vunpack.c.h.bf16 %v155_v54  ;;  %v149_v3 = vld [vmem:[#allocation3 + $0xc] sm:$0xff]  ;;  %v147_v8 = vld [vmem:[#allocation3] sm:$0xff] }
  0x37   :  { %249 = vmatpush1.msra.mxu0 %v218_v14  ;;  %5267 = vmatprep.subr.mxu1 %v220_v28  ;;  %v199_v61 = vunpack.c.l.bf16 %v162_v53  ;;  %v191_v62 = vunpack.c.l.bf16 %v155_v54  ;;  %v188_v2 = vunpack.c.l.bf16 %v153_v58  ;;  %v186_v5 = vunpack.c.h.bf16 %v151_v63  ;;  %v4666_v30 = vld [vmem:[%s6537_s4] ss:$0 sm:$0xff] }
  0x38   :  { %250 = vmatprep.subr.mxu0 %v216_v15  ;;  %5268 = vmatpush3.msra.mxu1 %v220_v28  ;;  %v193_v6 = vunpack.c.l.bf16 %v158_v59  ;;  %v185_v7 = vunpack.c.l.bf16 %v151_v63  ;;  %v183_v9 = vunpack.c.h.bf16 %v149_v3  ;;  %v190_v10 = vunpack.c.h.bf16 %v154_v4  ;;  %v150_v15 = vld [vmem:[#allocation3 + $0x8] ss:$12 sps:$4 sm:$0xff]   ;;  %v4665_v28 = vld [vmem:[%s6560_s3] ss:$0 sm:$0xff]  ;;  %s6562_s3 = sld [smem:[#allocation15_spill]] }
  0x39   :  { %110 = vadd.xlane.f32.xlu0 %v105_v1  ;;  %251 = vmatpush1.msra.mxu0 %v215_v16  ;;  %v182_v11 = vunpack.c.l.bf16 %v149_v3  ;;  %v180_v12 = vunpack.c.h.bf16 %v147_v8  ;;  %v187_v13 = vunpack.c.l.bf16 %v154_v4  ;;  %v179_v14 = vunpack.c.l.bf16 %v147_v8  ;;  %v396_v4 = vld [vmem:[%s6561_s21] sm:$0x1] }
  0x3a   :  { %252 = vmatprep.subr.mxu0 %v213_v27  ;;  %5269 = vmatprep.subr.mxu1 %v217_v32  ;;  %v184_v16 = vunpack.c.h.bf16 %v150_v15  ;;  %vm399_vm1 = vcmask 261120   ;;  %vm484_vm2 = vcmask 64512   ;;  %vm742_vm3 = vcmask 523520  }
  0x3b   :  { %253 = vmatpush1.msra.mxu0 %v212_v29  ;;  %5270 = vmatpush3.msra.mxu1 %v217_v32  ;;  %vm915_vm4 = vcmask 785920   ;;  %vm1088_vm5 = vcmask 1048320   ;;  %vm4532_vm6 = vcmask 123904   ;;  %vm4458_vm7 = vcmask 130048  }
  0x3c   :  { %254 = vmatprep.subr.mxu0 %v210_v31  ;;  %5271 = vmatprep.subr.mxu1 %v214_v37 }
  0x3d   :  { %255 = vmatpush1.msra.mxu0 %v209_v33  ;;  %5272 = vmatpush3.msra.mxu1 %v214_v37 }
  0x3e   :  { %256 = vmatprep.subr.mxu0 %v207_v36  ;;  %5273 = vmatprep.subr.mxu1 %v211_v41 }
  0x3f   :  { %257 = vmatpush1.msra.mxu0 %v206_v38  ;;  %5274 = vmatpush3.msra.mxu1 %v211_v41  ;;  %v227_v38 = vld [vmem:[%s6539_s6] sm:$0x7] }
  0x40   :  { %258 = vmatprep.subr.mxu0 %v204_v40  ;;  %5275 = vmatprep.subr.mxu1 %v208_v46 }
  0x41   :  { %259 = vmatpush1.msra.mxu0 %v203_v42  ;;  %5276 = vmatpush3.msra.mxu1 %v208_v46 }
  0x42   :  { %260 = vmatprep.subr.mxu0 %v201_v45  ;;  %5277 = vmatprep.subr.mxu1 %v205_v50 }
  0x43   :  { %261 = vmatpush1.msra.mxu0 %v200_v47  ;;  %5278 = vmatpush3.msra.mxu1 %v205_v50 }
  0x44   :  { %262 = vmatprep.subr.mxu0 %v198_v49  ;;  %5279 = vmatprep.subr.mxu1 %v202_v56 }
  0x45   :  { %263 = vmatpush1.msra.mxu0 %v197_v51  ;;  %5280 = vmatpush3.msra.mxu1 %v202_v56 }
  0x46   :  { %264 = vmatprep.subr.mxu0 %v195_v55  ;;  %5281 = vmatprep.subr.mxu1 %v199_v61 }
  0x47   :  { %265 = vmatpush1.msra.mxu0 %v194_v57  ;;  %5282 = vmatpush3.msra.mxu1 %v199_v61 }
  0x48   :  { %266 = vmatprep.subr.mxu0 %v192_v60 }
  0x49   :  { %267 = vmatpush1.msra.mxu0 %v191_v62 }
  0xbe   :  { %v109_v17 = vpop.xlane.xlu0 %108 }
  0xbf   :  { %v113_v18 = vmul.f32 0.0078125, %v109_v17  ;;  %v5816_v17 = vmov 0.0  }
  0xc0   :  { %308 = vmatprep.mubr.f32.mxu0 %v5816_v17 }
  0xc1   :  { %v5938_v19 = vsub.f32 %v104_v0, %v113_v18  ;;  %v189_v0 = vunpack.c.h.bf16 %v153_v58  ;;  %v181_v18 = vunpack.c.l.bf16 %v150_v15 }
  0xc2   :  { %v111_v20 = vpop.xlane.xlu0 %110 }
  0xc3   :  { %v114_v21 = vmul.f32 0.0078125, %v111_v20  ;;  %v117_v22 = vmul.f32 %v5938_v19, %v5938_v19  ;;  %268 = vmatprep.subr.mxu0 %v189_v0 }
  0xc4   :  { %269 = vmatpush1.msra.mxu0 %v188_v2 }
  0xc5   :  { %119 = vadd.xlane.f32.xlu1 %v117_v22  ;;  %v5942_v23 = vsub.f32 %v105_v1, %v114_v21  ;;  %v196_v1 = vunpack.c.h.bf16 %v158_v59  ;;  %270 = vmatprep.subr.mxu0 %v186_v5  ;;  %v397_v5 = vsub.f32 1.0, %v396_v4 }
  0xc6   :  { %271 = vmatpush1.msra.mxu0 %v185_v7 }
  0xc7   :  { %v118_v24 = vmul.f32 %v5942_v23, %v5942_v23  ;;  %5283 = vmatprep.subr.mxu1 %v196_v1  ;;  %272 = vmatprep.subr.mxu0 %v183_v9 }
  0xc8   :  { %5284 = vmatpush3.msra.mxu1 %v196_v1  ;;  %273 = vmatpush1.msra.mxu0 %v182_v11 }
  0xc9   :  { %121 = vadd.xlane.f32.xlu1 %v118_v24  ;;  %5285 = vmatprep.subr.mxu1 %v193_v6 }
  0xca   :  { %5286 = vmatpush3.msra.mxu1 %v193_v6  ;;  %274 = vmatprep.subr.mxu0 %v180_v12  ;;  %v398_v6 = vmul.f32 -1e+09, %v397_v5 }
  0xcb   :  { %5287 = vmatprep.subr.mxu1 %v190_v10  ;;  %275 = vmatpush1.msra.mxu0 %v179_v14  ;;  %v4679_v14 = vld [vmem:[%s6561_s21 + $0x1] sm:$0x1] }
  0xcc   :  { %5288 = vmatpush3.msra.mxu1 %v190_v10  ;;  %5303 = vmatprep.subr.mxu0 %v5816_v17 }
  0xcd   :  { %5289 = vmatprep.subr.mxu1 %v187_v13 }
  0xce   :  { %5290 = vmatpush3.msra.mxu1 %v187_v13 }
  0xcf   :  { %5291 = vmatprep.subr.mxu1 %v184_v16 }
  0xd0   :  { %5292 = vmatpush3.msra.mxu1 %v184_v16 }
  0xd1   :  { %5293 = vmatprep.subr.mxu1 %v181_v18 }
  0xd2   :  { %5294 = vmatpush3.msra.mxu1 %v181_v18 }
  0xd3   :  { %5298 = vmatprep.subr.mxu1 %v5816_v17 }
 0x14e   :  { %v120_v20 = vpop.xlane.xlu1 %119 }
 0x14f   :  { %v123_v21 = vmul.f32 0.0078125, %v120_v20  ;;  %v1092_v20 = vsub.f32 1.0, %v4679_v14 }
 0x151   :  { %v125_v22 = vadd.f32 1e-12, %v123_v21 }
 0x152   :  { %v122_v24 = vpop.xlane.xlu1 %121 }
 0x153   :  { %5619 = vrsqrt.f32 %v125_v22  ;;  %v124_v25 = vmul.f32 0.0078125, %v122_v24 }
 0x155   :  { %v126_v26 = vadd.f32 1e-12, %v124_v25 }
 0x157   :  { %5621 = vrsqrt.f32 %v126_v26 }
 0x160   :  { %v5620_v27 = vpop.eup %5619 }
 0x161   :  { %v129_v29 = vmul.f32 %v5620_v27, %v5938_v19  ;;  %v229_v19 = vlaneseq  ;;  %v1093_v27 = vmul.f32 -1e+09, %v1092_v20 }
 0x163   :  { %v137_v31 = vmul.f32 %v4665_v28, %v129_v29 }
 0x164   :  { %v5622_v32 = vpop.eup %5621 }
 0x165   :  { %v5956_v33 = vadd.f32 %v4666_v30, %v137_v31  ;;  %v130_v34 = vmul.f32 %v5622_v32, %v5942_v23  ;;  %v5970_v23 = vshrl.u32 %v229_v19, 7 }
 0x167   :  { %309 = vmatmul.mubr.f32.vlgmr.msra.gmra.mxu0 %v5956_v33  ;;  %5295 = vmatprep.mubr.f32.mxu1 %v5956_v33  ;;  %v138_v35 = vmul.f32 %v4665_v28, %v130_v34  ;;  %v5973_v37 = vsub.s32 0, %v5970_v23  ;;  %v5979_v39 = vsub.s32 1, %v5970_v23  ;;  %v239_v41 = vsub.s32 2, %v5970_v23 }
 0x168   :  { %314 = vmatprep.mubr.f32.mxu0 %v5816_v17 }
 0x169   :  { %v5962_v36 = vadd.f32 %v4666_v30, %v138_v35  ;;  %v232_v40 = vrot.slane %v227_v38, %v5973_v37  ;;  %v236_v42 = vrot.slane %v227_v38, %v5979_v39  ;;  %v240_v45 = vrot.slane %v227_v38, %v239_v41 }
 0x16a   :  { %v481_v7 = vrot.slane %v398_v6, %v5973_v37  ;;  %v1175_v34 = vrot.slane %v1093_v27, %v5973_v37 }
 0x16b   :  { %315 = vmatmul.mubr.f32.gmra.mxu0 %v5962_v36  ;;  %5296 = vmatmul.mubr.f32.vlgmr.msra.gmra.mxu1 %v5962_v36 }
 0x16c   :  { %5300 = vmatprep.mubr.msk.f32.mxu1 %vm5817_vm0, %v5816_v17  ;;  %5305 = vmatprep.mubr.msk.f32.mxu0 %vm5817_vm0, %v5816_v17 }
 0x227   :  { %v310_v43 = vpop.f32.mrf.mxu0 }
 0x228   :  { %v311_v44 = vadd.f32 %v310_v43, %v232_v40 }
 0x229   :  { %v312_v46 = vpop.f32.mrf.mxu0 }
 0x22a   :  { %v313_v47 = vadd.f32 %v312_v46, %v236_v42  ;;  %570 = vrot.lane.b32.xlu1 %v311_v44, %s5818_s29 }
 0x22b   :  { %v316_v48 = vpop.f32.mrf.mxu0  ;;  %v5297_v49 = vpop.f32.mrf.mxu1 }
 0x22c   :  { %v5987_v50 = vadd.f32 %v5297_v49, %v240_v45  ;;  %572 = vrot.lane.b32.xlu0 %v313_v47, %s5818_s29  ;;  %5299 = vmatpush3.xpose.msk.msra.mxu1 %vm399_vm1, %v313_v47  ;;  %v317_v55 = vadd.f32 %v316_v48, %v232_v40 }
 0x22d   :  { %v387_v51 = vpop.f32.mrf.mxu1  ;;  %5308 = vmatprep.subr.mxu1 %v5816_v17  ;;  %v318_v53 = vpop.f32.mrf.mxu0 }
 0x22e   :  { %v5992_v52 = vadd.f32 %v387_v51, %v240_v45  ;;  %746 = vrot.lane.b32.xlu1 %v313_v47, %s5814_s30  ;;  %v319_v54 = vadd.f32 %v318_v53, %v236_v42 }
 0x22f   :  { %5301 = vmatmul.mubr.msk.f32.vlgmr.msra.gmra.mxu1 %vm399_vm1, %v311_v44 }
 0x230   :  { %919 = vrot.lane.b32.xlu0 %v313_v47, %s5819_s0  ;;  %5304 = vmatpush3.msra.mxu0 %v5992_v52 }
 0x231   :  { %5310 = vmatprep.mubr.msk.f32.mxu1 %vm5817_vm0, %v5816_v17  ;;  %5313 = vmatprep.subr.mxu0 %v5816_v17 }
 0x232   :  { %744 = vrot.lane.b32.xlu1 %v311_v44, %s5814_s30 }
 0x234   :  { %1265 = vrot.lane.b32.xlu0 %v319_v54, %s5818_s29 }
 0x236   :  { %917 = vrot.lane.b32.xlu1 %v311_v44, %s5819_s0 }
 0x238   :  { %1438 = vrot.lane.b32.xlu0 %v319_v54, %s5814_s30 }
 0x23a   :  { %1263 = vrot.lane.b32.xlu1 %v317_v55, %s5818_s29 }
 0x23c   :  { %1610 = vrot.lane.b32.xlu0 %v319_v54, %s5819_s0 }
 0x23e   :  { %1436 = vrot.lane.b32.xlu1 %v317_v55, %s5814_s30 }
 0x242   :  { %1608 = vrot.lane.b32.xlu1 %v317_v55, %s5819_s0 }
 0x29c   :  { %v571_v56 = vpop.permute.xlu1 %570 }
 0x29e   :  { %v573_v57 = vpop.permute.xlu0 %572 }
 0x29f   :  { %5309 = vmatpush3.xpose.msk.msra.mxu1 %vm399_vm1, %v573_v57 }
 0x2a0   :  { %v747_v58 = vpop.permute.xlu1 %746  ;;  %5318 = vmatprep.subr.mxu1 %v5816_v17 }
 0x2a2   :  { %5311 = vmatmul.mubr.msk.f32.vlgmr.msra.gmra.mxu1 %vm399_vm1, %v571_v56  ;;  %v920_v59 = vpop.permute.xlu0 %919 }
 0x2a3   :  { %5319 = vmatpush3.xpose.msk.msra.mxu1 %vm399_vm1, %v747_v58  ;;  %5320 = vmatprep.mubr.msk.f32.mxu1 %vm5817_vm0, %v5816_v17 }
 0x2a4   :  { %v745_v60 = vpop.permute.xlu1 %744  ;;  %5328 = vmatprep.subr.mxu1 %v5816_v17 }
 0x2a6   :  { %5321 = vmatmul.mubr.msk.f32.vlgmr.msra.gmra.mxu1 %vm399_vm1, %v745_v60  ;;  %v1266_v62 = vpop.permute.xlu0 %1265 }
 0x2a7   :  { %5329 = vmatpush3.xpose.msk.msra.mxu1 %vm399_vm1, %v920_v59  ;;  %5330 = vmatprep.mubr.msk.f32.mxu1 %vm5817_vm0, %v5816_v17 }
 0x2a8   :  { %v918_v61 = vpop.permute.xlu1 %917  ;;  %5338 = vmatprep.subr.mxu1 %v5816_v17 }
 0x2aa   :  { %5331 = vmatmul.mubr.msk.f32.vlgmr.msra.gmra.mxu1 %vm399_vm1, %v918_v61  ;;  %v1439_v0 = vpop.permute.xlu0 %1438 }
 0x2ab   :  { %5339 = vmatpush3.xpose.msk.msra.mxu1 %vm399_vm1, %v319_v54  ;;  %5340 = vmatprep.mubr.msk.f32.mxu1 %vm5817_vm0, %v5816_v17 }
 0x2ac   :  { %5348 = vmatprep.subr.mxu1 %v5816_v17  ;;  %v1264_v63 = vpop.permute.xlu1 %1263 }
 0x2ae   :  { %5341 = vmatmul.mubr.msk.f32.vlgmr.msra.gmra.mxu1 %vm399_vm1, %v317_v55  ;;  %v1611_v2 = vpop.permute.xlu0 %1610 }
 0x2af   :  { %5349 = vmatpush3.xpose.msk.msra.mxu1 %vm399_vm1, %v1266_v62  ;;  %5350 = vmatprep.mubr.msk.f32.mxu1 %vm5817_vm0, %v5816_v17 }
 0x2b0   :  { %5358 = vmatprep.subr.mxu1 %v5816_v17  ;;  %v1437_v1 = vpop.permute.xlu1 %1436 }
 0x2b2   :  { %5351 = vmatmul.mubr.msk.f32.vlgmr.msra.gmra.mxu1 %vm399_vm1, %v1264_v63 }
 0x2b3   :  { %5359 = vmatpush3.xpose.msk.msra.mxu1 %vm399_vm1, %v1439_v0  ;;  %5360 = vmatprep.mubr.msk.f32.mxu1 %vm5817_vm0, %v5816_v17 }
 0x2b4   :  { %5368 = vmatprep.subr.mxu1 %v5816_v17  ;;  %v1609_v3 = vpop.permute.xlu1 %1608 }
 0x2b6   :  { %5361 = vmatmul.mubr.msk.f32.vlgmr.msra.gmra.mxu1 %vm399_vm1, %v1437_v1 }
 0x2b7   :  { %5369 = vmatpush3.xpose.msk.msra.mxu1 %vm399_vm1, %v1611_v2  ;;  %5370 = vmatprep.mubr.msk.f32.mxu1 %vm5817_vm0, %v5816_v17 }
 0x2ba   :  { %5371 = vmatmul.mubr.msk.f32.vlgmr.msra.gmra.mxu1 %vm399_vm1, %v1609_v3 }
 0x2ef   :  { %v472_v8 = vpop.f32.mrf.mxu1 }
 0x2f0   :  { %v476_v9 = vmul.f32 0.17677669, %v472_v8 }
 0x2f1   :  { %v5302_v10 = vpop.f32.mrf.mxu1 }
 0x2f2   :  { %v483_v11 = vadd.f32 %v481_v7, %v476_v9 }
 0x2f4   :  { %v485_v12 = vsel %vm484_vm2, %v483_v11, -inf }
 0x2f5   :  { %486 = vmax.xlane.f32.xlu0 %v485_v12 }
 0x362   :  { %v644_v13 = vpop.f32.mrf.mxu1 }
 0x363   :  { %v648_v15 = vmul.f32 0.17677669, %v644_v13 }
 0x364   :  { %v5312_v16 = vpop.f32.mrf.mxu1 }
 0x365   :  { %v649_v18 = vadd.f32 %v648_v15, %v481_v7 }
 0x366   :  { %v818_v21 = vpop.f32.mrf.mxu1 }
 0x367   :  { %v822_v22 = vmul.f32 0.17677669, %v818_v21  ;;  %v650_v24 = vsel %vm484_vm2, %v649_v18, -inf }
 0x368   :  { %651 = vmax.xlane.f32.xlu1 %v650_v24  ;;  %v5322_v25 = vpop.f32.mrf.mxu1 }
 0x369   :  { %v823_v26 = vadd.f32 %v822_v22, %v481_v7 }
 0x36a   :  { %v991_v28 = vpop.f32.mrf.mxu1 }
 0x36b   :  { %v995_v29 = vmul.f32 0.17677669, %v991_v28  ;;  %v824_v30 = vsel %vm484_vm2, %v823_v26, -inf }
 0x36c   :  { %825 = vmax.xlane.f32.xlu0 %v824_v30  ;;  %v5332_v31 = vpop.f32.mrf.mxu1 }
 0x36d   :  { %v6051_v32 = vadd.f32 %v995_v29, %v481_v7 }
 0x36e   :  { %v1166_v35 = vpop.f32.mrf.mxu1 }
 0x36f   :  { %v1170_v19 = vmul.f32 0.17677669, %v1166_v35  ;;  %v997_v38 = vsel %vm484_vm2, %v6051_v32, -inf }
 0x370   :  { %998 = vmax.xlane.f32.xlu0 %v997_v38  ;;  %v5342_v40 = vpop.f32.mrf.mxu1 }
 0x371   :  { %v1177_v42 = vadd.f32 %v1175_v34, %v1170_v19 }
 0x372   :  { %v1337_v43 = vpop.f32.mrf.mxu1 }
 0x373   :  { %v1341_v44 = vmul.f32 0.17677669, %v1337_v43  ;;  %v1178_v45 = vsel %vm484_vm2, %v1177_v42, -inf }
 0x374   :  { %1179 = vmax.xlane.f32.xlu0 %v1178_v45  ;;  %v5352_v46 = vpop.f32.mrf.mxu1 }
 0x375   :  { %v1342_v47 = vadd.f32 %v1341_v44, %v1175_v34 }
 0x376   :  { %v1510_v48 = vpop.f32.mrf.mxu1 }
 0x377   :  { %v1514_v49 = vmul.f32 0.17677669, %v1510_v48  ;;  %v1343_v51 = vsel %vm484_vm2, %v1342_v47, -inf }
 0x378   :  { %1344 = vmax.xlane.f32.xlu1 %v1343_v51  ;;  %v5362_v53 = vpop.f32.mrf.mxu1 }
 0x379   :  { %v1515_v54 = vadd.f32 %v1514_v49, %v1175_v34 }
 0x37a   :  { %v1682_v55 = vpop.f32.mrf.mxu1 }
 0x37b   :  { %v1686_v56 = vmul.f32 0.17677669, %v1682_v55  ;;  %v1516_v57 = vsel %vm484_vm2, %v1515_v54, -inf }
 0x37c   :  { %1517 = vmax.xlane.f32.xlu0 %v1516_v57  ;;  %v5372_v58 = vpop.f32.mrf.mxu1 }
 0x37d   :  { %v1687_v59 = vadd.f32 %v1686_v56, %v1175_v34 }
 0x37e   :  { %v487_v60 = vpop.xlane.xlu0 %486 }
 0x37f   :  { %v488_v61 = vsub.f32 %v483_v11, %v487_v60  ;;  %v1688_v62 = vsel %vm484_vm2, %v1687_v59, -inf }
 0x380   :  { %1689 = vmax.xlane.f32.xlu1 %v1688_v62 }
 0x381   :  { %v489_v63 = vmul.f32 1.442695, %v488_v61 }
 0x383   :  { %5623 = vpow2.f32 %v489_v63 }
 0x390   :  { %v5624_v0 = vpop.eup %5623 }
 0x391   :  { %v491_v1 = vsel %vm484_vm2, %v5624_v0, 0.0 }
 0x392   :  { %492 = vadd.xlane.f32.xlu0 %v491_v1 }
 0x3f1   :  { %v652_v2 = vpop.xlane.xlu1 %651 }
 0x3f2   :  { %v653_v3 = vsub.f32 %v649_v18, %v652_v2 }
 0x3f4   :  { %v654_v4 = vmul.f32 1.442695, %v653_v3 }
 0x3f5   :  { %v826_v5 = vpop.xlane.xlu0 %825 }
 0x3f6   :  { %5625 = vpow2.f32 %v654_v4  ;;  %v827_v6 = vsub.f32 %v823_v26, %v826_v5 }
 0x3f8   :  { %v828_v7 = vmul.f32 1.442695, %v827_v6 }
 0x3f9   :  { %v999_v12 = vpop.xlane.xlu0 %998 }
 0x3fa   :  { %5627 = vpow2.f32 %v828_v7  ;;  %v1000_v18 = vsub.f32 %v6051_v32, %v999_v12  ;;  %v4985_v12 = vld [vmem:[%s6540_s7 + $0x38] sm:$0xff]  }
 0x3fc   :  { %v1001_v26 = vmul.f32 1.442695, %v1000_v18 }
 0x3fd   :  { %v1180_v13 = vpop.xlane.xlu0 %1179 }
 0x3fe   :  { %v1181_v16 = vsub.f32 %v1177_v42, %v1180_v13  ;;  %v4984_v13 = vld [vmem:[%s6540_s7 + $0x30] sm:$0xff]  }
 0x3ff   :  { %v4781_v18 = vunpack.c.l.bf16 %v4984_v13 }
 0x400   :  { %v1182_v21 = vmul.f32 1.442695, %v1181_v16  ;;  %v4782_v16 = vunpack.c.h.bf16 %v4984_v13 }
 0x401   :  { %v1345_v24 = vpop.xlane.xlu1 %1344 }
 0x402   :  { %v1346_v27 = vsub.f32 %v1342_v47, %v1345_v24 }
 0x403   :  { %v5626_v8 = vpop.eup %5625 }
 0x404   :  { %v656_v9 = vsel %vm484_vm2, %v5626_v8, 0.0 }
 0x405   :  { %657 = vadd.xlane.f32.xlu1 %v656_v9  ;;  %v1518_v14 = vpop.xlane.xlu0 %1517 }
 0x406   :  { %v1519_v22 = vsub.f32 %v1515_v54, %v1518_v14  ;;  %v4786_v14 = vunpack.c.h.bf16 %v4985_v12 }
 0x407   :  { %v6062_v10 = vpop.eup %5627 }
 0x408   :  { %v830_v11 = vsel %vm484_vm2, %v6062_v10, 0.0  ;;  %v1520_v28 = vmul.f32 1.442695, %v1519_v22  ;;  %5378 = vmatprep.subr.mxu1 %v4786_v14 }
 0x409   :  { %831 = vadd.xlane.f32.xlu0 %v830_v11  ;;  %v1690_v29 = vpop.xlane.xlu1 %1689  ;;  %5379 = vmatpush3.msra.mxu1 %v4786_v14 }
 0x40a   :  { %v1691_v30 = vsub.f32 %v1687_v59, %v1690_v29 }
 0x40c   :  { %v1692_v31 = vmul.f32 1.442695, %v1691_v30  ;;  %v4981_v30 = vld [vmem:[%s6540_s7 + $0x18] sm:$0xff]  }
 0x416   :  { %835 = vrot.lane.b32.xlu1 %v5992_v52, %s5814_s30 }
 0x41a   :  { %1008 = vrot.lane.b32.xlu1 %v5992_v52, %s5819_s0 }
 0x41b   :  { %v493_v15 = vpop.xlane.xlu0 %492 }
 0x41c   :  { %5629 = vrcp.f32 %v493_v15  ;;  %v4785_v15 = vunpack.c.l.bf16 %v4985_v12 }
 0x41d   :  { %5631 = vpow2.f32 %v1182_v21 }
 0x41e   :  { %1355 = vrot.lane.b32.xlu1 %v5987_v50, %s5818_s29  ;;  %5633 = vpow2.f32 %v1001_v26  ;;  %5380 = vmatprep.subr.mxu1 %v4785_v15 }
 0x41f   :  { %662 = vrot.lane.b32.xlu0 %v5992_v52, %s5818_s29  ;;  %v1347_v52 = vmul.f32 1.442695, %v1346_v27  ;;  %5635 = vpow2.f32 %v1520_v28  ;;  %5381 = vmatpush3.msra.mxu1 %v4785_v15  ;;  %v4982_v28 = vld [vmem:[%s6540_s7 + $0x20] sm:$0xff]   ;;  %v1950_v15 = vld [vmem:[#allocation6 + $0x60] sm:$0xff] }
 0x420   :  { %5382 = vmatprep.subr.mxu1 %v4782_v16  ;;  %v4774_v29 = vunpack.c.h.bf16 %v4982_v28 }
 0x421   :  { %5637 = vpow2.f32 %v1347_v52  ;;  %5383 = vmatpush3.msra.mxu1 %v4782_v16  ;;  %v4773_v52 = vunpack.c.l.bf16 %v4982_v28 }
 0x422   :  { %5639 = vpow2.f32 %v1692_v31  ;;  %5384 = vmatprep.subr.mxu1 %v4781_v18  ;;  %v4770_v31 = vunpack.c.h.bf16 %v4981_v30 }
 0x423   :  { %5385 = vmatpush3.msra.mxu1 %v4781_v18 }
 0x429   :  { %v5630_v20 = vpop.eup %5629 }
 0x42a   :  { %v495_v25 = vmul.f32 %v5630_v20, %v5624_v0  ;;  %v5632_v32 = vpop.eup %5631 }
 0x42b   :  { %v5634_v34 = vpop.eup %5633  ;;  %v1184_v35 = vsel %vm484_vm2, %v5632_v32, 0.0 }
 0x42c   :  { %5306 = vmatmul.mubr.msk.f32.vlgmr.msra.gmra.mxu0 %vm484_vm2, %v495_v25  ;;  %v6079_v19 = vpop.eup %5635  ;;  %v1003_v38 = vsel %vm484_vm2, %v5634_v34, 0.0  ;;  %v4983_v25 = vld [vmem:[%s6540_s7 + $0x28] sm:$0xff]  }
 0x42d   :  { %5315 = vmatprep.mubr.msk.f32.mxu0 %vm5817_vm0, %v5816_v17  ;;  %v1522_v40 = vsel %vm484_vm2, %v6079_v19, 0.0  ;;  %v4778_v26 = vunpack.c.h.bf16 %v4983_v25  ;;  %v4777_v27 = vunpack.c.l.bf16 %v4983_v25 }
 0x42e   :  { %v5638_v42 = vpop.eup %5637 }
 0x42f   :  { %v1349_v43 = vsel %vm484_vm2, %v5638_v42, 0.0  ;;  %v6085_v44 = vpop.eup %5639  ;;  %5386 = vmatprep.subr.mxu1 %v4778_v26 }
 0x430   :  { %v1694_v45 = vsel %vm484_vm2, %v6085_v44, 0.0  ;;  %5387 = vmatpush3.msra.mxu1 %v4778_v26 }
 0x431   :  { %5388 = vmatprep.subr.mxu1 %v4777_v27 }
 0x432   :  { %5389 = vmatpush3.msra.mxu1 %v4777_v27 }
 0x433   :  { %5390 = vmatprep.subr.mxu1 %v4774_v29 }
 0x434   :  { %5391 = vmatpush3.msra.mxu1 %v4774_v29  ;;  %v1949_v29 = vld [vmem:[#allocation6 + $0x58] sm:$0xff] }
 0x435   :  { %5392 = vmatprep.subr.mxu1 %v4773_v52 }
 0x436   :  { %5393 = vmatpush3.msra.mxu1 %v4773_v52  ;;  %v1977_v52 = vunpack.c.h.bf16 %v1949_v29 }
 0x437   :  { %5394 = vmatprep.subr.mxu1 %v4770_v31 }
 0x438   :  { %5395 = vmatpush3.msra.mxu1 %v4770_v31  ;;  %v1948_v31 = vld [vmem:[#allocation6 + $0x50] sm:$0xff] }
 0x43e   :  { %1185 = vadd.xlane.f32.xlu0 %v1184_v35 }
 0x442   :  { %1004 = vadd.xlane.f32.xlu1 %v1003_v38  ;;  %1523 = vadd.xlane.f32.xlu0 %v1522_v40 }
 0x446   :  { %1350 = vadd.xlane.f32.xlu1 %v1349_v43 }
 0x44a   :  { %1695 = vadd.xlane.f32.xlu1 %v1694_v45 }
 0x458   :  { %1527 = vrot.lane.b32.xlu0 %v5987_v50, %s5814_s30 }
 0x45b   :  { %1699 = vrot.lane.b32.xlu1 %v5987_v50, %s5819_s0 }
 0x48e   :  { %v658_v46 = vpop.xlane.xlu1 %657 }
 0x48f   :  { %5641 = vrcp.f32 %v658_v46  ;;  %v4756_v46 = vld [vmem:[%s6540_s7] sm:$0xff]  }
 0x492   :  { %v832_v47 = vpop.xlane.xlu0 %831  ;;  %v836_v51 = vpop.permute.xlu1 %835 }
 0x493   :  { %5643 = vrcp.f32 %v832_v47  ;;  %v4758_v47 = vunpack.c.h.bf16 %v4756_v46 }
 0x496   :  { %v663_v48 = vpop.permute.xlu0 %662  ;;  %v1009_v56 = vpop.permute.xlu1 %1008 }
 0x497   :  { %5314 = vmatpush3.msra.mxu0 %v663_v48 }
 0x498   :  { %5323 = vmatprep.subr.mxu0 %v5816_v17 }
 0x49a   :  { %v1356_v57 = vpop.permute.xlu1 %1355 }
 0x49c   :  { %v5642_v49 = vpop.eup %5641 }
 0x49d   :  { %v660_v53 = vmul.f32 %v5642_v49, %v5626_v8  ;;  %v4757_v49 = vunpack.c.l.bf16 %v4756_v46 }
 0x49f   :  { %5316 = vmatmul.mubr.msk.f32.vlgmr.msra.gmra.mxu0 %vm484_vm2, %v660_v53 }
 0x4a0   :  { %v5644_v54 = vpop.eup %5643  ;;  %5324 = vmatpush3.msra.mxu0 %v836_v51  ;;  %5325 = vmatprep.mubr.msk.f32.mxu0 %vm5817_vm0, %v5816_v17 }
 0x4a1   :  { %5333 = vmatprep.subr.mxu0 %v5816_v17  ;;  %v834_v55 = vmul.f32 %v5644_v54, %v6062_v10 }
 0x4a3   :  { %5326 = vmatmul.mubr.msk.f32.vlgmr.msra.gmra.mxu0 %vm484_vm2, %v834_v55 }
 0x4a4   :  { %5334 = vmatpush3.msra.mxu0 %v1009_v56  ;;  %5335 = vmatprep.mubr.msk.f32.mxu0 %vm5817_vm0, %v5816_v17 }
 0x4a5   :  { %5343 = vmatprep.subr.mxu0 %v5816_v17 }
 0x4c7   :  { %v1186_v58 = vpop.xlane.xlu0 %1185 }
 0x4cb   :  { %v1005_v59 = vpop.xlane.xlu1 %1004  ;;  %v1524_v61 = vpop.xlane.xlu0 %1523 }
 0x4cc   :  { %5645 = vrcp.f32 %v1005_v59 }
 0x4cd   :  { %5647 = vrcp.f32 %v1186_v58 }
 0x4cf   :  { %v1351_v60 = vpop.xlane.xlu1 %1350  ;;  %v1528_v6 = vpop.permute.xlu0 %1527 }
 0x4d0   :  { %5649 = vrcp.f32 %v1351_v60 }
 0x4d1   :  { %5651 = vrcp.f32 %v1524_v61 }
 0x4d3   :  { %v1696_v62 = vpop.xlane.xlu1 %1695 }
 0x4d4   :  { %5653 = vrcp.f32 %v1696_v62 }
 0x4d7   :  { %v1700_v8 = vpop.permute.xlu1 %1699 }
 0x4d9   :  { %v5646_v63 = vpop.eup %5645 }
 0x4da   :  { %v1007_v0 = vmul.f32 %v5646_v63, %v5634_v34  ;;  %v5648_v1 = vpop.eup %5647  ;;  %v4980_v34 = vld [vmem:[%s6540_s7 + $0x10] sm:$0xff]  }
 0x4db   :  { %v1188_v2 = vmul.f32 %v5648_v1, %v5632_v32  ;;  %v4769_v32 = vunpack.c.l.bf16 %v4981_v30  ;;  %v4766_v35 = vunpack.c.h.bf16 %v4980_v34  ;;  %v4765_v38 = vunpack.c.l.bf16 %v4980_v34 }
 0x4dc   :  { %5336 = vmatmul.mubr.msk.f32.vlgmr.msra.gmra.mxu0 %vm484_vm2, %v1007_v0  ;;  %v1976_v30 = vunpack.c.l.bf16 %v1949_v29  ;;  %v1974_v34 = vunpack.c.l.bf16 %v1948_v31 }
 0x4dd   :  { %5344 = vmatpush3.msra.mxu0 %v5987_v50  ;;  %5345 = vmatprep.mubr.msk.f32.mxu0 %vm5817_vm0, %v5816_v17  ;;  %v5650_v3 = vpop.eup %5649 }
 0x4de   :  { %5353 = vmatprep.subr.mxu0 %v5816_v17  ;;  %v1353_v4 = vmul.f32 %v5650_v3, %v5638_v42  ;;  %v5652_v5 = vpop.eup %5651  ;;  %5396 = vmatprep.subr.mxu1 %v4769_v32  ;;  %v4979_v42 = vld [vmem:[%s6540_s7 + $0x8] sm:$0xff]   ;;  %v4692_v3 = vld [vmem:[%s6541_s8] ss:$0 sm:$0xff] }
 0x4df   :  { %v1526_v50 = vmul.f32 %v5652_v5, %v6079_v19  ;;  %5397 = vmatpush3.msra.mxu1 %v4769_v32  ;;  %v4762_v43 = vunpack.c.h.bf16 %v4979_v42  ;;  %v4761_v45 = vunpack.c.l.bf16 %v4979_v42  ;;  %v1975_v32 = vunpack.c.h.bf16 %v1948_v31 }
 0x4e0   :  { %5346 = vmatmul.mubr.msk.f32.vlgmr.msra.gmra.mxu0 %vm484_vm2, %v1188_v2  ;;  %5398 = vmatprep.subr.mxu1 %v4766_v35 }
 0x4e1   :  { %5354 = vmatpush3.msra.mxu0 %v1356_v57  ;;  %5355 = vmatprep.mubr.msk.f32.mxu0 %vm5817_vm0, %v5816_v17  ;;  %v5654_v7 = vpop.eup %5653 }
 0x4e2   :  { %5363 = vmatprep.subr.mxu0 %v5816_v17  ;;  %v1698_v9 = vmul.f32 %v5654_v7, %v6085_v44  ;;  %5399 = vmatpush3.msra.mxu1 %v4766_v35  ;;  %v1947_v35 = vld [vmem:[#allocation6 + $0x48] sm:$0xff] }
 0x4e3   :  { %5400 = vmatprep.subr.mxu1 %v4765_v38 }
 0x4e4   :  { %5356 = vmatmul.mubr.msk.f32.vlgmr.msra.gmra.mxu0 %vm484_vm2, %v1353_v4  ;;  %5401 = vmatpush3.msra.mxu1 %v4765_v38  ;;  %v1972_v38 = vunpack.c.l.bf16 %v1947_v35 }
 0x4e5   :  { %5364 = vmatpush3.msra.mxu0 %v1528_v6  ;;  %5365 = vmatprep.mubr.msk.f32.mxu0 %vm5817_vm0, %v5816_v17 }
 0x4e6   :  { %5373 = vmatprep.subr.mxu0 %v5816_v17  ;;  %5402 = vmatprep.subr.mxu1 %v4762_v43 }
 0x4e7   :  { %5403 = vmatpush3.msra.mxu1 %v4762_v43 }
 0x4e8   :  { %5366 = vmatmul.mubr.msk.f32.vlgmr.msra.gmra.mxu0 %vm484_vm2, %v1526_v50  ;;  %5404 = vmatprep.subr.mxu1 %v4761_v45 }
 0x4e9   :  { %5374 = vmatpush3.msra.mxu0 %v1700_v8  ;;  %5375 = vmatprep.mubr.msk.f32.mxu0 %vm5817_vm0, %v5816_v17  ;;  %v1953_v8 = vld [vmem:[#allocation6 + $0x78] sm:$0xff] }
 0x4ea   :  { %5405 = vmatpush3.msra.mxu1 %v4761_v45  ;;  %v1985_v12 = vunpack.c.h.bf16 %v1953_v8 }
 0x4eb   :  { %5406 = vmatprep.subr.mxu1 %v4758_v47 }
 0x4ec   :  { %v565_v10 = vpop.f32.mrf.mxu0  ;;  %5376 = vmatmul.mubr.msk.f32.vlgmr.msra.gmra.mxu0 %vm484_vm2, %v1698_v9  ;;  %5407 = vmatpush3.msra.mxu1 %v4758_v47  ;;  %v1952_v9 = vld [vmem:[#allocation6 + $0x70] sm:$0xff] }
 0x4ed   :  { %569 = vst.msk [vmem:[#allocation2] sm:$0xff] %vm399_vm1, %v565_v10  ;;  %2062 = vmatprep.mubr.f32.mxu0 %v5816_v17  ;;  %5408 = vmatprep.subr.mxu1 %v4757_v49  ;;  %v1951_v10 = vld [vmem:[#allocation6 + $0x68] sm:$0xff]  ;;  %v1983_v13 = vunpack.c.h.bf16 %v1952_v9  ;;  %v1982_v14 = vunpack.c.l.bf16 %v1952_v9  ;;  %v1944_v47 = vld [vmem:[#allocation6 + $0x30] sm:$0xff] }
 0x4ee   :  { %v5307_v11 = vpop.f32.mrf.mxu0  ;;  %5409 = vmatpush3.msra.mxu1 %v4757_v49  ;;  %1998 = vmatprep.subr.mxu0 %v1985_v12  ;;  %v1981_v16 = vunpack.c.h.bf16 %v1951_v10  ;;  %v1980_v18 = vunpack.c.l.bf16 %v1951_v10  ;;  %v1942_v49 = vld [vmem:[#allocation6 + $0x20] sm:$0xff]  ;;  %v4693_v12 = vld [vmem:[%s6542_s9] ss:$0 sm:$0xff] }
 0x4ef   :  { %v1984_v11 = vunpack.c.l.bf16 %v1953_v8 }
 0x4f1   :  { %1999 = vmatpush1.msra.mxu0 %v1984_v11 }
 0x4f2   :  { %2000 = vmatprep.subr.mxu0 %v1983_v13 }
 0x4f3   :  { %2001 = vmatpush1.msra.mxu0 %v1982_v14  ;;  %v4694_v14 = vld [vmem:[%s6543_s10] ss:$0 sm:$0xff] }
 0x4f4   :  { %2002 = vmatprep.subr.mxu0 %v1981_v16 }
 0x4f5   :  { %2003 = vmatpush1.msra.mxu0 %v1980_v18 }
 0x55f   :  { %v734_v20 = vpop.f32.mrf.mxu0 }
 0x560   :  { %739 = vrot.lane.b32.xlu0 %v734_v20, %s5819_s0  ;;  %v1979_v20 = vunpack.c.h.bf16 %v1950_v15 }
 0x561   :  { %v5317_v21 = vpop.f32.mrf.mxu0 }
 0x562   :  { %2004 = vmatprep.subr.mxu0 %v1979_v20 }
 0x563   :  { %v907_v22 = vpop.f32.mrf.mxu0 }
 0x564   :  { %912 = vrot.lane.b32.xlu1 %v907_v22, %s5814_s30 }
 0x565   :  { %v5327_v24 = vpop.f32.mrf.mxu0 }
 0x59c   :  { %v1080_v19 = vpop.f32.mrf.mxu0 }
 0x59d   :  { %1085 = vrot.lane.b32.xlu1 %v1080_v19, %s5818_s29  ;;  %v1973_v19 = vunpack.c.h.bf16 %v1947_v35 }
 0x59e   :  { %v5337_v40 = vpop.f32.mrf.mxu0 }
 0x59f   :  { %v1946_v40 = vld [vmem:[#allocation6 + $0x40] sm:$0xff] }
 0x5a0   :  { %v1258_v44 = vpop.f32.mrf.mxu0  ;;  %v1971_v42 = vunpack.c.h.bf16 %v1946_v40  ;;  %v1970_v43 = vunpack.c.l.bf16 %v1946_v40 }
 0x5a1   :  { %1262 = vst.msk [vmem:[#allocation2 + $0x8] sm:$0xff] %vm399_vm1, %v1258_v44  ;;  %v1945_v44 = vld [vmem:[#allocation6 + $0x38] sm:$0xff] }
 0x5a2   :  { %v5347_v48 = vpop.f32.mrf.mxu0  ;;  %v1969_v45 = vunpack.c.h.bf16 %v1945_v44  ;;  %v1968_v46 = vunpack.c.l.bf16 %v1945_v44 }
 0x5a3   :  { %v1943_v48 = vld [vmem:[#allocation6 + $0x28] sm:$0xff] }
 0x5a4   :  { %v1427_v51 = vpop.f32.mrf.mxu0 }
 0x5a5   :  { %1432 = vrot.lane.b32.xlu0 %v1427_v51, %s5819_s0  ;;  %v1966_v51 = vunpack.c.l.bf16 %v1944_v47 }
 0x5a6   :  { %v5357_v53 = vpop.f32.mrf.mxu0 }
 0x5a7   :  { %v1967_v53 = vunpack.c.h.bf16 %v1944_v47 }
 0x5a8   :  { %v1599_v54 = vpop.f32.mrf.mxu0 }
 0x5a9   :  { %1604 = vrot.lane.b32.xlu0 %v1599_v54, %s5814_s30  ;;  %v1965_v54 = vunpack.c.h.bf16 %v1943_v48 }
 0x5aa   :  { %v5367_v55 = vpop.f32.mrf.mxu0 }
 0x5ab   :  { %v1964_v55 = vunpack.c.l.bf16 %v1943_v48 }
 0x5ac   :  { %v1771_v56 = vpop.f32.mrf.mxu0 }
 0x5ad   :  { %1776 = vrot.lane.b32.xlu1 %v1771_v56, %s5818_s29  ;;  %v1941_v56 = vld [vmem:[#allocation6 + $0x18] sm:$0xff] }
 0x5ae   :  { %v5377_v57 = vpop.f32.mrf.mxu0 }
 0x5af   :  { %v1963_v57 = vunpack.c.h.bf16 %v1942_v49 }
 0x5d2   :  { %v740_v58 = vpop.permute.xlu0 %739 }
 0x5d3   :  { %743 = vst.msk [vmem:[#allocation2] sm:$0xff] %vm742_vm3, %v740_v58  ;;  %v1962_v58 = vunpack.c.l.bf16 %v1942_v49  ;;  %v4996_v49 = vld [vmem:[#allocation8 + $0x58] sm:$0xff]  }
 0x5d6   :  { %v913_v59 = vpop.permute.xlu1 %912 }
 0x5d7   :  { %916 = vst.msk [vmem:[#allocation2] sm:$0xff] %vm915_vm4, %v913_v59  ;;  %v1940_v59 = vld [vmem:[#allocation6 + $0x10] sm:$0xff] }
 0x60f   :  { %v1086_v60 = vpop.permute.xlu1 %1085 }
 0x610   :  { %1089 = vst.msk [vmem:[#allocation2] sm:$0xff] %vm1088_vm5, %v1086_v60  ;;  %v1961_v60 = vunpack.c.h.bf16 %v1941_v56 }
 0x617   :  { %v1433_v61 = vpop.permute.xlu0 %1432  ;;  %v1780_v62 = vld [vmem:[#allocation2] sm:$0xff] }
 0x618   :  { %1435 = vst.msk [vmem:[#allocation2 + $0x8] sm:$0xff] %vm742_vm3, %v1433_v61  ;;  %5410 = vmatprep.mubr.f32.mxu1 %v1780_v62  ;;  %v1960_v61 = vunpack.c.l.bf16 %v1941_v56  ;;  %v1939_v62 = vld [vmem:[#allocation6 + $0x8] sm:$0xff]  ;;  %v4987_v56 = vld [vmem:[#allocation8 + $0x10] sm:$0xff]  }
 0x61b   :  { %v1605_v63 = vpop.permute.xlu0 %1604 }
 0x61c   :  { %1607 = vst.msk [vmem:[#allocation2 + $0x8] sm:$0xff] %vm915_vm4, %v1605_v63  ;;  %v1959_v63 = vunpack.c.h.bf16 %v1940_v59 }
 0x61f   :  { %v1777_v0 = vpop.permute.xlu1 %1776 }
 0x620   :  { %1779 = vst.msk [vmem:[#allocation2 + $0x8] sm:$0xff] %vm1088_vm5, %v1777_v0  ;;  %v1958_v0 = vunpack.c.l.bf16 %v1940_v59 }
 0x627   :  { %v1781_v1 = vld [vmem:[#allocation2 + $0x8] sm:$0xff] }
 0x628   :  { %5411 = vmatmul.mubr.f32.vlgmr.msra.gmra.mxu1 %v1781_v1  ;;  %v1938_v1 = vld [vmem:[#allocation6] sm:$0xff] }
 0x6e8   :  { %v5412_v2 = vpop.f32.mrf.mxu1 }
 0x6e9   :  { %v1893_v6 = vadd.f32 %v5412_v2, %v4692_v3  ;;  %v1957_v2 = vunpack.c.h.bf16 %v1939_v62 }
 0x6ea   :  { %v1887_v4 = vpop.f32.mrf.mxu1 }
 0x6eb   :  { %v1888_v5 = vadd.f32 %v4692_v3, %v1887_v4  ;;  %v1897_v7 = vadd.f32 %v1893_v6, %v5962_v36  ;;  %v1956_v3 = vunpack.c.l.bf16 %v1939_v62  ;;  %v1955_v4 = vunpack.c.h.bf16 %v1938_v1 }
 0x6ed   :  { %v1896_v50 = vadd.f32 %v1888_v5, %v5956_v33  ;;  %v1978_v33 = vunpack.c.l.bf16 %v1950_v15  ;;  %v1954_v5 = vunpack.c.l.bf16 %v1938_v1 }
 0x6ef   :  { %1900 = vadd.xlane.f32.xlu0 %v1896_v50  ;;  %2005 = vmatpush1.msra.mxu0 %v1978_v33 }
 0x6f0   :  { %2006 = vmatprep.subr.mxu0 %v1977_v52  ;;  %v4991_v52 = vld [vmem:[#allocation8 + $0x30] sm:$0xff]  }
 0x6f1   :  { %2007 = vmatpush1.msra.mxu0 %v1976_v30  ;;  %v4814_v30 = vunpack.c.h.bf16 %v4991_v52 }
 0x6f2   :  { %2008 = vmatprep.subr.mxu0 %v1975_v32  ;;  %v4813_v32 = vunpack.c.l.bf16 %v4991_v52 }
 0x6f3   :  { %1902 = vadd.xlane.f32.xlu0 %v1897_v7  ;;  %2009 = vmatpush1.msra.mxu0 %v1974_v34  ;;  %v4998_v34 = vld [vmem:[#allocation8 + $0x68] sm:$0xff]  }
 0x6f4   :  { %2010 = vmatprep.subr.mxu0 %v1973_v19  ;;  %v4842_v35 = vunpack.c.h.bf16 %v4998_v34  ;;  %v4990_v19 = vld [vmem:[#allocation8 + $0x28] sm:$0xff]   ;;  %v4841_v40 = vunpack.c.l.bf16 %v4998_v34 }
 0x6f5   :  { %2011 = vmatpush1.msra.mxu0 %v1972_v38  ;;  %v4810_v38 = vunpack.c.h.bf16 %v4990_v19 }
 0x6f6   :  { %2012 = vmatprep.subr.mxu0 %v1971_v42  ;;  %v4809_v42 = vunpack.c.l.bf16 %v4990_v19 }
 0x6f7   :  { %2013 = vmatpush1.msra.mxu0 %v1970_v43  ;;  %v4997_v43 = vld [vmem:[#allocation8 + $0x60] sm:$0xff]  }
 0x6f8   :  { %2014 = vmatprep.subr.mxu0 %v1969_v45  ;;  %v4838_v44 = vunpack.c.h.bf16 %v4997_v43  ;;  %v4989_v45 = vld [vmem:[#allocation8 + $0x20] sm:$0xff]   ;;  %v4837_v47 = vunpack.c.l.bf16 %v4997_v43 }
 0x6f9   :  { %2015 = vmatpush1.msra.mxu0 %v1968_v46  ;;  %v4806_v46 = vunpack.c.h.bf16 %v4989_v45  ;;  %v4805_v48 = vunpack.c.l.bf16 %v4989_v45 }
 0x6fa   :  { %2016 = vmatprep.subr.mxu0 %v1967_v53  ;;  %v4988_v53 = vld [vmem:[#allocation8 + $0x18] sm:$0xff]  }
 0x6fb   :  { %2017 = vmatpush1.msra.mxu0 %v1966_v51  ;;  %v4834_v51 = vunpack.c.h.bf16 %v4996_v49 }
 0x6fc   :  { %2018 = vmatprep.subr.mxu0 %v1965_v54  ;;  %v4833_v54 = vunpack.c.l.bf16 %v4996_v49 }
 0x6fd   :  { %2019 = vmatpush1.msra.mxu0 %v1964_v55  ;;  %v4995_v55 = vld [vmem:[#allocation8 + $0x50] sm:$0xff]  }
 0x6fe   :  { %2020 = vmatprep.subr.mxu0 %v1963_v57  ;;  %v4802_v57 = vunpack.c.h.bf16 %v4988_v53  ;;  %v4830_v59 = vunpack.c.h.bf16 %v4995_v55  ;;  %v4829_v62 = vunpack.c.l.bf16 %v4995_v55 }
 0x6ff   :  { %2021 = vmatpush1.msra.mxu0 %v1962_v58  ;;  %v4801_v58 = vunpack.c.l.bf16 %v4988_v53 }
 0x700   :  { %2022 = vmatprep.subr.mxu0 %v1961_v60  ;;  %v4798_v60 = vunpack.c.h.bf16 %v4987_v56 }
 0x701   :  { %2023 = vmatpush1.msra.mxu0 %v1960_v61  ;;  %v4994_v61 = vld [vmem:[#allocation8 + $0x48] sm:$0xff]  }
 0x702   :  { %2024 = vmatprep.subr.mxu0 %v1959_v63  ;;  %v4986_v63 = vld [vmem:[#allocation8 + $0x8] sm:$0xff]   ;;  %v4826_v1 = vunpack.c.h.bf16 %v4994_v61 }
 0x703   :  { %2025 = vmatpush1.msra.mxu0 %v1958_v0  ;;  %v4797_v0 = vunpack.c.l.bf16 %v4987_v56 }
 0x704   :  { %2026 = vmatprep.subr.mxu0 %v1957_v2  ;;  %v4794_v2 = vunpack.c.h.bf16 %v4986_v63 }
 0x705   :  { %2027 = vmatpush1.msra.mxu0 %v1956_v3  ;;  %v4993_v3 = vld [vmem:[#allocation8 + $0x40] sm:$0xff]  }
 0x706   :  { %2028 = vmatprep.subr.mxu0 %v1955_v4  ;;  %v4825_v4 = vunpack.c.l.bf16 %v4994_v61 }
 0x707   :  { %2029 = vmatpush1.msra.mxu0 %v1954_v5  ;;  %v4788_v5 = vld [vmem:[#allocation8] sm:$0xff]  }
 0x778   :  { %v1901_v36 = vpop.xlane.xlu0 %1900 }
 0x779   :  { %v1904_v21 = vmul.f32 0.0078125, %v1901_v36 }
 0x77b   :  { %v6166_v22 = vsub.f32 %v1896_v50, %v1904_v21  ;;  %v5000_v21 = vld [vmem:[#allocation8 + $0x78] sm:$0xff]  }
 0x77c   :  { %v1903_v24 = vpop.xlane.xlu0 %1902 }
 0x77d   :  { %v1905_v25 = vmul.f32 0.0078125, %v1903_v24  ;;  %v1908_v26 = vmul.f32 %v6166_v22, %v6166_v22  ;;  %v4992_v24 = vld [vmem:[#allocation8 + $0x38] sm:$0xff]  }
 0x77f   :  { %v6170_v27 = vsub.f32 %v1897_v7, %v1905_v25  ;;  %1910 = vadd.xlane.f32.xlu1 %v1908_v26  ;;  %v4818_v25 = vunpack.c.h.bf16 %v4992_v24  ;;  %v4849_v26 = vunpack.c.l.bf16 %v5000_v21 }
 0x781   :  { %v1909_v28 = vmul.f32 %v6170_v27, %v6170_v27 }
 0x783   :  { %1912 = vadd.xlane.f32.xlu0 %v1909_v28  ;;  %v4817_v28 = vunpack.c.l.bf16 %v4992_v24 }
 0x808   :  { %v1911_v6 = vpop.xlane.xlu1 %1910 }
 0x809   :  { %v1914_v50 = vmul.f32 0.0078125, %v1911_v6  ;;  %v4793_v6 = vunpack.c.l.bf16 %v4986_v63 }
 0x80b   :  { %v1916_v7 = vadd.f32 1e-12, %v1914_v50  ;;  %v4822_v50 = vunpack.c.h.bf16 %v4993_v3 }
 0x80c   :  { %v1913_v8 = vpop.xlane.xlu0 %1912 }
 0x80d   :  { %5655 = vrsqrt.f32 %v1916_v7  ;;  %v1915_v9 = vmul.f32 0.0078125, %v1913_v8  ;;  %v4790_v7 = vunpack.c.h.bf16 %v4788_v5  ;;  %v4821_v8 = vunpack.c.l.bf16 %v4993_v3 }
 0x80f   :  { %v1917_v10 = vadd.f32 1e-12, %v1915_v9  ;;  %v4789_v9 = vunpack.c.l.bf16 %v4788_v5 }
 0x811   :  { %5657 = vrsqrt.f32 %v1917_v10  ;;  %v1986_v10 = vld [vmem:[%s6545_s12] sm:$0x3] }
 0x81a   :  { %v5656_v11 = vpop.eup %5655 }
 0x81b   :  { %v1920_v13 = vmul.f32 %v5656_v11, %v6166_v22  ;;  %v4850_v22 = vunpack.c.h.bf16 %v5000_v21  ;;  %v1991_v11 = vrot.slane %v1986_v10, %v5973_v37 }
 0x81d   :  { %v1928_v15 = vmul.f32 %v4693_v12, %v1920_v13  ;;  %5099 = vmatprep.subr.mxu1 %v4850_v22 }
 0x81e   :  { %v5658_v16 = vpop.eup %5657  ;;  %5100 = vmatpush3.msra.mxu1 %v4818_v25 }
 0x81f   :  { %v6181_v18 = vadd.f32 %v4694_v14, %v1928_v15  ;;  %v1921_v20 = vmul.f32 %v5658_v16, %v6170_v27  ;;  %v4999_v27 = vld [vmem:[#allocation8 + $0x70] sm:$0xff]   ;;  %5101 = vmatprep.subr.mxu1 %v4849_v26 }
 0x820   :  { %v4846_v29 = vunpack.c.h.bf16 %v4999_v27  ;;  %5102 = vmatpush3.msra.mxu1 %v4817_v28  ;;  %v4845_v31 = vunpack.c.l.bf16 %v4999_v27 }
 0x821   :  { %2063 = vmatmul.mubr.f32.vlgmr.msra.gmra.mxu0 %v6181_v18  ;;  %v1929_v33 = vmul.f32 %v4693_v12, %v1921_v20  ;;  %v1995_v12 = vrot.slane %v1986_v10, %v5979_v39 }
 0x822   :  { %2068 = vmatprep.mubr.f32.mxu0 %v5816_v17  ;;  %5103 = vmatprep.subr.mxu1 %v4846_v29 }
 0x823   :  { %v6186_v36 = vadd.f32 %v4694_v14, %v1929_v33  ;;  %5104 = vmatpush3.msra.mxu1 %v4814_v30 }
 0x824   :  { %5105 = vmatprep.subr.mxu1 %v4845_v31 }
 0x825   :  { %2069 = vmatmul.mubr.f32.gmra.mxu0 %v6186_v36  ;;  %5106 = vmatpush3.msra.mxu1 %v4813_v32 }
 0x826   :  { %2462 = vmatprep.mubr.f32.mxu0 %v5816_v17  ;;  %5107 = vmatprep.subr.mxu1 %v4842_v35 }
 0x827   :  { %5108 = vmatpush3.msra.mxu1 %v4810_v38 }
 0x828   :  { %5109 = vmatprep.subr.mxu1 %v4841_v40 }
 0x829   :  { %5110 = vmatpush3.msra.mxu1 %v4809_v42 }
 0x82a   :  { %5111 = vmatprep.subr.mxu1 %v4838_v44 }
 0x82b   :  { %5112 = vmatpush3.msra.mxu1 %v4806_v46 }
 0x82c   :  { %5113 = vmatprep.subr.mxu1 %v4837_v47 }
 0x82d   :  { %5114 = vmatpush3.msra.mxu1 %v4805_v48 }
 0x82e   :  { %5115 = vmatprep.subr.mxu1 %v4834_v51 }
 0x82f   :  { %5116 = vmatpush3.msra.mxu1 %v4802_v57 }
 0x830   :  { %5117 = vmatprep.subr.mxu1 %v4833_v54 }
 0x831   :  { %5118 = vmatpush3.msra.mxu1 %v4801_v58 }
 0x832   :  { %5119 = vmatprep.subr.mxu1 %v4830_v59 }
 0x833   :  { %5120 = vmatpush3.msra.mxu1 %v4798_v60 }
 0x834   :  { %5121 = vmatprep.subr.mxu1 %v4829_v62 }
 0x835   :  { %5122 = vmatpush3.msra.mxu1 %v4797_v0 }
 0x836   :  { %5123 = vmatprep.subr.mxu1 %v4826_v1 }
 0x837   :  { %5124 = vmatpush3.msra.mxu1 %v4794_v2  ;;  %v4695_v2 = vld [vmem:[%s6547_s14] ss:$0 sm:$0xff] }
 0x838   :  { %5125 = vmatprep.subr.mxu1 %v4825_v4 }
 0x839   :  { %5126 = vmatpush3.msra.mxu1 %v4793_v6 }
 0x83a   :  { %5127 = vmatprep.subr.mxu1 %v4822_v50 }
 0x83b   :  { %5128 = vmatpush3.msra.mxu1 %v4790_v7 }
 0x83c   :  { %5129 = vmatprep.subr.mxu1 %v4821_v8 }
 0x83d   :  { %5130 = vmatpush3.msra.mxu1 %v4789_v9 }
 0x8e1   :  { %v2064_v13 = vpop.f32.mrf.mxu0 }
 0x8e2   :  { %v2065_v14 = vadd.f32 %v2064_v13, %v1991_v11  ;;  %v2326_v13 = vld [vmem:[#allocation3 + $0x15c] sm:$0xff] }
 0x8e3   :  { %v2066_v15 = vpop.f32.mrf.mxu0 }
 0x8e4   :  { %v2075_v16 = vmul.f32 %v2065_v14, %v2065_v14  ;;  %v2067_v20 = vadd.f32 %v2066_v15, %v1995_v12 }
 0x8e5   :  { %v2070_v33 = vpop.f32.mrf.mxu0 }
 0x8e6   :  { %v2079_v21 = vmul.f32 %v2075_v16, %v2065_v14  ;;  %v2076_v22 = vmul.f32 %v2067_v20, %v2067_v20  ;;  %v2071_v24 = vadd.f32 %v2070_v33, %v1991_v11  ;;  %v2330_v11 = vld [vmem:[#allocation3 + $0x174] sm:$0xff] }
 0x8e7   :  { %v2072_v25 = vpop.f32.mrf.mxu0  ;;  %v2378_v15 = vunpack.c.h.bf16 %v2330_v11 }
 0x8e8   :  { %v2083_v26 = vmul.f32 0.044715, %v2079_v21  ;;  %v2080_v28 = vmul.f32 %v2076_v22, %v2067_v20  ;;  %v2077_v27 = vmul.f32 %v2071_v24, %v2071_v24  ;;  %v2073_v29 = vadd.f32 %v2072_v25, %v1995_v12  ;;  %v2328_v12 = vld [vmem:[#allocation3 + $0x168] sm:$0xff]  ;;  %v2324_v22 = vld [vmem:[#allocation3 + $0x150] sm:$0xff] }
 0x8e9   :  { %v2375_v16 = vunpack.c.h.bf16 %v2328_v12  ;;  %v2374_v33 = vunpack.c.l.bf16 %v2328_v12  ;;  %2398 = vmatprep.subr.mxu0 %v2378_v15  ;;  %v2311_v12 = vld [vmem:[#allocation3 + $0xf8] ss:$12 sps:$4 sm:$0xff]  }
 0x8ea   :  { %v2087_v52 = vadd.f32 %v2083_v26, %v2065_v14  ;;  %v2084_v30 = vmul.f32 0.044715, %v2080_v28  ;;  %v2081_v31 = vmul.f32 %v2077_v27, %v2071_v24  ;;  %v2078_v32 = vmul.f32 %v2073_v29, %v2073_v29 }
 0x8eb   :  { %v2368_v26 = vunpack.c.l.bf16 %v2324_v22 }
 0x8ec   :  { %v2091_v34 = vmul.f32 0.7978846, %v2087_v52  ;;  %v2088_v35 = vadd.f32 %v2084_v30, %v2067_v20  ;;  %v2085_v19 = vmul.f32 0.044715, %v2081_v31  ;;  %v2082_v38 = vmul.f32 %v2078_v32, %v2073_v29 }
 0x8ee   :  { %5659 = vtanh.f32 %v2091_v34  ;;  %v2092_v40 = vmul.f32 0.7978846, %v2088_v35  ;;  %v2089_v42 = vadd.f32 %v2085_v19, %v2071_v24  ;;  %v2086_v43 = vmul.f32 0.044715, %v2082_v38  ;;  %v2322_v35 = vld [vmem:[#allocation3 + $0x144] sm:$0xff] }
 0x8ef   :  { %v2327_v19 = vld [vmem:[#allocation3 + $0x158] ss:$12 sps:$4 sm:$0xff]   ;;  %v2366_v38 = vunpack.c.h.bf16 %v2322_v35 }
 0x8f0   :  { %5661 = vtanh.f32 %v2092_v40  ;;  %v2093_v44 = vmul.f32 0.7978846, %v2089_v42  ;;  %v2090_v45 = vadd.f32 %v2086_v43, %v2073_v29  ;;  %v2373_v40 = vunpack.c.h.bf16 %v2327_v19  ;;  %v2320_v43 = vld [vmem:[#allocation3 + $0x138] sm:$0xff] }
 0x8f1   :  { %v2365_v42 = vunpack.c.l.bf16 %v2322_v35 }
 0x8f2   :  { %5663 = vtanh.f32 %v2093_v44  ;;  %v2094_v46 = vmul.f32 0.7978846, %v2090_v45  ;;  %v2363_v44 = vunpack.c.h.bf16 %v2320_v43  ;;  %v2370_v45 = vunpack.c.l.bf16 %v2327_v19 }
 0x8f4   :  { %5665 = vtanh.f32 %v2094_v46  ;;  %v2362_v46 = vunpack.c.l.bf16 %v2320_v43 }
 0x8fb   :  { %v5660_v47 = vpop.eup %5659 }
 0x8fc   :  { %v2099_v48 = vadd.f32 1.0, %v5660_v47  ;;  %v2318_v47 = vld [vmem:[#allocation3 + $0x12c] sm:$0xff] }
 0x8fd   :  { %v5662_v49 = vpop.eup %5661 }
 0x8fe   :  { %v2100_v51 = vadd.f32 1.0, %v5662_v49  ;;  %v2103_v54 = vmul.f32 0.5, %v2099_v48  ;;  %v2323_v48 = vld [vmem:[#allocation3 + $0x140] ss:$12 sps:$4 sm:$0xff]   ;;  %v2360_v49 = vunpack.c.h.bf16 %v2318_v47 }
 0x8ff   :  { %v5664_v53 = vpop.eup %5663 }
 0x900   :  { %v2104_v55 = vmul.f32 0.5, %v2100_v51  ;;  %v2101_v56 = vadd.f32 1.0, %v5664_v53  ;;  %v2107_v60 = vmul.f32 %v2103_v54, %v2065_v14  ;;  %v2377_v14 = vunpack.c.l.bf16 %v2330_v11  ;;  %v2316_v54 = vld [vmem:[#allocation3 + $0x120] sm:$0xff] }
 0x901   :  { %v5666_v57 = vpop.eup %5665  ;;  %v2367_v51 = vunpack.c.h.bf16 %v2323_v48  ;;  %v2359_v53 = vunpack.c.l.bf16 %v2318_v47  ;;  %v2306_v11 = vld [vmem:[#allocation3 + $0xe4] sm:$0xff]  ;;  %v4697_v47 = vld [vmem:[%s6549_s16] ss:$0 sm:$0xff] }
 0x902   :  { %v2108_v58 = vmul.f32 %v2104_v55, %v2067_v20  ;;  %v2102_v59 = vadd.f32 1.0, %v5666_v57  ;;  %v2105_v61 = vmul.f32 0.5, %v2101_v56  ;;  %v2331_v20 = vld [vmem:[#allocation3 + $0x170] ss:$12 sps:$4 sm:$0xff]   ;;  %2399 = vmatpush1.msra.mxu0 %v2377_v14  ;;  %v2357_v55 = vunpack.c.h.bf16 %v2316_v54 }
 0x903   :  { %v2379_v21 = vunpack.c.h.bf16 %v2331_v20  ;;  %v2376_v25 = vunpack.c.l.bf16 %v2331_v20  ;;  %2400 = vmatprep.subr.mxu0 %v2375_v16  ;;  %v2364_v56 = vunpack.c.l.bf16 %v2323_v48  ;;  %v2356_v57 = vunpack.c.l.bf16 %v2316_v54  ;;  %v2304_v16 = vld [vmem:[#allocation3 + $0xd8] sm:$0xff] }
 0x904   :  { %2246 = vmatprep.mubr.f32.mxu1 %v2108_v58  ;;  %v2106_v62 = vmul.f32 0.5, %v2102_v59  ;;  %v2109_v0 = vmul.f32 %v2105_v61, %v2071_v24  ;;  %v2372_v24 = vunpack.c.h.bf16 %v2326_v13  ;;  %2401 = vmatpush1.msra.mxu0 %v2374_v33  ;;  %v2314_v58 = vld [vmem:[#allocation3 + $0x114] sm:$0xff]  ;;  %v2349_v14 = vunpack.c.h.bf16 %v2311_v12 }
 0x905   :  { %2247 = vmatmul.mubr.f32.vlgmr.msra.gmra.mxu1 %v2107_v60  ;;  %5413 = vmatprep.subr.mxu1 %v2379_v21  ;;  %v2319_v59 = vld [vmem:[#allocation3 + $0x128] ss:$12 sps:$4 sm:$0xff]   ;;  %v2354_v60 = vunpack.c.h.bf16 %v2314_v58  ;;  %v2341_v15 = vunpack.c.l.bf16 %v2306_v11  ;;  %v2339_v20 = vunpack.c.h.bf16 %v2304_v16  ;;  %v2346_v33 = vunpack.c.l.bf16 %v2311_v12 }
 0x906   :  { %v2110_v63 = vmul.f32 %v2106_v62, %v2073_v29  ;;  %5414 = vmatpush3.msra.mxu1 %v2379_v21  ;;  %2402 = vmatprep.subr.mxu0 %v2372_v24  ;;  %v2361_v61 = vunpack.c.h.bf16 %v2319_v59  ;;  %v2353_v62 = vunpack.c.l.bf16 %v2314_v58  ;;  %v2338_v21 = vunpack.c.l.bf16 %v2304_v16  ;;  %v2307_v24 = vld [vmem:[#allocation3 + $0xe0] ss:$12 sps:$4 sm:$0xff]  }
 0x907   :  { %5415 = vmatprep.subr.mxu1 %v2376_v25 }
 0x908   :  { %2251 = vmatprep.mubr.f32.mxu1 %v2110_v63  ;;  %5416 = vmatpush3.msra.mxu1 %v2376_v25  ;;  %v2312_v63 = vld [vmem:[#allocation3 + $0x108] sm:$0xff]  ;;  %v2300_v25 = vld [vmem:[#allocation3 + $0xc0] sm:$0xff] }
 0x909   :  { %2252 = vmatmul.mubr.f32.gmra.mxu1 %v2109_v0  ;;  %5417 = vmatprep.subr.mxu1 %v2373_v40  ;;  %v2351_v0 = vunpack.c.h.bf16 %v2312_v63 }
 0x90a   :  { %5418 = vmatpush3.msra.mxu1 %v2373_v40 }
 0x90b   :  { %5419 = vmatprep.subr.mxu1 %v2370_v45 }
 0x90c   :  { %5420 = vmatpush3.msra.mxu1 %v2370_v45  ;;  %v4696_v45 = vld [vmem:[%s6548_s15] ss:$0 sm:$0xff] }
 0x90d   :  { %5421 = vmatprep.subr.mxu1 %v2367_v51 }
 0x90e   :  { %5422 = vmatpush3.msra.mxu1 %v2367_v51 }
 0x90f   :  { %5423 = vmatprep.subr.mxu1 %v2364_v56 }
 0x910   :  { %5424 = vmatpush3.msra.mxu1 %v2364_v56 }
 0x911   :  { %5425 = vmatprep.subr.mxu1 %v2361_v61 }
 0x912   :  { %5426 = vmatpush3.msra.mxu1 %v2361_v61 }
 0x9c5   :  { %v5131_v1 = vpop.f32.mrf.mxu1 }
 0x9c7   :  { %v5132_v3 = vpop.f32.mrf.mxu1 }
 0x9c8   :  { %v5133_v4 = vadd.f32 %v5132_v3, %v5131_v1  ;;  %v2358_v1 = vunpack.c.l.bf16 %v2319_v59  ;;  %v2310_v3 = vld [vmem:[#allocation3 + $0xfc] sm:$0xff] }
 0x9c9   :  { %v5134_v5 = vpop.f32.mrf.mxu1 }
 0x9ca   :  { %v2249_v6 = vadd.f32 %v5133_v4, %v4695_v2  ;;  %v2315_v4 = vld [vmem:[#allocation3 + $0x110] ss:$12 sps:$4 sm:$0xff]   ;;  %5427 = vmatprep.subr.mxu1 %v2358_v1 }
 0x9cb   :  { %v5135_v50 = vpop.f32.mrf.mxu1  ;;  %5428 = vmatpush3.msra.mxu1 %v2358_v1 }
 0x9cc   :  { %v5136_v7 = vadd.f32 %v5135_v50, %v5134_v5  ;;  %v2257_v8 = vadd.f32 %v2249_v6, %v6181_v18  ;;  %v2371_v18 = vunpack.c.l.bf16 %v2326_v13  ;;  %v2348_v5 = vunpack.c.h.bf16 %v2310_v3 }
 0x9cd   :  { %v2355_v6 = vunpack.c.h.bf16 %v2315_v4  ;;  %v2347_v50 = vunpack.c.l.bf16 %v2310_v3  ;;  %v2342_v13 = vunpack.c.h.bf16 %v2306_v11 }
 0x9ce   :  { %v2254_v9 = vadd.f32 %v5136_v7, %v4695_v2  ;;  %2261 = vadd.xlane.f32.xlu0 %v2257_v8  ;;  %2403 = vmatpush1.msra.mxu0 %v2371_v18  ;;  %v2350_v2 = vunpack.c.l.bf16 %v2312_v63  ;;  %v2308_v7 = vld [vmem:[#allocation3 + $0xf0] sm:$0xff] }
 0x9cf   :  { %5429 = vmatprep.subr.mxu1 %v2355_v6 }
 0x9d0   :  { %v2258_v10 = vadd.f32 %v2254_v9, %v6186_v36  ;;  %v2369_v36 = vunpack.c.h.bf16 %v2324_v22  ;;  %v2352_v9 = vunpack.c.l.bf16 %v2315_v4  ;;  %5430 = vmatpush3.msra.mxu1 %v2355_v6  ;;  %v2302_v22 = vld [vmem:[#allocation3 + $0xcc] sm:$0xff] }
 0x9d1   :  { %v2335_v18 = vunpack.c.l.bf16 %v2302_v22 }
 0x9d2   :  { %2263 = vadd.xlane.f32.xlu0 %v2258_v10  ;;  %2404 = vmatprep.subr.mxu0 %v2369_v36  ;;  %v2336_v36 = vunpack.c.h.bf16 %v2302_v22 }
 0x9d3   :  { %2405 = vmatpush1.msra.mxu0 %v2368_v26  ;;  %5431 = vmatprep.subr.mxu1 %v2352_v9  ;;  %v2343_v26 = vunpack.c.h.bf16 %v2307_v24 }
 0x9d4   :  { %2406 = vmatprep.subr.mxu0 %v2366_v38  ;;  %5432 = vmatpush3.msra.mxu1 %v2352_v9 }
 0x9d5   :  { %2407 = vmatpush1.msra.mxu0 %v2365_v42  ;;  %5433 = vmatprep.subr.mxu1 %v2349_v14 }
 0x9d6   :  { %2408 = vmatprep.subr.mxu0 %v2363_v44  ;;  %5434 = vmatpush3.msra.mxu1 %v2349_v14 }
 0x9d7   :  { %2409 = vmatpush1.msra.mxu0 %v2362_v46  ;;  %5435 = vmatprep.subr.mxu1 %v2346_v33 }
 0x9d8   :  { %2410 = vmatprep.subr.mxu0 %v2360_v49  ;;  %5436 = vmatpush3.msra.mxu1 %v2346_v33 }
 0x9d9   :  { %2411 = vmatpush1.msra.mxu0 %v2359_v53  ;;  %5437 = vmatprep.subr.mxu1 %v2343_v26 }
 0x9da   :  { %2412 = vmatprep.subr.mxu0 %v2357_v55  ;;  %5438 = vmatpush3.msra.mxu1 %v2343_v26 }
 0x9db   :  { %2413 = vmatpush1.msra.mxu0 %v2356_v57 }
 0x9dc   :  { %2414 = vmatprep.subr.mxu0 %v2354_v60 }
 0x9dd   :  { %2415 = vmatpush1.msra.mxu0 %v2353_v62 }
 0x9de   :  { %2416 = vmatprep.subr.mxu0 %v2351_v0 }
 0x9df   :  { %2417 = vmatpush1.msra.mxu0 %v2350_v2 }
 0x9e0   :  { %2418 = vmatprep.subr.mxu0 %v2348_v5 }
 0x9e1   :  { %2419 = vmatpush1.msra.mxu0 %v2347_v50 }
 0xa57   :  { %v2262_v28 = vpop.xlane.xlu0 %2261 }
 0xa58   :  { %v2265_v27 = vmul.f32 0.0078125, %v2262_v28  ;;  %v2332_v28 = vunpack.c.l.bf16 %v2300_v25 }
 0xa5a   :  { %v6200_v29 = vsub.f32 %v2257_v8, %v2265_v27  ;;  %v2345_v8 = vunpack.c.h.bf16 %v2308_v7  ;;  %v2333_v27 = vunpack.c.h.bf16 %v2300_v25 }
 0xa5b   :  { %v2264_v52 = vpop.xlane.xlu0 %2263 }
 0xa5c   :  { %v2266_v30 = vmul.f32 0.0078125, %v2264_v52  ;;  %v2269_v31 = vmul.f32 %v6200_v29, %v6200_v29  ;;  %2420 = vmatprep.subr.mxu0 %v2345_v8  ;;  %v2340_v52 = vunpack.c.l.bf16 %v2307_v24 }
 0xa5e   :  { %v6204_v32 = vsub.f32 %v2258_v10, %v2266_v30  ;;  %2271 = vadd.xlane.f32.xlu1 %v2269_v31  ;;  %v2344_v10 = vunpack.c.l.bf16 %v2308_v7  ;;  %v2303_v30 = vld [vmem:[#allocation3 + $0xc8] ss:$12 sps:$4 sm:$0xff]   ;;  %5439 = vmatprep.subr.mxu1 %v2340_v52 }
 0xa5f   :  { %v2337_v31 = vunpack.c.h.bf16 %v2303_v30  ;;  %5440 = vmatpush3.msra.mxu1 %v2340_v52 }
 0xa60   :  { %v2270_v34 = vmul.f32 %v6204_v32, %v6204_v32  ;;  %2421 = vmatpush1.msra.mxu0 %v2344_v10 }
 0xa61   :  { %2422 = vmatprep.subr.mxu0 %v2342_v13  ;;  %5441 = vmatprep.subr.mxu1 %v2337_v31 }
 0xa62   :  { %2273 = vadd.xlane.f32.xlu1 %v2270_v34  ;;  %2423 = vmatpush1.msra.mxu0 %v2341_v15  ;;  %v2334_v34 = vunpack.c.l.bf16 %v2303_v30 }
 0xa63   :  { %2424 = vmatprep.subr.mxu0 %v2339_v20  ;;  %5442 = vmatpush3.msra.mxu1 %v2337_v31 }
 0xa64   :  { %2425 = vmatpush1.msra.mxu0 %v2338_v21  ;;  %5443 = vmatprep.subr.mxu1 %v2334_v34 }
 0xa65   :  { %2426 = vmatprep.subr.mxu0 %v2336_v36  ;;  %5444 = vmatpush3.msra.mxu1 %v2334_v34 }
 0xa66   :  { %2427 = vmatpush1.msra.mxu0 %v2335_v18  ;;  %5483 = vmatprep.subr.mxu1 %v5816_v17 }
 0xa67   :  { %2428 = vmatprep.subr.mxu0 %v2333_v27 }
 0xa68   :  { %2429 = vmatpush1.msra.mxu0 %v2332_v28 }
 0xa69   :  { %5448 = vmatprep.subr.mxu0 %v5816_v17 }
 0xae7   :  { %v2272_v35 = vpop.xlane.xlu1 %2271 }
 0xae8   :  { %v2275_v19 = vmul.f32 0.0078125, %v2272_v35 }
 0xaea   :  { %v2277_v38 = vadd.f32 1e-12, %v2275_v19 }
 0xaeb   :  { %v2274_v40 = vpop.xlane.xlu1 %2273 }
 0xaec   :  { %5667 = vrsqrt.f32 %v2277_v38  ;;  %v2276_v42 = vmul.f32 0.0078125, %v2274_v40 }
 0xaee   :  { %v2278_v43 = vadd.f32 1e-12, %v2276_v42 }
 0xaf0   :  { %5669 = vrsqrt.f32 %v2278_v43 }
 0xaf9   :  { %v5668_v44 = vpop.eup %5667 }
 0xafa   :  { %v2281_v46 = vmul.f32 %v5668_v44, %v6200_v29  ;;  %v4698_v29 = vld [vmem:[%s6539_s6 + $0x3] sm:$0x7] }
 0xafb   :  { %v2394_v57 = vrot.slane %v4698_v29, %v239_v41  ;;  %v2386_v58 = vrot.slane %v4698_v29, %v5973_v37  ;;  %v2550_v41 = vld [vmem:[%s6561_s21] sm:$0x1] }
 0xafc   :  { %v2289_v48 = vmul.f32 %v4696_v45, %v2281_v46  ;;  %v2551_v3 = vsub.f32 1.0, %v2550_v41 }
 0xafd   :  { %v5670_v49 = vpop.eup %5669 }
 0xafe   :  { %v6217_v51 = vadd.f32 %v4697_v47, %v2289_v48  ;;  %v2282_v53 = vmul.f32 %v5670_v49, %v6204_v32  ;;  %v6235_v32 = vrot.slane %v4698_v29, %v5979_v39  ;;  %v2552_v4 = vmul.f32 -1e+09, %v2551_v3 }
 0xb00   :  { %2463 = vmatmul.mubr.f32.vlgmr.msra.gmra.mxu0 %v6217_v51  ;;  %5445 = vmatprep.mubr.f32.mxu1 %v6217_v51  ;;  %v2290_v54 = vmul.f32 %v4696_v45, %v2282_v53  ;;  %v6266_v6 = vrot.slane %v2552_v4, %v5973_v37 }
 0xb01   :  { %2468 = vmatprep.mubr.f32.mxu0 %v5816_v17 }
 0xb02   :  { %v6223_v55 = vadd.f32 %v4697_v47, %v2290_v54 }
 0xb04   :  { %2469 = vmatmul.mubr.f32.gmra.mxu0 %v6223_v55  ;;  %5446 = vmatmul.mubr.f32.vlgmr.msra.gmra.mxu1 %v6223_v55 }
 0xb05   :  { %5450 = vmatprep.mubr.msk.f32.mxu0 %vm5817_vm0, %v5816_v17  ;;  %5485 = vmatprep.mubr.msk.f32.mxu1 %vm5817_vm0, %v5816_v17 }
 0xbc0   :  { %v2464_v56 = vpop.f32.mrf.mxu0 }
 0xbc1   :  { %v6249_v1 = vadd.f32 %v2464_v56, %v2386_v58 }
 0xbc2   :  { %v2466_v59 = vpop.f32.mrf.mxu0 }
 0xbc3   :  { %v6241_v60 = vadd.f32 %v2466_v59, %v6235_v32 }
 0xbc4   :  { %v2470_v61 = vpop.f32.mrf.mxu0  ;;  %v5447_v62 = vpop.f32.mrf.mxu1 }
 0xbc5   :  { %v6243_v63 = vadd.f32 %v2470_v61, %v2386_v58  ;;  %v6245_v0 = vadd.f32 %v5447_v62, %v2394_v57  ;;  %5449 = vmatpush3.xpose.msk.msra.mxu0 %vm399_vm1, %v6241_v60 }
 0xbc6   :  { %v2541_v2 = vpop.f32.mrf.mxu1  ;;  %5453 = vmatprep.subr.mxu0 %v5816_v17  ;;  %v6263_v5 = vpop.f32.mrf.mxu0 }
 0xbc7   :  { %v6252_v23 = vadd.f32 %v2541_v2, %v2394_v57 }
 0xbc8   :  { %5451 = vmatmul.mubr.msk.f32.vlgmr.msra.gmra.mxu0 %vm399_vm1, %v6249_v1 }
 0xbc9   :  { %5454 = vmatpush3.msra.mxu0 %v6252_v23  ;;  %5455 = vmatprep.mubr.msk.f32.mxu0 %vm5817_vm0, %v5816_v17 }
 0xbca   :  { %5458 = vmatprep.subr.mxu0 %v5816_v17 }
 0xc88   :  { %v2625_v50 = vpop.f32.mrf.mxu0 }
 0xc89   :  { %v2629_v7 = vmul.f32 0.17677669, %v2625_v50 }
 0xc8a   :  { %v5452_v8 = vpop.f32.mrf.mxu0 }
 0xc8b   :  { %v2636_v9 = vadd.f32 %v6266_v6, %v2629_v7  ;;  %v4711_v8 = vld [vmem:[%s6561_s21 + $0x1] sm:$0x1] }
 0xc8d   :  { %v2637_v10 = vsel %vm484_vm2, %v2636_v9, -inf }
 0xc8e   :  { %2638 = vmax.xlane.f32.xlu0 %v2637_v10 }
 0xca4   :  { %2724 = vrot.lane.b32.xlu0 %v6241_v60, %s5818_s29 }
 0xd17   :  { %v2639_v11 = vpop.xlane.xlu0 %2638 }
 0xd18   :  { %v2640_v12 = vsub.f32 %v2636_v9, %v2639_v11  ;;  %v3240_v9 = vsub.f32 1.0, %v4711_v8 }
 0xd1a   :  { %v2641_v13 = vmul.f32 1.442695, %v2640_v12  ;;  %v3241_v12 = vmul.f32 -1e+09, %v3240_v9 }
 0xd1b   :  { %v2725_v21 = vpop.permute.xlu0 %2724 }
 0xd1c   :  { %5671 = vpow2.f32 %v2641_v13 }
 0xd29   :  { %v5672_v14 = vpop.eup %5671 }
 0xd2a   :  { %v2643_v15 = vsel %vm484_vm2, %v5672_v14, 0.0 }
 0xd2b   :  { %2644 = vadd.xlane.f32.xlu1 %v2643_v15 }
 0xd3c   :  { %2722 = vrot.lane.b32.xlu1 %v6249_v1, %s5818_s29 }
 0xdb4   :  { %v2645_v16 = vpop.xlane.xlu1 %2644 }
 0xdb5   :  { %5673 = vrcp.f32 %v2645_v16 }
 0xdb8   :  { %v2723_v22 = vpop.permute.xlu1 %2722 }
 0xdc2   :  { %v5674_v20 = vpop.eup %5673 }
 0xdc3   :  { %v2647_v33 = vmul.f32 %v5674_v20, %v5672_v14  ;;  %v3323_v20 = vrot.slane %v3241_v12, %v5973_v37 }
 0xdc5   :  { %5456 = vmatmul.mubr.msk.f32.vlgmr.msra.gmra.mxu0 %vm484_vm2, %v2647_v33 }
 0xdc6   :  { %5459 = vmatpush3.xpose.msk.msra.mxu0 %vm399_vm1, %v2725_v21  ;;  %5460 = vmatprep.mubr.msk.f32.mxu0 %vm5817_vm0, %v5816_v17 }
 0xdc7   :  { %5463 = vmatprep.subr.mxu0 %v5816_v17 }
 0xdc9   :  { %5461 = vmatmul.mubr.msk.f32.vlgmr.msra.gmra.mxu0 %vm399_vm1, %v2723_v22 }
 0xdca   :  { %5465 = vmatprep.mubr.msk.f32.mxu0 %vm5817_vm0, %v5816_v17 }
 0xe85   :  { %v2717_v24 = vpop.f32.mrf.mxu0 }
 0xe86   :  { %2721 = vst.msk [vmem:[#allocation2] sm:$0xff] %vm399_vm1, %v2717_v24 }
 0xe87   :  { %v5457_v25 = vpop.f32.mrf.mxu0 }
 0xe89   :  { %v2796_v18 = vpop.f32.mrf.mxu0 }
 0xe8a   :  { %v2800_v36 = vmul.f32 0.17677669, %v2796_v18 }
 0xe8b   :  { %v5462_v26 = vpop.f32.mrf.mxu0 }
 0xe8c   :  { %v2801_v28 = vadd.f32 %v2800_v36, %v6266_v6 }
 0xe8e   :  { %v2802_v27 = vsel %vm484_vm2, %v2801_v28, -inf }
 0xe8f   :  { %2803 = vmax.xlane.f32.xlu1 %v2802_v27 }
 0xea0   :  { %2897 = vrot.lane.b32.xlu1 %v6241_v60, %s5814_s30 }
 0xea4   :  { %2895 = vrot.lane.b32.xlu1 %v6249_v1, %s5814_s30 }
 0xf18   :  { %v2804_v52 = vpop.xlane.xlu1 %2803 }
 0xf19   :  { %v2805_v30 = vsub.f32 %v2801_v28, %v2804_v52 }
 0xf1b   :  { %v2806_v31 = vmul.f32 1.442695, %v2805_v30 }
 0xf1c   :  { %v2898_v42 = vpop.permute.xlu1 %2897 }
 0xf1d   :  { %5675 = vpow2.f32 %v2806_v31 }
 0xf20   :  { %v2896_v44 = vpop.permute.xlu1 %2895 }
 0xf2a   :  { %v5676_v34 = vpop.eup %5675 }
 0xf2b   :  { %v2808_v35 = vsel %vm484_vm2, %v5676_v34, 0.0 }
 0xf2c   :  { %2809 = vadd.xlane.f32.xlu0 %v2808_v35 }
 0xf42   :  { %2814 = vrot.lane.b32.xlu0 %v6252_v23, %s5818_s29 }
 0xfb5   :  { %v2810_v19 = vpop.xlane.xlu0 %2809 }
 0xfb6   :  { %5677 = vrcp.f32 %v2810_v19 }
 0xfb9   :  { %v2815_v38 = vpop.permute.xlu0 %2814 }
 0xfba   :  { %5464 = vmatpush3.msra.mxu0 %v2815_v38 }
 0xfbb   :  { %5468 = vmatprep.subr.mxu0 %v5816_v17 }
 0xfc3   :  { %v5678_v40 = vpop.eup %5677 }
 0xfc4   :  { %v2812_v43 = vmul.f32 %v5678_v40, %v5676_v34 }
 0xfc6   :  { %5466 = vmatmul.mubr.msk.f32.vlgmr.msra.gmra.mxu0 %vm484_vm2, %v2812_v43 }
 0xfc7   :  { %5469 = vmatpush3.xpose.msk.msra.mxu0 %vm399_vm1, %v2898_v42  ;;  %5470 = vmatprep.mubr.msk.f32.mxu0 %vm5817_vm0, %v5816_v17 }
 0xfc8   :  { %5473 = vmatprep.subr.mxu0 %v5816_v17 }
 0xfca   :  { %5471 = vmatmul.mubr.msk.f32.vlgmr.msra.gmra.mxu0 %vm399_vm1, %v2896_v44 }
 0xfcb   :  { %5475 = vmatprep.mubr.msk.f32.mxu0 %vm5817_vm0, %v5816_v17 }
0x1086   :  { %v6302_v45 = vpop.f32.mrf.mxu0 }
0x1088   :  { %v5467_v46 = vpop.f32.mrf.mxu0 }
0x108a   :  { %v2969_v47 = vpop.f32.mrf.mxu0 }
0x108b   :  { %v2973_v48 = vmul.f32 0.17677669, %v2969_v47 }
0x108c   :  { %v5472_v49 = vpop.f32.mrf.mxu0 }
0x108d   :  { %v2974_v53 = vadd.f32 %v2973_v48, %v6266_v6 }
0x108f   :  { %v2975_v54 = vsel %vm484_vm2, %v2974_v53, -inf }
0x1090   :  { %2976 = vmax.xlane.f32.xlu1 %v2975_v54 }
0x10a1   :  { %3069 = vrot.lane.b32.xlu1 %v6241_v60, %s5819_s0  ;;  %v2473_v60 = vadd.f32 %v6263_v5, %v6235_v32 }
0x10a5   :  { %3067 = vrot.lane.b32.xlu1 %v6249_v1, %s5819_s0 }
0x10a9   :  { %3411 = vrot.lane.b32.xlu1 %v6243_v63, %s5818_s29 }
0x10ad   :  { %3584 = vrot.lane.b32.xlu1 %v6243_v63, %s5814_s30 }
0x10b1   :  { %3756 = vrot.lane.b32.xlu1 %v6243_v63, %s5819_s0 }
0x1119   :  { %v2977_v29 = vpop.xlane.xlu1 %2976 }
0x111a   :  { %v2978_v56 = vsub.f32 %v2974_v53, %v2977_v29 }
0x111c   :  { %v2979_v57 = vmul.f32 1.442695, %v2978_v56 }
0x111d   :  { %v3070_v1 = vpop.permute.xlu1 %3069 }
0x111e   :  { %5679 = vpow2.f32 %v2979_v57 }
0x1121   :  { %v3068_v3 = vpop.permute.xlu1 %3067 }
0x1125   :  { %v3412_v4 = vpop.permute.xlu1 %3411 }
0x1129   :  { %v3585_v50 = vpop.permute.xlu1 %3584 }
0x112b   :  { %v5680_v58 = vpop.eup %5679 }
0x112c   :  { %v2981_v59 = vsel %vm484_vm2, %v5680_v58, 0.0 }
0x112d   :  { %2982 = vadd.xlane.f32.xlu0 %v2981_v59 }
0x1143   :  { %2986 = vrot.lane.b32.xlu0 %v6252_v23, %s5814_s30 }
0x1147   :  { %3413 = vrot.lane.b32.xlu0 %v2473_v60, %s5818_s29 }
0x114b   :  { %3586 = vrot.lane.b32.xlu0 %v2473_v60, %s5814_s30 }
0x114f   :  { %3758 = vrot.lane.b32.xlu0 %v2473_v60, %s5819_s0 }
0x11b6   :  { %v2983_v61 = vpop.xlane.xlu0 %2982 }
0x11b7   :  { %5681 = vrcp.f32 %v2983_v61 }
0x11ba   :  { %v2987_v62 = vpop.permute.xlu0 %2986 }
0x11bb   :  { %5474 = vmatpush3.msra.mxu0 %v2987_v62 }
0x11bc   :  { %5478 = vmatprep.subr.mxu0 %v5816_v17 }
0x11be   :  { %v3414_v32 = vpop.permute.xlu0 %3413 }
0x11c2   :  { %v3587_v5 = vpop.permute.xlu0 %3586 }
0x11c4   :  { %v5682_v2 = vpop.eup %5681 }
0x11c5   :  { %v2985_v41 = vmul.f32 %v5682_v2, %v5680_v58 }
0x11c6   :  { %v3759_v7 = vpop.permute.xlu0 %3758 }
0x11c7   :  { %5476 = vmatmul.mubr.msk.f32.vlgmr.msra.gmra.mxu0 %vm484_vm2, %v2985_v41 }
0x11c8   :  { %5479 = vmatpush3.xpose.msk.msra.mxu0 %vm399_vm1, %v3070_v1  ;;  %5480 = vmatprep.mubr.msk.f32.mxu0 %vm5817_vm0, %v5816_v17 }
0x11c9   :  { %5488 = vmatprep.subr.mxu0 %v5816_v17 }
0x11cb   :  { %5481 = vmatmul.mubr.msk.f32.vlgmr.msra.gmra.mxu0 %vm399_vm1, %v3068_v3 }
0x11cc   :  { %5489 = vmatpush3.xpose.msk.msra.mxu0 %vm399_vm1, %v2473_v60  ;;  %5490 = vmatprep.mubr.msk.f32.mxu0 %vm5817_vm0, %v5816_v17 }
0x11cd   :  { %5498 = vmatprep.subr.mxu0 %v5816_v17 }
0x11cf   :  { %5491 = vmatmul.mubr.msk.f32.vlgmr.msra.gmra.mxu0 %vm399_vm1, %v6243_v63  ;;  %v3757_v63 = vpop.permute.xlu1 %3756 }
0x11d0   :  { %5499 = vmatpush3.xpose.msk.msra.mxu0 %vm399_vm1, %v3414_v32  ;;  %5500 = vmatprep.mubr.msk.f32.mxu0 %vm5817_vm0, %v5816_v17 }
0x11d1   :  { %5508 = vmatprep.subr.mxu0 %v5816_v17 }
0x11d3   :  { %5501 = vmatmul.mubr.msk.f32.vlgmr.msra.gmra.mxu0 %vm399_vm1, %v3412_v4 }
0x11d4   :  { %5509 = vmatpush3.xpose.msk.msra.mxu0 %vm399_vm1, %v3587_v5  ;;  %5510 = vmatprep.mubr.msk.f32.mxu0 %vm5817_vm0, %v5816_v17 }
0x11d5   :  { %5518 = vmatprep.subr.mxu0 %v5816_v17 }
0x11d7   :  { %5511 = vmatmul.mubr.msk.f32.vlgmr.msra.gmra.mxu0 %vm399_vm1, %v3585_v50 }
0x11d8   :  { %5519 = vmatpush3.xpose.msk.msra.mxu0 %vm399_vm1, %v3759_v7  ;;  %5520 = vmatprep.mubr.msk.f32.mxu0 %vm5817_vm0, %v5816_v17 }
0x11db   :  { %5521 = vmatmul.mubr.msk.f32.vlgmr.msra.gmra.mxu0 %vm399_vm1, %v3757_v63 }
0x1287   :  { %v6354_v10 = vpop.f32.mrf.mxu0 }
0x1289   :  { %v5477_v11 = vpop.f32.mrf.mxu0 }
0x128b   :  { %v3141_v13 = vpop.f32.mrf.mxu0 }
0x128c   :  { %v3145_v14 = vmul.f32 0.17677669, %v3141_v13 }
0x128d   :  { %v5482_v15 = vpop.f32.mrf.mxu0 }
0x128e   :  { %v3146_v16 = vadd.f32 %v3145_v14, %v6266_v6 }
0x128f   :  { %v3314_v33 = vpop.f32.mrf.mxu0 }
0x1290   :  { %v3318_v21 = vmul.f32 0.17677669, %v3314_v33  ;;  %v3147_v22 = vsel %vm484_vm2, %v3146_v16, -inf }
0x1291   :  { %3148 = vmax.xlane.f32.xlu0 %v3147_v22  ;;  %v5492_v24 = vpop.f32.mrf.mxu0 }
0x1292   :  { %v3325_v25 = vadd.f32 %v3323_v20, %v3318_v21 }
0x1293   :  { %v3485_v18 = vpop.f32.mrf.mxu0 }
0x1294   :  { %v3489_v36 = vmul.f32 0.17677669, %v3485_v18  ;;  %v3326_v26 = vsel %vm484_vm2, %v3325_v25, -inf }
0x1295   :  { %3327 = vmax.xlane.f32.xlu1 %v3326_v26  ;;  %v5502_v28 = vpop.f32.mrf.mxu0 }
0x1296   :  { %v3490_v27 = vadd.f32 %v3489_v36, %v3323_v20 }
0x1297   :  { %v3658_v52 = vpop.f32.mrf.mxu0 }
0x1298   :  { %v3662_v30 = vmul.f32 0.17677669, %v3658_v52  ;;  %v3491_v6 = vsel %vm484_vm2, %v3490_v27, -inf  ;;  %v5007_v52 = vld [vmem:[%s6540_s7 + $0x70] sm:$0xff]  }
0x1299   :  { %3492 = vmax.xlane.f32.xlu0 %v3491_v6  ;;  %v5512_v31 = vpop.f32.mrf.mxu0 }
0x129a   :  { %v3663_v34 = vadd.f32 %v3662_v30, %v3323_v20 }
0x129b   :  { %v3830_v35 = vpop.f32.mrf.mxu0 }
0x129c   :  { %v3834_v19 = vmul.f32 0.17677669, %v3830_v35  ;;  %v3664_v38 = vsel %vm484_vm2, %v3663_v34, -inf }
0x129d   :  { %3665 = vmax.xlane.f32.xlu0 %v3664_v38  ;;  %v5522_v40 = vpop.f32.mrf.mxu0  ;;  %v4877_v38 = vunpack.c.l.bf16 %v5007_v52 }
0x129e   :  { %v3835_v42 = vadd.f32 %v3834_v19, %v3323_v20  ;;  %v5006_v19 = vld [vmem:[%s6540_s7 + $0x68] sm:$0xff]  }
0x12a0   :  { %v3836_v43 = vsel %vm484_vm2, %v3835_v42, -inf }
0x12a1   :  { %3837 = vmax.xlane.f32.xlu0 %v3836_v43 }
0x131a   :  { %v3149_v44 = vpop.xlane.xlu0 %3148 }
0x131b   :  { %v3150_v46 = vsub.f32 %v3146_v16, %v3149_v44  ;;  %v5005_v44 = vld [vmem:[%s6540_s7 + $0x60] sm:$0xff]  }
0x131d   :  { %v3151_v47 = vmul.f32 1.442695, %v3150_v46  ;;  %v4873_v46 = vunpack.c.l.bf16 %v5006_v19 }
0x131e   :  { %v3328_v48 = vpop.xlane.xlu1 %3327 }
0x131f   :  { %5683 = vpow2.f32 %v3151_v47  ;;  %v3329_v49 = vsub.f32 %v3325_v25, %v3328_v48  ;;  %v4870_v48 = vunpack.c.h.bf16 %v5005_v44 }
0x1321   :  { %v3330_v53 = vmul.f32 1.442695, %v3329_v49 }
0x1322   :  { %v3493_v54 = vpop.xlane.xlu0 %3492 }
0x1323   :  { %5685 = vpow2.f32 %v3330_v53  ;;  %v3494_v29 = vsub.f32 %v3490_v27, %v3493_v54  ;;  %v5008_v27 = vld [vmem:[%s6540_s7 + $0x78] sm:$0xff]   ;;  %v4869_v54 = vunpack.c.l.bf16 %v5005_v44 }
0x1324   :  { %v4882_v30 = vunpack.c.h.bf16 %v5008_v27  ;;  %v4881_v6 = vunpack.c.l.bf16 %v5008_v27  ;;  %v5004_v53 = vld [vmem:[%s6540_s7 + $0x58] sm:$0xff]  }
0x1325   :  { %v3495_v56 = vmul.f32 1.442695, %v3494_v29 }
0x1326   :  { %v3666_v57 = vpop.xlane.xlu0 %3665  ;;  %5528 = vmatprep.subr.mxu0 %v4882_v30 }
0x1327   :  { %5687 = vpow2.f32 %v3495_v56  ;;  %v3667_v58 = vsub.f32 %v3663_v34, %v3666_v57  ;;  %v4878_v34 = vunpack.c.h.bf16 %v5007_v52  ;;  %5529 = vmatpush3.msra.mxu0 %v4882_v30  ;;  %v4866_v56 = vunpack.c.h.bf16 %v5004_v53  ;;  %v5003_v57 = vld [vmem:[%s6540_s7 + $0x50] sm:$0xff]  }
0x1328   :  { %5530 = vmatprep.subr.mxu0 %v4881_v6 }
0x1329   :  { %v3668_v59 = vmul.f32 1.442695, %v3667_v58  ;;  %5531 = vmatpush3.msra.mxu0 %v4881_v6  ;;  %v4865_v58 = vunpack.c.l.bf16 %v5004_v53  ;;  %v4098_v53 = vld [vmem:[#allocation6 + $0xb8] sm:$0xff] }
0x132a   :  { %v3838_v4 = vpop.xlane.xlu0 %3837  ;;  %5532 = vmatprep.subr.mxu0 %v4878_v34 }
0x132b   :  { %5689 = vpow2.f32 %v3668_v59  ;;  %v3839_v5 = vsub.f32 %v3835_v42, %v3838_v4  ;;  %v4874_v42 = vunpack.c.h.bf16 %v5006_v19  ;;  %5533 = vmatpush3.msra.mxu0 %v4878_v34  ;;  %v4862_v59 = vunpack.c.h.bf16 %v5003_v57  ;;  %v4102_v34 = vld [vmem:[#allocation6 + $0xd8] sm:$0xff] }
0x132c   :  { %v5684_v60 = vpop.eup %5683  ;;  %5534 = vmatprep.subr.mxu0 %v4877_v38  ;;  %v4129_v19 = vunpack.c.l.bf16 %v4102_v34 }
0x132d   :  { %v3153_v61 = vsel %vm484_vm2, %v5684_v60, 0.0  ;;  %v3840_v50 = vmul.f32 1.442695, %v3839_v5  ;;  %5535 = vmatpush3.msra.mxu0 %v4877_v38  ;;  %v4101_v38 = vld [vmem:[#allocation6 + $0xd0] sm:$0xff] }
0x132e   :  { %3154 = vadd.xlane.f32.xlu1 %v3153_v61  ;;  %5536 = vmatprep.subr.mxu0 %v4874_v42  ;;  %v5002_v61 = vld [vmem:[%s6540_s7 + $0x48] sm:$0xff]  }
0x132f   :  { %5691 = vpow2.f32 %v3840_v50  ;;  %5537 = vmatpush3.msra.mxu0 %v4874_v42  ;;  %v4127_v42 = vunpack.c.l.bf16 %v4101_v38 }
0x1330   :  { %v5686_v62 = vpop.eup %5685  ;;  %5538 = vmatprep.subr.mxu0 %v4873_v46 }
0x1331   :  { %v3332_v1 = vsel %vm484_vm2, %v5686_v62, 0.0  ;;  %5539 = vmatpush3.msra.mxu0 %v4873_v46 }
0x1332   :  { %3333 = vadd.xlane.f32.xlu0 %v3332_v1  ;;  %5540 = vmatprep.subr.mxu0 %v4870_v48  ;;  %v4857_v1 = vunpack.c.l.bf16 %v5002_v61 }
0x1333   :  { %5541 = vmatpush3.msra.mxu0 %v4870_v48 }
0x1334   :  { %v5688_v2 = vpop.eup %5687  ;;  %5542 = vmatprep.subr.mxu0 %v4869_v54 }
0x1335   :  { %v3497_v41 = vsel %vm484_vm2, %v5688_v2, 0.0  ;;  %5543 = vmatpush3.msra.mxu0 %v4869_v54  ;;  %v4122_v54 = vunpack.c.h.bf16 %v4098_v53 }
0x1336   :  { %3498 = vadd.xlane.f32.xlu1 %v3497_v41  ;;  %5544 = vmatprep.subr.mxu0 %v4866_v56 }
0x1337   :  { %5545 = vmatpush3.msra.mxu0 %v4866_v56  ;;  %v4097_v56 = vld [vmem:[#allocation6 + $0xb0] sm:$0xff] }
0x1338   :  { %v5690_v3 = vpop.eup %5689  ;;  %5546 = vmatprep.subr.mxu0 %v4865_v58 }
0x1339   :  { %v3670_v32 = vsel %vm484_vm2, %v5690_v3, 0.0  ;;  %5547 = vmatpush3.msra.mxu0 %v4865_v58  ;;  %v4095_v58 = vld [vmem:[#allocation6 + $0xa0] sm:$0xff] }
0x133a   :  { %3671 = vadd.xlane.f32.xlu0 %v3670_v32  ;;  %5548 = vmatprep.subr.mxu0 %v4862_v59 }
0x133b   :  { %5549 = vmatpush3.msra.mxu0 %v4862_v59  ;;  %v4119_v59 = vunpack.c.l.bf16 %v4097_v56 }
0x133c   :  { %v5692_v7 = vpop.eup %5691 }
0x133d   :  { %v3842_v63 = vsel %vm484_vm2, %v5692_v7, 0.0 }
0x1347   :  { %3503 = vrot.lane.b32.xlu1 %v6245_v0, %s5818_s29 }
0x134b   :  { %3675 = vrot.lane.b32.xlu1 %v6245_v0, %s5814_s30 }
0x1350   :  { %3158 = vrot.lane.b32.xlu0 %v6252_v23, %s5819_s0 }
0x1354   :  { %2891 = vrot.lane.b32.xlu0 %v6302_v45, %s5819_s0 }
0x136f   :  { %3843 = vadd.xlane.f32.xlu1 %v3842_v63 }
0x1380   :  { %3847 = vrot.lane.b32.xlu1 %v6245_v0, %s5819_s0 }
0x1384   :  { %3063 = vrot.lane.b32.xlu1 %v6354_v10, %s5814_s30 }
0x13b7   :  { %v3155_v8 = vpop.xlane.xlu1 %3154 }
0x13b8   :  { %5693 = vrcp.f32 %v3155_v8 }
0x13bb   :  { %v3334_v23 = vpop.xlane.xlu0 %3333 }
0x13bc   :  { %5695 = vrcp.f32 %v3334_v23 }
0x13bf   :  { %v3499_v9 = vpop.xlane.xlu1 %3498 }
0x13c0   :  { %5697 = vrcp.f32 %v3499_v9  ;;  %v4741_v9 = vld [vmem:[%s6541_s8 + $0x1] ss:$0 sm:$0xff] }
0x13c3   :  { %v3672_v45 = vpop.xlane.xlu0 %3671  ;;  %v3504_v15 = vpop.permute.xlu1 %3503 }
0x13c4   :  { %5699 = vrcp.f32 %v3672_v45 }
0x13c5   :  { %v5694_v11 = vpop.eup %5693 }
0x13c6   :  { %v3157_v12 = vmul.f32 %v5694_v11, %v5684_v60  ;;  %v4861_v60 = vunpack.c.l.bf16 %v5003_v57  ;;  %v4096_v57 = vld [vmem:[#allocation6 + $0xa8] sm:$0xff] }
0x13c7   :  { %v3159_v13 = vpop.permute.xlu0 %3158  ;;  %v3676_v21 = vpop.permute.xlu1 %3675 }
0x13c8   :  { %5484 = vmatpush3.msra.mxu1 %v3159_v13  ;;  %5550 = vmatprep.subr.mxu0 %v4861_v60 }
0x13c9   :  { %v5696_v14 = vpop.eup %5695  ;;  %5486 = vmatmul.mubr.msk.f32.vlgmr.msra.gmra.mxu1 %vm484_vm2, %v3157_v12  ;;  %5493 = vmatprep.subr.mxu1 %v5816_v17 }
0x13ca   :  { %5494 = vmatpush3.msra.mxu1 %v6245_v0  ;;  %5495 = vmatprep.mubr.msk.f32.mxu1 %vm5817_vm0, %v5816_v17  ;;  %v3336_v10 = vmul.f32 %v5696_v14, %v5686_v62  ;;  %v4858_v62 = vunpack.c.h.bf16 %v5002_v61  ;;  %v4118_v61 = vunpack.c.h.bf16 %v4096_v57 }
0x13cb   :  { %v2892_v16 = vpop.permute.xlu0 %2891  ;;  %5503 = vmatprep.subr.mxu1 %v5816_v17  ;;  %5551 = vmatpush3.msra.mxu0 %v4861_v60  ;;  %v4120_v60 = vunpack.c.h.bf16 %v4097_v56  ;;  %v5019_v56 = vld [vmem:[#allocation8 + $0xd8] sm:$0xff]  }
0x13cc   :  { %2894 = vst.msk [vmem:[#allocation2] sm:$0xff] %vm742_vm3, %v2892_v16  ;;  %5552 = vmatprep.subr.mxu0 %v4858_v62  ;;  %v4105_v16 = vld [vmem:[#allocation6 + $0xf0] sm:$0xff] }
0x13cd   :  { %v5698_v20 = vpop.eup %5697  ;;  %5496 = vmatmul.mubr.msk.f32.vlgmr.msra.gmra.mxu1 %vm484_vm2, %v3336_v10  ;;  %5553 = vmatpush3.msra.mxu0 %v4858_v62  ;;  %v4117_v62 = vunpack.c.l.bf16 %v4096_v57  ;;  %v4930_v57 = vunpack.c.h.bf16 %v5019_v56 }
0x13ce   :  { %5504 = vmatpush3.msra.mxu1 %v3504_v15  ;;  %5505 = vmatprep.mubr.msk.f32.mxu1 %vm5817_vm0, %v5816_v17  ;;  %v3501_v33 = vmul.f32 %v5698_v20, %v5688_v2  ;;  %v5001_v2 = vld [vmem:[%s6540_s7 + $0x40] sm:$0xff]   ;;  %v4106_v15 = vld [vmem:[#allocation6 + $0xf8] sm:$0xff]  ;;  %v4104_v20 = vld [vmem:[#allocation6 + $0xe8] sm:$0xff] }
0x13cf   :  { %5513 = vmatprep.subr.mxu1 %v5816_v17  ;;  %v4854_v41 = vunpack.c.h.bf16 %v5001_v2  ;;  %5554 = vmatprep.subr.mxu0 %v4857_v1 }
0x13d0   :  { %5555 = vmatpush3.msra.mxu0 %v4857_v1  ;;  %v4094_v1 = vld [vmem:[#allocation6 + $0x98] sm:$0xff] }
0x13d1   :  { %v5700_v0 = vpop.eup %5699  ;;  %5506 = vmatmul.mubr.msk.f32.vlgmr.msra.gmra.mxu1 %vm484_vm2, %v3501_v33  ;;  %5556 = vmatprep.subr.mxu0 %v4854_v41  ;;  %v4137_v33 = vunpack.c.l.bf16 %v4106_v15 }
0x13d2   :  { %5514 = vmatpush3.msra.mxu1 %v3676_v21  ;;  %5515 = vmatprep.mubr.msk.f32.mxu1 %vm5817_vm0, %v5816_v17  ;;  %v3674_v22 = vmul.f32 %v5700_v0, %v5690_v3  ;;  %v4853_v3 = vunpack.c.l.bf16 %v5001_v2  ;;  %v4138_v0 = vunpack.c.h.bf16 %v4106_v15  ;;  %v4136_v21 = vunpack.c.h.bf16 %v4105_v16 }
0x13d3   :  { %5523 = vmatprep.subr.mxu1 %v5816_v17  ;;  %5557 = vmatpush3.msra.mxu0 %v4854_v41  ;;  %v4116_v2 = vunpack.c.h.bf16 %v4095_v58  ;;  %v4115_v41 = vunpack.c.l.bf16 %v4095_v58  ;;  %v5011_v58 = vld [vmem:[#allocation8 + $0x98] sm:$0xff]  }
0x13d4   :  { %5558 = vmatprep.subr.mxu0 %v4853_v3 }
0x13d5   :  { %5516 = vmatmul.mubr.msk.f32.vlgmr.msra.gmra.mxu1 %vm484_vm2, %v3674_v22  ;;  %5559 = vmatpush3.msra.mxu0 %v4853_v3  ;;  %v4135_v22 = vunpack.c.l.bf16 %v4105_v16  ;;  %v4093_v3 = vld [vmem:[#allocation6 + $0x90] sm:$0xff] }
0x13d6   :  { %5525 = vmatprep.mubr.msk.f32.mxu1 %vm5817_vm0, %v5816_v17 }
0x13f8   :  { %v3844_v24 = vpop.xlane.xlu1 %3843 }
0x13f9   :  { %5701 = vrcp.f32 %v3844_v24  ;;  %v4103_v24 = vld [vmem:[#allocation6 + $0xe0] sm:$0xff] }
0x13fc   :  { %v3848_v25 = vpop.permute.xlu1 %3847 }
0x13fd   :  { %5524 = vmatpush3.msra.mxu1 %v3848_v25  ;;  %v4134_v25 = vunpack.c.h.bf16 %v4104_v20 }
0x13fe   :  { %4152 = vmatprep.subr.mxu1 %v4138_v0  ;;  %v4745_v0 = vld [vmem:[%s6543_s10 + $0x1] ss:$0 sm:$0xff]  ;;  %s5820_s10 = smov [#allocation9]  }
0x1400   :  { %v3064_v18 = vpop.permute.xlu1 %3063 }
0x1401   :  { %3066 = vst.msk [vmem:[#allocation2] sm:$0xff] %vm915_vm4, %v3064_v18  ;;  %v4133_v18 = vunpack.c.l.bf16 %v4104_v20  ;;  %v4744_v20 = vld [vmem:[%s6542_s9 + $0x1] ss:$0 sm:$0xff] }
0x1406   :  { %v5702_v36 = vpop.eup %5701 }
0x1407   :  { %v3846_v26 = vmul.f32 %v5702_v36, %v5692_v7  ;;  %v4132_v36 = vunpack.c.h.bf16 %v4103_v24 }
0x1409   :  { %5526 = vmatmul.mubr.msk.f32.vlgmr.msra.gmra.mxu1 %vm484_vm2, %v3846_v26 }
0x140a   :  { %4216 = vmatprep.mubr.f32.mxu1 %v5816_v17  ;;  %4153 = vmatpush1.msra.mxu1 %v4137_v33 }
0x140b   :  { %4154 = vmatprep.subr.mxu1 %v4136_v21 }
0x140c   :  { %4155 = vmatpush1.msra.mxu1 %v4135_v22 }
0x140d   :  { %4156 = vmatprep.subr.mxu1 %v4134_v25 }
0x140e   :  { %4157 = vmatpush1.msra.mxu1 %v4133_v18 }
0x140f   :  { %4158 = vmatprep.subr.mxu1 %v4132_v36 }
0x1489   :  { %v3230_v28 = vpop.f32.mrf.mxu1 }
0x148a   :  { %3235 = vrot.lane.b32.xlu1 %v3230_v28, %s5818_s29 }
0x148b   :  { %v5487_v31 = vpop.f32.mrf.mxu1 }
0x148d   :  { %v3406_v35 = vpop.f32.mrf.mxu1 }
0x148e   :  { %3410 = vst.msk [vmem:[#allocation2 + $0x8] sm:$0xff] %vm399_vm1, %v3406_v35  ;;  %v4130_v35 = vunpack.c.h.bf16 %v4102_v34 }
0x148f   :  { %v5497_v40 = vpop.f32.mrf.mxu1 }
0x1490   :  { %v4128_v40 = vunpack.c.h.bf16 %v4101_v38  ;;  %v5021_v38 = vld [vmem:[#allocation8 + $0xe8] sm:$0xff]  }
0x1491   :  { %v3575_v43 = vpop.f32.mrf.mxu1 }
0x1492   :  { %3580 = vrot.lane.b32.xlu0 %v3575_v43, %s5819_s0  ;;  %v4100_v43 = vld [vmem:[#allocation6 + $0xc8] sm:$0xff] }
0x1493   :  { %v5507_v47 = vpop.f32.mrf.mxu1  ;;  %v4126_v44 = vunpack.c.h.bf16 %v4100_v43  ;;  %v4125_v46 = vunpack.c.l.bf16 %v4100_v43 }
0x1494   :  { %v4099_v47 = vld [vmem:[#allocation6 + $0xc0] sm:$0xff] }
0x1495   :  { %v3747_v49 = vpop.f32.mrf.mxu1  ;;  %v4124_v48 = vunpack.c.h.bf16 %v4099_v47 }
0x1496   :  { %3752 = vrot.lane.b32.xlu0 %v3747_v49, %s5814_s30  ;;  %v4123_v49 = vunpack.c.l.bf16 %v4099_v47  ;;  %v5020_v47 = vld [vmem:[#allocation8 + $0xe0] sm:$0xff]  }
0x1497   :  { %v5517_v29 = vpop.f32.mrf.mxu1 }
0x1498   :  { %v4121_v29 = vunpack.c.l.bf16 %v4098_v53 }
0x14c9   :  { %v3919_v32 = vpop.f32.mrf.mxu1 }
0x14ca   :  { %3924 = vrot.lane.b32.xlu1 %v3919_v32, %s5818_s29  ;;  %v4114_v32 = vunpack.c.h.bf16 %v4094_v1 }
0x14cb   :  { %v5527_v4 = vpop.f32.mrf.mxu1 }
0x14cc   :  { %v4113_v4 = vunpack.c.l.bf16 %v4094_v1  ;;  %v4897_v1 = vunpack.c.l.bf16 %v5011_v58 }
0x14fc   :  { %v3236_v5 = vpop.permute.xlu1 %3235 }
0x14fd   :  { %3238 = vst.msk [vmem:[#allocation2] sm:$0xff] %vm1088_vm5, %v3236_v5  ;;  %v4092_v5 = vld [vmem:[#allocation6 + $0x88] sm:$0xff] }
0x1504   :  { %v3581_v50 = vpop.permute.xlu0 %3580  ;;  %v3928_v7 = vld [vmem:[#allocation2] sm:$0xff] }
0x1505   :  { %3583 = vst.msk [vmem:[#allocation2 + $0x8] sm:$0xff] %vm742_vm3, %v3581_v50  ;;  %5560 = vmatprep.mubr.f32.mxu0 %v3928_v7  ;;  %v4112_v50 = vunpack.c.h.bf16 %v4093_v3  ;;  %v4111_v7 = vunpack.c.l.bf16 %v4093_v3  ;;  %v5017_v3 = vld [vmem:[#allocation8 + $0xc8] sm:$0xff]  }
0x1508   :  { %v3753_v63 = vpop.permute.xlu0 %3752 }
0x1509   :  { %3755 = vst.msk [vmem:[#allocation2 + $0x8] sm:$0xff] %vm915_vm4, %v3753_v63  ;;  %v4091_v63 = vld [vmem:[#allocation6 + $0x80] sm:$0xff] }
0x153c   :  { %v3925_v8 = vpop.permute.xlu1 %3924 }
0x153d   :  { %3927 = vst.msk [vmem:[#allocation2 + $0x8] sm:$0xff] %vm1088_vm5, %v3925_v8  ;;  %v4110_v8 = vunpack.c.h.bf16 %v4092_v5 }
0x1544   :  { %v3929_v23 = vld [vmem:[#allocation2 + $0x8] sm:$0xff] }
0x1545   :  { %5561 = vmatmul.mubr.f32.vlgmr.msra.gmra.mxu0 %v3929_v23  ;;  %v4109_v23 = vunpack.c.l.bf16 %v4092_v5 }
0x1605   :  { %v5562_v45 = vpop.f32.mrf.mxu0 }
0x1606   :  { %v4043_v11 = vadd.f32 %v5562_v45, %v4741_v9  ;;  %v4107_v45 = vunpack.c.l.bf16 %v4091_v63 }
0x1607   :  { %v4037_v12 = vpop.f32.mrf.mxu0 }
0x1608   :  { %v4038_v13 = vadd.f32 %v4741_v9, %v4037_v12  ;;  %v4047_v14 = vadd.f32 %v4043_v11, %v6223_v55  ;;  %v4131_v55 = vunpack.c.l.bf16 %v4103_v24  ;;  %v4108_v9 = vunpack.c.h.bf16 %v4091_v63  ;;  %v5016_v63 = vld [vmem:[#allocation8 + $0xc0] sm:$0xff]  }
0x160a   :  { %4054 = vadd.xlane.f32.xlu1 %v4047_v14  ;;  %v4046_v10 = vadd.f32 %v4038_v13, %v6217_v51  ;;  %4159 = vmatpush1.msra.mxu1 %v4131_v55  ;;  %v5023_v55 = vld [vmem:[#allocation8 + $0xf8] sm:$0xff]  }
0x160b   :  { %4160 = vmatprep.subr.mxu1 %v4130_v35 }
0x160c   :  { %4052 = vadd.xlane.f32.xlu0 %v4046_v10  ;;  %4161 = vmatpush1.msra.mxu1 %v4129_v19 }
0x160d   :  { %4162 = vmatprep.subr.mxu1 %v4128_v40  ;;  %v4938_v40 = vunpack.c.h.bf16 %v5021_v38 }
0x160e   :  { %4163 = vmatpush1.msra.mxu1 %v4127_v42  ;;  %v5013_v42 = vld [vmem:[#allocation8 + $0xa8] sm:$0xff]  }
0x160f   :  { %4164 = vmatprep.subr.mxu1 %v4126_v44  ;;  %v4906_v43 = vunpack.c.h.bf16 %v5013_v42  ;;  %v4937_v44 = vunpack.c.l.bf16 %v5021_v38 }
0x1610   :  { %4165 = vmatpush1.msra.mxu1 %v4125_v46  ;;  %v4905_v46 = vunpack.c.l.bf16 %v5013_v42 }
0x1611   :  { %4166 = vmatprep.subr.mxu1 %v4124_v48  ;;  %v4934_v48 = vunpack.c.h.bf16 %v5020_v47 }
0x1612   :  { %4167 = vmatpush1.msra.mxu1 %v4123_v49  ;;  %v5012_v49 = vld [vmem:[#allocation8 + $0xa0] sm:$0xff]  }
0x1613   :  { %4168 = vmatprep.subr.mxu1 %v4122_v54  ;;  %v4902_v53 = vunpack.c.h.bf16 %v5012_v49  ;;  %v4933_v54 = vunpack.c.l.bf16 %v5020_v47 }
0x1614   :  { %4169 = vmatpush1.msra.mxu1 %v4121_v29  ;;  %v4901_v29 = vunpack.c.l.bf16 %v5012_v49 }
0x1615   :  { %4170 = vmatprep.subr.mxu1 %v4120_v60  ;;  %v5018_v60 = vld [vmem:[#allocation8 + $0xd0] sm:$0xff]  }
0x1616   :  { %4171 = vmatpush1.msra.mxu1 %v4119_v59  ;;  %v4929_v59 = vunpack.c.l.bf16 %v5019_v56 }
0x1617   :  { %4172 = vmatprep.subr.mxu1 %v4118_v61  ;;  %v5010_v61 = vld [vmem:[#allocation8 + $0x90] sm:$0xff]  }
0x1618   :  { %4173 = vmatpush1.msra.mxu1 %v4117_v62  ;;  %v4898_v62 = vunpack.c.h.bf16 %v5011_v58  ;;  %v4893_v5 = vunpack.c.l.bf16 %v5010_v61 }
0x1619   :  { %4174 = vmatprep.subr.mxu1 %v4116_v2  ;;  %v4926_v2 = vunpack.c.h.bf16 %v5018_v60 }
0x161a   :  { %4175 = vmatpush1.msra.mxu1 %v4115_v41  ;;  %v4894_v41 = vunpack.c.h.bf16 %v5010_v61 }
0x161b   :  { %4176 = vmatprep.subr.mxu1 %v4114_v32  ;;  %v4925_v32 = vunpack.c.l.bf16 %v5018_v60 }
0x161c   :  { %4177 = vmatpush1.msra.mxu1 %v4113_v4  ;;  %v5009_v4 = vld [vmem:[#allocation8 + $0x88] sm:$0xff]  }
0x161d   :  { %4178 = vmatprep.subr.mxu1 %v4112_v50  ;;  %v4922_v50 = vunpack.c.h.bf16 %v5017_v3 }
0x161e   :  { %4179 = vmatpush1.msra.mxu1 %v4111_v7  ;;  %v4890_v7 = vunpack.c.h.bf16 %v5009_v4 }
0x161f   :  { %4180 = vmatprep.subr.mxu1 %v4110_v8  ;;  %v4921_v8 = vunpack.c.l.bf16 %v5017_v3 }
0x1620   :  { %4181 = vmatpush1.msra.mxu1 %v4109_v23  ;;  %v4884_v23 = vld [vmem:[#allocation8 + $0x80] sm:$0xff]  }
0x1621   :  { %4182 = vmatprep.subr.mxu1 %v4108_v9  ;;  %v4889_v9 = vunpack.c.l.bf16 %v5009_v4 }
0x1622   :  { %4183 = vmatpush1.msra.mxu1 %v4107_v45  ;;  %v4918_v45 = vunpack.c.h.bf16 %v5016_v63 }
0x1623   :  { %5563 = vmatprep.subr.mxu1 %v5816_v17 }
0x1693   :  { %v4055_v51 = vpop.xlane.xlu1 %4054 }
0x1694   :  { %v4057_v28 = vmul.f32 0.0078125, %v4055_v51  ;;  %v4946_v51 = vunpack.c.h.bf16 %v5023_v55 }
0x1695   :  { %v4053_v26 = vpop.xlane.xlu0 %4052 }
0x1696   :  { %v4056_v27 = vmul.f32 0.0078125, %v4053_v26  ;;  %v6441_v30 = vsub.f32 %v4047_v14, %v4057_v28  ;;  %v5015_v26 = vld [vmem:[#allocation8 + $0xb8] sm:$0xff]   ;;  %5205 = vmatprep.subr.mxu0 %v4946_v51 }
0x1697   :  { %v4914_v28 = vunpack.c.h.bf16 %v5015_v26 }
0x1698   :  { %v6439_v52 = vsub.f32 %v4046_v10, %v4056_v27  ;;  %v4061_v31 = vmul.f32 %v6441_v30, %v6441_v30  ;;  %v4945_v27 = vunpack.c.l.bf16 %v5023_v55 }
0x1699   :  { %5206 = vmatpush3.msra.mxu0 %v4914_v28 }
0x169a   :  { %v4060_v6 = vmul.f32 %v6439_v52, %v6439_v52  ;;  %5207 = vmatprep.subr.mxu0 %v4945_v27 }
0x169c   :  { %4062 = vadd.xlane.f32.xlu0 %v4060_v6 }
0x16a0   :  { %4064 = vadd.xlane.f32.xlu0 %v4061_v31  ;;  %v5014_v31 = vld [vmem:[#allocation8 + $0xb0] sm:$0xff]  }
0x16a1   :  { %v4910_v34 = vunpack.c.h.bf16 %v5014_v31  ;;  %v4909_v19 = vunpack.c.l.bf16 %v5014_v31 }
0x1725   :  { %v4063_v11 = vpop.xlane.xlu0 %4062 }
0x1726   :  { %v4066_v12 = vmul.f32 0.0078125, %v4063_v11  ;;  %v4886_v11 = vunpack.c.h.bf16 %v4884_v23 }
0x1728   :  { %v4068_v13 = vadd.f32 1e-12, %v4066_v12  ;;  %v4917_v12 = vunpack.c.l.bf16 %v5016_v63 }
0x1729   :  { %v4065_v14 = vpop.xlane.xlu0 %4064 }
0x172a   :  { %5703 = vrsqrt.f32 %v4068_v13  ;;  %v4067_v10 = vmul.f32 0.0078125, %v4065_v14  ;;  %v4885_v13 = vunpack.c.l.bf16 %v4884_v23  ;;  %v4746_v14 = vld [vmem:[%s6545_s12 + $0x2] sm:$0x3] }
0x172c   :  { %v4069_v15 = vadd.f32 1e-12, %v4067_v10  ;;  %v4145_v10 = vrot.slane %v4746_v14, %v5973_v37 }
0x172e   :  { %5705 = vrsqrt.f32 %v4069_v15  ;;  %v4149_v15 = vrot.slane %v4746_v14, %v5979_v39 }
0x1737   :  { %v5704_v16 = vpop.eup %5703 }
0x1738   :  { %v4072_v33 = vmul.f32 %v5704_v16, %v6439_v52  ;;  %v4913_v52 = vunpack.c.l.bf16 %v5015_v26 }
0x173a   :  { %v4080_v21 = vmul.f32 %v4744_v20, %v4072_v33  ;;  %5208 = vmatpush3.msra.mxu0 %v4913_v52 }
0x173b   :  { %v5706_v22 = vpop.eup %5705 }
0x173c   :  { %v6455_v24 = vadd.f32 %v4745_v0, %v4080_v21  ;;  %v4073_v25 = vmul.f32 %v5706_v22, %v6441_v30  ;;  %v5022_v30 = vld [vmem:[#allocation8 + $0xf0] sm:$0xff]  }
0x173d   :  { %v4942_v6 = vunpack.c.h.bf16 %v5022_v30  ;;  %v4941_v35 = vunpack.c.l.bf16 %v5022_v30 }
0x173e   :  { %4217 = vmatmul.mubr.f32.vlgmr.msra.gmra.mxu1 %v6455_v24  ;;  %v4081_v18 = vmul.f32 %v4744_v20, %v4073_v25 }
0x173f   :  { %4222 = vmatprep.mubr.f32.mxu1 %v5816_v17  ;;  %5209 = vmatprep.subr.mxu0 %v4942_v6 }
0x1740   :  { %v6460_v36 = vadd.f32 %v4745_v0, %v4081_v18  ;;  %5210 = vmatpush3.msra.mxu0 %v4910_v34 }
0x1741   :  { %5211 = vmatprep.subr.mxu0 %v4941_v35 }
0x1742   :  { %4223 = vmatmul.mubr.f32.gmra.mxu1 %v6460_v36  ;;  %5212 = vmatpush3.msra.mxu0 %v4909_v19 }
0x1743   :  { %5567 = vmatprep.mubr.msk.f32.mxu1 %vm5817_vm0, %v5816_v17  ;;  %5213 = vmatprep.subr.mxu0 %v4938_v40 }
0x1744   :  { %5214 = vmatpush3.msra.mxu0 %v4906_v43 }
0x1745   :  { %5215 = vmatprep.subr.mxu0 %v4937_v44 }
0x1746   :  { %5216 = vmatpush3.msra.mxu0 %v4905_v46 }
0x1747   :  { %5217 = vmatprep.subr.mxu0 %v4934_v48 }
0x1748   :  { %5218 = vmatpush3.msra.mxu0 %v4902_v53 }
0x1749   :  { %5219 = vmatprep.subr.mxu0 %v4933_v54 }
0x174a   :  { %5220 = vmatpush3.msra.mxu0 %v4901_v29 }
0x174b   :  { %5221 = vmatprep.subr.mxu0 %v4930_v57 }
0x174c   :  { %5222 = vmatpush3.msra.mxu0 %v4898_v62 }
0x174d   :  { %5223 = vmatprep.subr.mxu0 %v4929_v59 }
0x174e   :  { %5224 = vmatpush3.msra.mxu0 %v4897_v1 }
0x174f   :  { %5225 = vmatprep.subr.mxu0 %v4926_v2 }
0x1750   :  { %5226 = vmatpush3.msra.mxu0 %v4894_v41 }
0x1751   :  { %5227 = vmatprep.subr.mxu0 %v4925_v32  ;;  %v4748_v32 = vld [vmem:[%s6547_s14 + $0x1] ss:$0 sm:$0xff] }
0x1752   :  { %5228 = vmatpush3.msra.mxu0 %v4893_v5 }
0x1753   :  { %5229 = vmatprep.subr.mxu0 %v4922_v50 }
0x1754   :  { %5230 = vmatpush3.msra.mxu0 %v4890_v7 }
0x1755   :  { %5231 = vmatprep.subr.mxu0 %v4921_v8 }
0x1756   :  { %5232 = vmatpush3.msra.mxu0 %v4889_v9 }
0x1757   :  { %5233 = vmatprep.subr.mxu0 %v4918_v45 }
0x1758   :  { %5234 = vmatpush3.msra.mxu0 %v4886_v11 }
0x1759   :  { %5235 = vmatprep.subr.mxu0 %v4917_v12 }
0x175a   :  { %5236 = vmatpush3.msra.mxu0 %v4885_v13 }
0x17fe   :  { %v4218_v16 = vpop.f32.mrf.mxu1 }
0x17ff   :  { %v4219_v20 = vadd.f32 %v4218_v16, %v4145_v10 }
0x1800   :  { %v4220_v33 = vpop.f32.mrf.mxu1 }
0x1801   :  { %v4229_v0 = vmul.f32 %v4219_v20, %v4219_v20  ;;  %v4221_v21 = vadd.f32 %v4220_v33, %v4149_v15  ;;  %v4457_v33 = vld [vmem:[%s6562_s3] sm:$0x3] }
0x1802   :  { %v4224_v22 = vpop.f32.mrf.mxu1 }
0x1803   :  { %v4233_v25 = vmul.f32 %v4229_v0, %v4219_v20  ;;  %v4230_v18 = vmul.f32 %v4221_v21, %v4221_v21  ;;  %v4225_v55 = vadd.f32 %v4224_v22, %v4145_v10 }
0x1804   :  { %v4226_v51 = vpop.f32.mrf.mxu1 }
0x1805   :  { %v4237_v26 = vmul.f32 0.044715, %v4233_v25  ;;  %v4234_v28 = vmul.f32 %v4230_v18, %v4221_v21  ;;  %v4231_v27 = vmul.f32 %v4225_v55, %v4225_v55  ;;  %v4227_v52 = vadd.f32 %v4226_v51, %v4149_v15 }
0x1807   :  { %v4241_v30 = vadd.f32 %v4237_v26, %v4219_v20  ;;  %v4238_v6 = vmul.f32 0.044715, %v4234_v28  ;;  %v4235_v31 = vmul.f32 %v4231_v27, %v4225_v55  ;;  %v4232_v37 = vmul.f32 %v4227_v52, %v4227_v52  ;;  %v4751_v28 = vld [vmem:[%s6548_s15 + $0x1] ss:$0 sm:$0xff] }
0x1809   :  { %v4245_v34 = vmul.f32 0.7978846, %v4241_v30  ;;  %v4242_v39 = vadd.f32 %v4238_v6, %v4221_v21  ;;  %v4239_v35 = vmul.f32 0.044715, %v4235_v31  ;;  %v4236_v19 = vmul.f32 %v4232_v37, %v4227_v52  ;;  %v4752_v6 = vld [vmem:[%s6549_s16 + $0x1] ss:$0 sm:$0xff] }
0x180a   :  { %v5030_v31 = vld [vmem:[%s6550_s17 + $0x38] sm:$0xff]  }
0x180b   :  { %5707 = vtanh.f32 %v4245_v34  ;;  %v4246_v38 = vmul.f32 0.7978846, %v4242_v39  ;;  %v4243_v40 = vadd.f32 %v4239_v35, %v4225_v55  ;;  %v4240_v42 = vmul.f32 0.044715, %v4236_v19  ;;  %v5029_v35 = vld [vmem:[%s6550_s17 + $0x30] sm:$0xff]  }
0x180c   :  { %v4978_v39 = vunpack.c.h.bf16 %v5030_v31  ;;  %v4977_v19 = vunpack.c.l.bf16 %v5030_v31 }
0x180d   :  { %5709 = vtanh.f32 %v4246_v38  ;;  %v4247_v43 = vmul.f32 0.7978846, %v4243_v40  ;;  %v4244_v44 = vadd.f32 %v4240_v42, %v4227_v52  ;;  %v4974_v38 = vunpack.c.h.bf16 %v5029_v35  ;;  %v5028_v40 = vld [vmem:[%s6550_s17 + $0x28] sm:$0xff]  }
0x180e   :  { %v4973_v42 = vunpack.c.l.bf16 %v5029_v35 }
0x180f   :  { %5711 = vtanh.f32 %v4247_v43  ;;  %v4248_v46 = vmul.f32 0.7978846, %v4244_v44  ;;  %v4970_v43 = vunpack.c.h.bf16 %v5028_v40  ;;  %v5027_v44 = vld [vmem:[%s6550_s17 + $0x20] sm:$0xff]  }
0x1811   :  { %5713 = vtanh.f32 %v4248_v46  ;;  %v4969_v46 = vunpack.c.l.bf16 %v5028_v40 }
0x1818   :  { %v5708_v47 = vpop.eup %5707 }
0x1819   :  { %v4253_v48 = vadd.f32 1.0, %v5708_v47  ;;  %v4966_v47 = vunpack.c.h.bf16 %v5027_v44 }
0x181a   :  { %v5710_v49 = vpop.eup %5709 }
0x181b   :  { %v4254_v53 = vadd.f32 1.0, %v5710_v49  ;;  %v4257_v29 = vmul.f32 0.5, %v4253_v48  ;;  %v5026_v48 = vld [vmem:[%s6550_s17 + $0x18] sm:$0xff]   ;;  %v4965_v49 = vunpack.c.l.bf16 %v5027_v44 }
0x181c   :  { %v5712_v54 = vpop.eup %5711 }
0x181d   :  { %v4258_v56 = vmul.f32 0.5, %v4254_v53  ;;  %v4255_v57 = vadd.f32 1.0, %v5712_v54  ;;  %v4261_v61 = vmul.f32 %v4257_v29, %v4219_v20  ;;  %v4962_v53 = vunpack.c.h.bf16 %v5026_v48  ;;  %v5025_v54 = vld [vmem:[%s6550_s17 + $0x10] sm:$0xff]  }
0x181e   :  { %v5714_v58 = vpop.eup %5713  ;;  %v4961_v29 = vunpack.c.l.bf16 %v5026_v48 }
0x181f   :  { %v4262_v59 = vmul.f32 %v4258_v56, %v4221_v21  ;;  %v4256_v60 = vadd.f32 1.0, %v5714_v58  ;;  %v4259_v62 = vmul.f32 0.5, %v4255_v57  ;;  %v4958_v56 = vunpack.c.h.bf16 %v5025_v54  ;;  %v5024_v57 = vld [vmem:[%s6550_s17 + $0x8] sm:$0xff]  }
0x1820   :  { %v4957_v58 = vunpack.c.l.bf16 %v5025_v54 }
0x1821   :  { %4402 = vmatprep.mubr.f32.mxu0 %v4262_v59  ;;  %v4260_v1 = vmul.f32 0.5, %v4256_v60  ;;  %v4263_v41 = vmul.f32 %v4259_v62, %v4225_v55  ;;  %v4954_v59 = vunpack.c.h.bf16 %v5024_v57  ;;  %v4953_v60 = vunpack.c.l.bf16 %v5024_v57 }
0x1822   :  { %4403 = vmatmul.mubr.f32.vlgmr.msra.gmra.mxu0 %v4261_v61  ;;  %v4948_v61 = vld [vmem:[%s6550_s17] sm:$0xff]   ;;  %s4655_s17 = sshll.u32 %s5820_s10, 4  ;;  %s4656_s17 = int_to_ptr.vmem [resolvable:$true] %s4655_s17 }
0x1823   :  { %v4264_v2 = vmul.f32 %v4260_v1, %v4227_v52  ;;  %v4950_v62 = vunpack.c.h.bf16 %v4948_v61  ;;  %v4949_v1 = vunpack.c.l.bf16 %v4948_v61  ;;  %s5781_s12 = scalar_lea.vmem %s4656_s17, 32  ;;  %p5786_p2 = scmp.lt.s32.totalorder %s4656_s17, %s4656_s17 }
0x1824   :  { %p5782_p1 = scmp.ne.s32.totalorder %s4656_s17, %s5781_s12  ;;  %p5787_p3 = scmp.lt.s32.totalorder %s5781_s12, %s5781_s12 }
0x1825   :  { %4407 = vmatprep.mubr.f32.mxu0 %v4264_v2 }
0x1826   :  { %4408 = vmatmul.mubr.f32.gmra.mxu0 %v4263_v41  ;;  %p5788_p4 = por %p5787_p3, %p5786_p2 }
0x1828   :  { %p5789_p5 = pnand %p5788_p4, %p5782_p1 }
0x18e2   :  { %v5237_v3 = vpop.f32.mrf.mxu0 }
0x18e4   :  { %v5238_v4 = vpop.f32.mrf.mxu0 }
0x18e5   :  { %v5239_v5 = vadd.f32 %v5238_v4, %v5237_v3 }
0x18e6   :  { %v5240_v50 = vpop.f32.mrf.mxu0 }
0x18e7   :  { %v4405_v7 = vadd.f32 %v5239_v5, %v4748_v32 }
0x18e8   :  { %v5241_v63 = vpop.f32.mrf.mxu0 }
0x18e9   :  { %v5242_v8 = vadd.f32 %v5241_v63, %v5240_v50  ;;  %v4413_v23 = vadd.f32 %v4405_v7, %v6455_v24  ;;  %v4533_v24 = vsel %vm4532_vm6, %v4457_v33, 0.0  ;;  %v4754_v50 = vld [vmem:[%s6551_s18] ss:$0 sm:$0xff] }
0x18eb   :  { %v4410_v9 = vadd.f32 %v5242_v8, %v4748_v32  ;;  %4419 = vadd.xlane.f32.xlu1 %v4413_v23 }
0x18ed   :  { %v4414_v45 = vadd.f32 %v4410_v9, %v6460_v36 }
0x18ef   :  { %4421 = vadd.xlane.f32.xlu0 %v4414_v45 }
0x1974   :  { %v4420_v11 = vpop.xlane.xlu1 %4419 }
0x1975   :  { %v4423_v12 = vmul.f32 0.0078125, %v4420_v11 }
0x1977   :  { %v4425_v13 = vsub.f32 %v4413_v23, %v4423_v12 }
0x1978   :  { %v4422_v14 = vpop.xlane.xlu0 %4421 }
0x1979   :  { %v4424_v10 = vmul.f32 0.0078125, %v4422_v14  ;;  %v4427_v15 = vmul.f32 %v4425_v13, %v4425_v13 }
0x197b   :  { %v4426_v16 = vsub.f32 %v4414_v45, %v4424_v10  ;;  %4429 = vadd.xlane.f32.xlu1 %v4427_v15 }
0x197d   :  { %v4428_v20 = vmul.f32 %v4426_v16, %v4426_v16 }
0x197f   :  { %4431 = vadd.xlane.f32.xlu0 %v4428_v20 }
0x1983   :  { %4534 = vadd.xlane.f32.xlu0 %v4533_v24 }
0x1a04   :  { %v4430_v0 = vpop.xlane.xlu1 %4429 }
0x1a05   :  { %v4433_v36 = vmul.f32 0.0078125, %v4430_v0 }
0x1a07   :  { %v4435_v21 = vadd.f32 1e-12, %v4433_v36 }
0x1a08   :  { %v4432_v22 = vpop.xlane.xlu0 %4431 }
0x1a09   :  { %5715 = vrsqrt.f32 %v4435_v21  ;;  %v4434_v25 = vmul.f32 0.0078125, %v4432_v22 }
0x1a0b   :  { %v4436_v18 = vadd.f32 1e-12, %v4434_v25 }
0x1a0c   :  { %v4535_v2 = vpop.xlane.xlu0 %4534 }
0x1a0d   :  { %5717 = vrsqrt.f32 %v4436_v18  ;;  %v4536_v41 = vmax.f32 %v4535_v2, 1e-09 }
0x1a0f   :  { %5719 = vrcp.f32 %v4536_v41 }
0x1a16   :  { %v5716_v55 = vpop.eup %5715 }
0x1a17   :  { %v4439_v51 = vmul.f32 %v5716_v55, %v4425_v13 }
0x1a19   :  { %v4447_v30 = vmul.f32 %v4751_v28, %v4439_v51 }
0x1a1a   :  { %v5718_v26 = vpop.eup %5717 }
0x1a1b   :  { %v4440_v27 = vmul.f32 %v5718_v26, %v4426_v16  ;;  %v4455_v34 = vadd.f32 %v4752_v6, %v4447_v30 }
0x1a1c   :  { %v5720_v3 = vpop.eup %5719 }
0x1a1d   :  { %v4448_v52 = vmul.f32 %v4751_v28, %v4440_v27 }
0x1a1f   :  { %v4456_v37 = vadd.f32 %v4752_v6, %v4448_v52 }
0x1a21   :  { %5564 = vmatpush3.msra.mxu1 %v4456_v37 }
0x1a22   :  { %5565 = vmatprep.subr.mxu1 %v5816_v17 }
0x1a23   :  { %5566 = vmatpush3.msra.mxu1 %v4455_v34 }
0x1a24   :  { %5568 = vmatmul.mubr.msk.f32.vlgmr.msra.gmra.mxu1 %vm4458_vm7, %v4457_v33  ;;  %5570 = vmatprep.subr.mxu1 %v5816_v17 }
0x1a25   :  { %5571 = vmatpush3.msra.mxu1 %v4978_v39  ;;  %5602 = vmatprep.mubr.msk.f32.mxu1 %vm5817_vm0, %v5816_v17 }
0x1a26   :  { %5572 = vmatprep.subr.mxu1 %v5816_v17 }
0x1a27   :  { %5573 = vmatpush3.msra.mxu1 %v4977_v19 }
0x1a28   :  { %5574 = vmatprep.subr.mxu1 %v5816_v17 }
0x1a29   :  { %5575 = vmatpush3.msra.mxu1 %v4974_v38 }
0x1a2a   :  { %5576 = vmatprep.subr.mxu1 %v5816_v17 }
0x1a2b   :  { %5577 = vmatpush3.msra.mxu1 %v4973_v42 }
0x1a2c   :  { %5578 = vmatprep.subr.mxu1 %v5816_v17 }
0x1a2d   :  { %5579 = vmatpush3.msra.mxu1 %v4970_v43 }
0x1a2e   :  { %5580 = vmatprep.subr.mxu1 %v5816_v17 }
0x1a2f   :  { %5581 = vmatpush3.msra.mxu1 %v4969_v46 }
0x1a30   :  { %5582 = vmatprep.subr.mxu1 %v5816_v17 }
0x1a31   :  { %5583 = vmatpush3.msra.mxu1 %v4966_v47 }
0x1a32   :  { %5584 = vmatprep.subr.mxu1 %v5816_v17 }
0x1a33   :  { %5585 = vmatpush3.msra.mxu1 %v4965_v49 }
0x1a34   :  { %5586 = vmatprep.subr.mxu1 %v5816_v17 }
0x1a35   :  { %5587 = vmatpush3.msra.mxu1 %v4962_v53 }
0x1a36   :  { %5588 = vmatprep.subr.mxu1 %v5816_v17 }
0x1a37   :  { %5589 = vmatpush3.msra.mxu1 %v4961_v29 }
0x1a38   :  { %5590 = vmatprep.subr.mxu1 %v5816_v17 }
0x1a39   :  { %5591 = vmatpush3.msra.mxu1 %v4958_v56 }
0x1a3a   :  { %5592 = vmatprep.subr.mxu1 %v5816_v17 }
0x1a3b   :  { %5593 = vmatpush3.msra.mxu1 %v4957_v58 }
0x1a3c   :  { %5594 = vmatprep.subr.mxu1 %v5816_v17 }
0x1a3d   :  { %5595 = vmatpush3.msra.mxu1 %v4954_v59 }
0x1a3e   :  { %5596 = vmatprep.subr.mxu1 %v5816_v17 }
0x1a3f   :  { %5597 = vmatpush3.msra.mxu1 %v4953_v60 }
0x1a40   :  { %5598 = vmatprep.subr.mxu1 %v5816_v17 }
0x1a41   :  { %5599 = vmatpush3.msra.mxu1 %v4950_v62 }
0x1a42   :  { %5600 = vmatprep.subr.mxu1 %v5816_v17 }
0x1a43   :  { %5601 = vmatpush3.msra.mxu1 %v4949_v1 }
0x1ae4   :  { %v4528_v32 = vpop.f32.mrf.mxu1 }
0x1ae5   :  { %v4538_v4 = vmul.f32 %v5720_v3, %v4528_v32 }
0x1ae6   :  { %v5569_v5 = vpop.f32.mrf.mxu1 }
0x1ae7   :  { %5603 = vmatmul.mubr.f32.vlgmr.msra.gmra.mxu1 %v4538_v4 }
0x1ba7   :  { %v4644_v7 = vpop.f32.mrf.mxu1 }
0x1ba8   :  { %v4645_v63 = vadd.f32 %v4754_v50, %v4644_v7 }
0x1ba9   :  { %v5604_v8 = vpop.f32.mrf.mxu1 }
0x1baa   :  { %4648 = vst [vmem:[#allocation9] sm:$0x3] %v4645_v63 }
0x1bab   :  { %5792 = shalt.err (!%p5789_p5)
}
0x1bac   :  { %4658 = dma.vmem_to_hbm [thread:$0]  %s4656_s17, 32, %s6552_s19, [#allocation5]  }
0x1bad   :  { %5805 = dma.done.wait [#allocation5], 32  }
0x1bae   :  { %5806 = vsyncadd [#allocation5], 4294967264 }
0x1baf   :  { %4662 = vsyncpa [#allocation4], 1 }
0x1bb0   :  { %4663 = vsyncpa [#allocation7], 1 }
0x1bb1   :  { %4664 = vsyncpa [#allocation5], 1 }

</bundles_post_ra>
